<compile_context>
chip_gen: v6e
topology: v6e:2x2x1
jax: 0.10.0
libtpu: 0.0.40
codegen_flags: <defaults>
</compile_context>

<pallas_src>
import functools

import jax
import jax.numpy as jnp
from jax import lax
from jax.experimental import pallas as pl
from jax.experimental.pallas import tpu as pltpu


def _round_up(v, m):
    return (v + m - 1) // m * m


def _ds_insnorm_kernel(x_ref, w_dw_ref, gamma_ref, beta_ref, w_pw_ref, o_ref,
                       *scratch, H, W, K, S, P, QW, Ho, Wo, C, Cout, Nb, eps):
    # x_ref:    (Nb, H, W, C)   unpadded NHWC input block
    # w_dw_ref: (K, K, C)       depthwise weights, channels on lanes
    # gamma_ref/beta_ref: (1, C) instance-norm affine params
    # w_pw_ref: (C, Cout)       pointwise 1x1 weights
    # o_ref:    (Nb, Cout, Ho*Wo)  lane-dense, NCHW-contiguous output block
    x = x_ref[...].astype(jnp.float32)

    # ---- zero-padding folded into the kernel (VMEM scratch, no HBM pad) ----
    if P > 0:
        xpad_ref, = scratch
        xpad_ref[...] = jnp.zeros(xpad_ref.shape, jnp.float32)
        # W offset QW is rounded up to a multiple of 8 so this interior store
        # is sublane-aligned (H/Nb are major dims: any offset is fine).
        xpad_ref[:, P:P + H, QW:QW + W, :] = x
        xp = xpad_ref[...]
    else:
        xp = x

    # ---- depthwise conv: K*K static taps, f32 accumulator stays in VMEM ----
    w_dw = w_dw_ref[...].astype(jnp.float32)          # single hoisted load
    acc = jnp.zeros((Nb, Ho, Wo, C), jnp.float32)
    for kh in range(K):                                # K small & static
        for kw in range(K):
            c0 = kw + QW - P                           # column start in scratch
            patch = lax.slice(
                xp,
                (0, kh, c0, 0),
                (Nb, kh + (Ho - 1) * S + 1, c0 + (Wo - 1) * S + 1, C),
                (1, S, S, 1))
            acc = acc + patch * w_dw[kh, kw]

    # ---- instance-norm stats: per sample, per channel, over (Ho, Wo) ----
    accr = acc.reshape(Nb, Ho * Wo, C)                 # last dim unchanged
    inv_npx = 1.0 / float(Ho * Wo)
    mean = jnp.sum(accr, axis=1) * inv_npx             # (Nb, C)
    # NOTE: single-pass E[x^2]-E[x]^2 in f32 (depthwise outputs are O(1) after
    # normalization upstream; matches PyTorch's biased variance).
    ex2 = jnp.sum(accr * accr, axis=1) * inv_npx
    var = ex2 - mean * mean
    inv_std = lax.rsqrt(var + eps)

    # ---- fold IN affine into the pointwise weights (no full-tensor FMA) ----
    scale = gamma_ref[...] * inv_std                    # (Nb, C)
    shift = beta_ref[...] - mean * scale                # (Nb, C)
    w_pw = w_pw_ref[...].astype(jnp.float32)            # (C, Cout)
    w_eff = scale[:, :, None] * w_pw[None, :, :]        # (Nb, C, Cout)
    bias = jnp.sum(shift[:, :, None] * w_pw[None, :, :], axis=1)   # (Nb, Cout)

    # ---- pointwise 1x1 conv == one batched MXU matmul per grid step ----
    lhs, rhs = accr, w_eff
    if C >= 64:    # bf16 MXU path for real MobileNet widths (static branch)
        lhs = lhs.astype(jnp.bfloat16)
        rhs = rhs.astype(jnp.bfloat16)
    y = jnp.einsum('npc,nco->npo', lhs, rhs,
                   preferred_element_type=jnp.float32)   # (Nb, Ho*Wo, Cout)
    # one small minor-dims transpose -> lane-dense (Nb, Cout, Ho*Wo) slab
    y = jnp.transpose(y, (0, 2, 1)) + bias[:, :, None]
    o_ref[...] = y.astype(o_ref.dtype)


def _ds_insnorm_pallas(x_nhwc, w_dw_kkc, gamma_1c, beta_1c, w_pw_cc,
                       *, K, S, P, Ho, Wo, eps):
    """Core fused kernel. x_nhwc: (N,H,W,C) unpadded. Returns (N,Cout,Ho*Wo)."""
    N, H, W, C = x_nhwc.shape
    Cout = w_pw_cc.shape[1]

    # In-kernel padding geometry: x lives at rows [P, P+H) and cols [QW, QW+W)
    # of the scratch; QW is sublane-aligned so the interior store is unmasked.
    QW = _round_up(P, 8) if P > 0 else 0
    Hs = H + 2 * P
    Ws = max((Wo - 1) * S + (K - 1) + QW - P + 1, QW + W)

    itemsize = x_nhwc.dtype.itemsize

    def footprint(nb):
        in_blk = nb * H * W * C * itemsize
        out_blk = nb * Cout * Ho * Wo * 4
        pad_scr = (nb * Hs * Ws * C * 4) if P > 0 else 0
        live = nb * Ho * Wo * (3 * C + 2 * Cout) * 4     # acc/patch + matmul temps
        wts = (K * K * C + 2 * C + C * Cout) * 4
        return 2 * in_blk + 2 * out_blk + pad_scr + live + wts

    VMEM_BUDGET = 48 * 1024 * 1024   # stay well under v7x's 64 MiB physical VMEM

    # Batch Nb samples per grid step (amortize per-step overhead, fatten the MXU
    # M dim) but keep the ("parallel",) grid length >= 2 so both v7x TensorCores
    # stay busy, and stay inside the VMEM budget.
    Nb = 1
    for nb in range(1, N + 1):
        if N % nb != 0:
            continue
        if N >= 2 and (N // nb) < 2:
            continue
        if footprint(nb) > VMEM_BUDGET:
            continue
        Nb = nb
    # TODO(synk): if footprint(1) exceeds the budget (very large H*W*C layers),
    # an Ho-tiled two-pass variant (stats pass, then normalize+matmul pass) is
    # required; not needed at MobileNet-like sizes.

    vmem_limit = int(min(max(2 * footprint(Nb), 8 * 1024 * 1024), VMEM_BUDGET))

    scratch_shapes = []
    if P > 0:
        scratch_shapes.append(pltpu.VMEM((Nb, Hs, Ws, C), jnp.float32))

    kern = functools.partial(
        _ds_insnorm_kernel, H=H, W=W, K=K, S=S, P=P, QW=QW,
        Ho=Ho, Wo=Wo, C=C, Cout=Cout, Nb=Nb, eps=eps)

    return pl.pallas_call(
        kern,
        out_shape=jax.ShapeDtypeStruct((N, Cout, Ho * Wo), jnp.float32),
        grid_spec=pltpu.PrefetchScalarGridSpec(
            num_scalar_prefetch=0,
            grid=(N // Nb,),
            in_specs=[
                pl.BlockSpec((Nb, H, W, C), lambda n: (n, 0, 0, 0)),
                pl.BlockSpec((K, K, C), lambda n: (0, 0, 0)),
                pl.BlockSpec((1, C), lambda n: (0, 0)),
                pl.BlockSpec((1, C), lambda n: (0, 0)),
                pl.BlockSpec((C, Cout), lambda n: (0, 0)),
            ],
            out_specs=pl.BlockSpec((Nb, Cout, Ho * Wo), lambda n: (n, 0, 0)),
            scratch_shapes=scratch_shapes,
        ),
        compiler_params=pltpu.CompilerParams(
            dimension_semantics=("parallel",),
            vmem_limit_bytes=vmem_limit),
    )(x_nhwc, w_dw_kkc, gamma_1c, beta_1c, w_pw_cc)


def conv2d_ds_insnorm_forward(x_nchw, w_dw, gamma, beta, w_pw,
                              *, stride=1, padding=0, eps=1e-5):
    """Conv2d_DS_insnorm forward (matches the PyTorch module, bias=False).
    x_nchw: (N, C, H, W); w_dw: (C, 1, K, K); gamma/beta: (C,);
    w_pw: (Cout, C, 1, 1).  Returns (N, Cout, Ho, Wo)."""
    N, C, H, W = x_nchw.shape
    K = int(w_dw.shape[-1])
    Cout = int(w_pw.shape[0])
    S, P = int(stride), int(padding)
    Ho = (H + 2 * P - K) // S + 1
    Wo = (W + 2 * P - K) // S + 1

    # Single layout transpose at the module boundary (NCHW spec -> channels-last
    # compute layout).  The kernel emits NCHW-contiguous output directly, and
    # zero-padding is folded in-kernel, so there is no host-side pad and no
    # output transpose.
    # TODO(synk): in a full channels-last MobileNet pipeline this input
    # transpose disappears too (keep activations NHWC end-to-end).
    x_nhwc = jnp.transpose(x_nchw, (0, 2, 3, 1))
    w_dw_kkc = jnp.transpose(w_dw[:, 0, :, :], (1, 2, 0))     # (K, K, C)
    w_pw_cc = jnp.transpose(w_pw[:, :, 0, 0], (1, 0))         # (C, Cout)

    out_flat = _ds_insnorm_pallas(
        x_nhwc, w_dw_kkc, gamma.reshape(1, C), beta.reshape(1, C), w_pw_cc,
        K=K, S=S, P=P, Ho=Ho, Wo=Wo, eps=eps)
    return out_flat.reshape(N, Cout, Ho, Wo)                  # free bitcast


def reference_forward(x, w_dw, gamma, beta, w_pw, *, stride, padding, eps=1e-5):
    """Pure-JAX NCHW reference matching PyTorch Conv2d_DS_insnorm.forward
    (InstanceNorm2d: per-sample per-channel stats over H,W, biased var)."""
    dw = lax.conv_general_dilated(
        x, w_dw, window_strides=(stride, stride),
        padding=((padding, padding), (padding, padding)),
        dimension_numbers=("NCHW", "OIHW", "NCHW"),
        feature_group_count=x.shape[1])
    mean = jnp.mean(dw, axis=(2, 3), keepdims=True)
    var = jnp.mean((dw - mean) ** 2, axis=(2, 3), keepdims=True)
    inorm = (dw - mean) / jnp.sqrt(var + eps) * gamma.reshape(1, -1, 1, 1) \
            + beta.reshape(1, -1, 1, 1)
    return lax.conv_general_dilated(
        inorm, w_pw, window_strides=(1, 1), padding=((0, 0), (0, 0)),
        dimension_numbers=("NCHW", "OIHW", "NCHW"))


if __name__ == "__main__":
    # Small shapes consistent with the module: N=2, C_in=8, H=W=16, K=3, C_out=16.
    N, C_in, H, W = 2, 8, 16, 16
    C_out, K, stride, padding = 16, 3, 1, 1

    key = jax.random.PRNGKey(0)
    k1, k2, k3, k4, k5 = jax.random.split(key, 5)

    x = jax.random.normal(k1, (N, C_in, H, W), jnp.float32)
    w_dw = jax.random.normal(k2, (C_in, 1, K, K), jnp.float32) * 0.2      # depthwise weights
    w_pw = jax.random.normal(k3, (C_out, C_in, 1, 1), jnp.float32) * 0.2  # pointwise weights
    gamma = 1.0 + 0.1 * jax.random.normal(k4, (C_in,), jnp.float32)       # IN affine weight
    beta = 0.1 * jax.random.normal(k5, (C_in,), jnp.float32)              # IN affine bias

    out = conv2d_ds_insnorm_forward(x, w_dw, gamma, beta, w_pw,
                                    stride=stride, padding=padding)
    out = jax.block_until_ready(out)

    ref = reference_forward(x, w_dw, gamma, beta, w_pw,
                            stride=stride, padding=padding)
    ref = jax.block_until_ready(ref)

    assert out.shape == (N, C_out, H, W), out.shape
    assert jnp.allclose(out, ref, atol=1e-3, rtol=1e-3), \
        float(jnp.max(jnp.abs(out - ref)))
    print("KERNEL_OK")
</pallas_src>

<mosaic_0001>
module attributes {stable_mosaic.version = 11 : i64} {
  func.func @_ds_insnorm_kernel(%arg0: i32, %arg1: memref<1x16x16x8xf32, #tpu.memory_space<vmem>>, %arg2: memref<3x3x8xf32, #tpu.memory_space<vmem>>, %arg3: memref<1x8xf32, #tpu.memory_space<vmem>>, %arg4: memref<1x8xf32, #tpu.memory_space<vmem>>, %arg5: memref<8x16xf32, #tpu.memory_space<vmem>>, %arg6: memref<1x16x256xf32, #tpu.memory_space<vmem>>, %arg7: memref<1x18x25x8xf32, #tpu.memory_space<vmem>>) attributes {dimension_semantics = [#tpu.dimension_semantics<parallel>], iteration_bounds = array<i64: 2>, scalar_prefetch = 0 : i64, scratch_operands = 1 : i64, tpu.core_type = #tpu.core_type<tc>, window_params = [{transform_indices = @transform_0, window_bounds = array<i64: 1, 16, 16, 8>}, {pipeline_mode = #tpu.pipeline_mode<synchronous>, transform_indices = @transform_1, window_bounds = array<i64: 3, 3, 8>}, {pipeline_mode = #tpu.pipeline_mode<synchronous>, transform_indices = @transform_2, window_bounds = array<i64: 1, 8>}, {pipeline_mode = #tpu.pipeline_mode<synchronous>, transform_indices = @transform_3, window_bounds = array<i64: 1, 8>}, {pipeline_mode = #tpu.pipeline_mode<synchronous>, transform_indices = @transform_4, window_bounds = array<i64: 8, 16>}, {transform_indices = @transform_5, window_bounds = array<i64: 1, 16, 256>}]} {
    %c0 = arith.constant 0 : index
    %c0_0 = arith.constant 0 : index
    %c0_1 = arith.constant 0 : index
    %c0_2 = arith.constant 0 : index
    %0 = vector.load %arg1[%c0, %c0_0, %c0_1, %c0_2] : memref<1x16x16x8xf32, #tpu.memory_space<vmem>>, vector<1x16x16x8xf32>
    %cst = arith.constant 0.000000e+00 : f32
    %1 = vector.broadcast %cst : f32 to vector<1x18x25x8xf32>
    %c0_3 = arith.constant 0 : index
    %c0_4 = arith.constant 0 : index
    %c0_5 = arith.constant 0 : index
    %c0_6 = arith.constant 0 : index
    %2 = vector.load %arg7[%c0_3, %c0_4, %c0_5, %c0_6] : memref<1x18x25x8xf32, #tpu.memory_space<vmem>>, vector<1x18x25x8xf32>
    tpu.vector_store %arg7[%c0_3, %c0_4, %c0_5, %c0_6], %1 {strides = array<i32>} : memref<1x18x25x8xf32, #tpu.memory_space<vmem>>, vector<1x18x25x8xf32>,
    %c0_7 = arith.constant 0 : index
    %c1 = arith.constant 1 : index
    %c8 = arith.constant 8 : index
    %c0_8 = arith.constant 0 : index
    %3 = vector.load %arg7[%c0_7, %c1, %c8, %c0_8] : memref<1x18x25x8xf32, #tpu.memory_space<vmem>>, vector<1x16x16x8xf32>
    tpu.vector_store %arg7[%c0_7, %c1, %c8, %c0_8], %0 {strides = array<i32>} : memref<1x18x25x8xf32, #tpu.memory_space<vmem>>, vector<1x16x16x8xf32>,
    %c0_9 = arith.constant 0 : index
    %c0_10 = arith.constant 0 : index
    %c0_11 = arith.constant 0 : index
    %c0_12 = arith.constant 0 : index
    %4 = vector.load %arg7[%c0_9, %c0_10, %c0_11, %c0_12] : memref<1x18x25x8xf32, #tpu.memory_space<vmem>>, vector<1x18x25x8xf32>
    %c0_13 = arith.constant 0 : index
    %c0_14 = arith.constant 0 : index
    %c0_15 = arith.constant 0 : index
    %5 = vector.load %arg2[%c0_13, %c0_14, %c0_15] : memref<3x3x8xf32, #tpu.memory_space<vmem>>, vector<3x3x8xf32>
    %cst_16 = arith.constant 0.000000e+00 : f32
    %6 = vector.broadcast %cst_16 : f32 to vector<1x16x16x8xf32>
    %7 = vector.extract_strided_slice %4 {offsets = [0, 0, 7, 0], sizes = [1, 16, 16, 8], strides = [1, 1, 1, 1]} : vector<1x18x25x8xf32> to vector<1x16x16x8xf32>
    %8 = vector.extract_strided_slice %5 {offsets = [0, 0, 0], sizes = [1, 1, 8], strides = [1, 1, 1]} : vector<3x3x8xf32> to vector<1x1x8xf32>
    %9 = vector.shape_cast %8 : vector<1x1x8xf32> to vector<8xf32>
    %10 = vector.shape_cast %9 : vector<8xf32> to vector<1x1x1x8xf32>
    %11 = vector.broadcast %10 : vector<1x1x1x8xf32> to vector<1x16x16x8xf32>
    %12 = arith.mulf %7, %11 : vector<1x16x16x8xf32>
    %13 = arith.addf %6, %12 : vector<1x16x16x8xf32>
    %14 = vector.extract_strided_slice %4 {offsets = [0, 0, 8, 0], sizes = [1, 16, 16, 8], strides = [1, 1, 1, 1]} : vector<1x18x25x8xf32> to vector<1x16x16x8xf32>
    %15 = vector.extract_strided_slice %5 {offsets = [0, 1, 0], sizes = [1, 1, 8], strides = [1, 1, 1]} : vector<3x3x8xf32> to vector<1x1x8xf32>
    %16 = vector.shape_cast %15 : vector<1x1x8xf32> to vector<8xf32>
    %17 = vector.shape_cast %16 : vector<8xf32> to vector<1x1x1x8xf32>
    %18 = vector.broadcast %17 : vector<1x1x1x8xf32> to vector<1x16x16x8xf32>
    %19 = arith.mulf %14, %18 : vector<1x16x16x8xf32>
    %20 = arith.addf %13, %19 : vector<1x16x16x8xf32>
    %21 = vector.extract_strided_slice %4 {offsets = [0, 0, 9, 0], sizes = [1, 16, 16, 8], strides = [1, 1, 1, 1]} : vector<1x18x25x8xf32> to vector<1x16x16x8xf32>
    %22 = vector.extract_strided_slice %5 {offsets = [0, 2, 0], sizes = [1, 1, 8], strides = [1, 1, 1]} : vector<3x3x8xf32> to vector<1x1x8xf32>
    %23 = vector.shape_cast %22 : vector<1x1x8xf32> to vector<8xf32>
    %24 = vector.shape_cast %23 : vector<8xf32> to vector<1x1x1x8xf32>
    %25 = vector.broadcast %24 : vector<1x1x1x8xf32> to vector<1x16x16x8xf32>
    %26 = arith.mulf %21, %25 : vector<1x16x16x8xf32>
    %27 = arith.addf %20, %26 : vector<1x16x16x8xf32>
    %28 = vector.extract_strided_slice %4 {offsets = [0, 1, 7, 0], sizes = [1, 16, 16, 8], strides = [1, 1, 1, 1]} : vector<1x18x25x8xf32> to vector<1x16x16x8xf32>
    %29 = vector.extract_strided_slice %5 {offsets = [1, 0, 0], sizes = [1, 1, 8], strides = [1, 1, 1]} : vector<3x3x8xf32> to vector<1x1x8xf32>
    %30 = vector.shape_cast %29 : vector<1x1x8xf32> to vector<8xf32>
    %31 = vector.shape_cast %30 : vector<8xf32> to vector<1x1x1x8xf32>
    %32 = vector.broadcast %31 : vector<1x1x1x8xf32> to vector<1x16x16x8xf32>
    %33 = arith.mulf %28, %32 : vector<1x16x16x8xf32>
    %34 = arith.addf %27, %33 : vector<1x16x16x8xf32>
    %35 = vector.extract_strided_slice %4 {offsets = [0, 1, 8, 0], sizes = [1, 16, 16, 8], strides = [1, 1, 1, 1]} : vector<1x18x25x8xf32> to vector<1x16x16x8xf32>
    %36 = vector.extract_strided_slice %5 {offsets = [1, 1, 0], sizes = [1, 1, 8], strides = [1, 1, 1]} : vector<3x3x8xf32> to vector<1x1x8xf32>
    %37 = vector.shape_cast %36 : vector<1x1x8xf32> to vector<8xf32>
    %38 = vector.shape_cast %37 : vector<8xf32> to vector<1x1x1x8xf32>
    %39 = vector.broadcast %38 : vector<1x1x1x8xf32> to vector<1x16x16x8xf32>
    %40 = arith.mulf %35, %39 : vector<1x16x16x8xf32>
    %41 = arith.addf %34, %40 : vector<1x16x16x8xf32>
    %42 = vector.extract_strided_slice %4 {offsets = [0, 1, 9, 0], sizes = [1, 16, 16, 8], strides = [1, 1, 1, 1]} : vector<1x18x25x8xf32> to vector<1x16x16x8xf32>
    %43 = vector.extract_strided_slice %5 {offsets = [1, 2, 0], sizes = [1, 1, 8], strides = [1, 1, 1]} : vector<3x3x8xf32> to vector<1x1x8xf32>
    %44 = vector.shape_cast %43 : vector<1x1x8xf32> to vector<8xf32>
    %45 = vector.shape_cast %44 : vector<8xf32> to vector<1x1x1x8xf32>
    %46 = vector.broadcast %45 : vector<1x1x1x8xf32> to vector<1x16x16x8xf32>
    %47 = arith.mulf %42, %46 : vector<1x16x16x8xf32>
    %48 = arith.addf %41, %47 : vector<1x16x16x8xf32>
    %49 = vector.extract_strided_slice %4 {offsets = [0, 2, 7, 0], sizes = [1, 16, 16, 8], strides = [1, 1, 1, 1]} : vector<1x18x25x8xf32> to vector<1x16x16x8xf32>
    %50 = vector.extract_strided_slice %5 {offsets = [2, 0, 0], sizes = [1, 1, 8], strides = [1, 1, 1]} : vector<3x3x8xf32> to vector<1x1x8xf32>
    %51 = vector.shape_cast %50 : vector<1x1x8xf32> to vector<8xf32>
    %52 = vector.shape_cast %51 : vector<8xf32> to vector<1x1x1x8xf32>
    %53 = vector.broadcast %52 : vector<1x1x1x8xf32> to vector<1x16x16x8xf32>
    %54 = arith.mulf %49, %53 : vector<1x16x16x8xf32>
    %55 = arith.addf %48, %54 : vector<1x16x16x8xf32>
    %56 = vector.extract_strided_slice %4 {offsets = [0, 2, 8, 0], sizes = [1, 16, 16, 8], strides = [1, 1, 1, 1]} : vector<1x18x25x8xf32> to vector<1x16x16x8xf32>
    %57 = vector.extract_strided_slice %5 {offsets = [2, 1, 0], sizes = [1, 1, 8], strides = [1, 1, 1]} : vector<3x3x8xf32> to vector<1x1x8xf32>
    %58 = vector.shape_cast %57 : vector<1x1x8xf32> to vector<8xf32>
    %59 = vector.shape_cast %58 : vector<8xf32> to vector<1x1x1x8xf32>
    %60 = vector.broadcast %59 : vector<1x1x1x8xf32> to vector<1x16x16x8xf32>
    %61 = arith.mulf %56, %60 : vector<1x16x16x8xf32>
    %62 = arith.addf %55, %61 : vector<1x16x16x8xf32>
    %63 = vector.extract_strided_slice %4 {offsets = [0, 2, 9, 0], sizes = [1, 16, 16, 8], strides = [1, 1, 1, 1]} : vector<1x18x25x8xf32> to vector<1x16x16x8xf32>
    %64 = vector.extract_strided_slice %5 {offsets = [2, 2, 0], sizes = [1, 1, 8], strides = [1, 1, 1]} : vector<3x3x8xf32> to vector<1x1x8xf32>
    %65 = vector.shape_cast %64 : vector<1x1x8xf32> to vector<8xf32>
    %66 = vector.shape_cast %65 : vector<8xf32> to vector<1x1x1x8xf32>
    %67 = vector.broadcast %66 : vector<1x1x1x8xf32> to vector<1x16x16x8xf32>
    %68 = arith.mulf %63, %67 : vector<1x16x16x8xf32>
    %69 = arith.addf %62, %68 : vector<1x16x16x8xf32>
    %70 = vector.shape_cast %69 : vector<1x16x16x8xf32> to vector<1x256x8xf32>
    %cst_17 = arith.constant dense<0.000000e+00> : vector<1x8xf32>
    %71 = vector.multi_reduction <add>, %70, %cst_17 [1] : vector<1x256x8xf32> to vector<1x8xf32>
    %cst_18 = arith.constant 3.906250e-03 : f32
    %72 = vector.broadcast %cst_18 : f32 to vector<1x8xf32>
    %73 = arith.mulf %71, %72 : vector<1x8xf32>
    %74 = arith.mulf %70, %70 : vector<1x256x8xf32>
    %cst_19 = arith.constant dense<0.000000e+00> : vector<1x8xf32>
    %75 = vector.multi_reduction <add>, %74, %cst_19 [1] : vector<1x256x8xf32> to vector<1x8xf32>
    %cst_20 = arith.constant 3.906250e-03 : f32
    %76 = vector.broadcast %cst_20 : f32 to vector<1x8xf32>
    %77 = arith.mulf %75, %76 : vector<1x8xf32>
    %78 = arith.mulf %73, %73 : vector<1x8xf32>
    %79 = arith.subf %77, %78 : vector<1x8xf32>
    %cst_21 = arith.constant 9.99999974E-6 : f32
    %80 = vector.broadcast %cst_21 : f32 to vector<1x8xf32>
    %81 = arith.addf %79, %80 : vector<1x8xf32>
    %82 = math.rsqrt %81 : vector<1x8xf32>
    %c0_22 = arith.constant 0 : index
    %c0_23 = arith.constant 0 : index
    %83 = vector.load %arg3[%c0_22, %c0_23] : memref<1x8xf32, #tpu.memory_space<vmem>>, vector<1x8xf32>
    %84 = arith.mulf %83, %82 : vector<1x8xf32>
    %c0_24 = arith.constant 0 : index
    %c0_25 = arith.constant 0 : index
    %85 = vector.load %arg4[%c0_24, %c0_25] : memref<1x8xf32, #tpu.memory_space<vmem>>, vector<1x8xf32>
    %86 = arith.mulf %73, %84 : vector<1x8xf32>
    %87 = arith.subf %85, %86 : vector<1x8xf32>
    %c0_26 = arith.constant 0 : index
    %c0_27 = arith.constant 0 : index
    %88 = vector.load %arg5[%c0_26, %c0_27] : memref<8x16xf32, #tpu.memory_space<vmem>>, vector<8x16xf32>
    %89 = vector.shape_cast %84 : vector<1x8xf32> to vector<1x8x1xf32>
    %90 = vector.shape_cast %88 : vector<8x16xf32> to vector<1x8x16xf32>
    %91 = vector.broadcast %89 : vector<1x8x1xf32> to vector<1x8x16xf32>
    %92 = arith.mulf %91, %90 : vector<1x8x16xf32>
    %93 = vector.shape_cast %87 : vector<1x8xf32> to vector<1x8x1xf32>
    %94 = vector.shape_cast %88 : vector<8x16xf32> to vector<1x8x16xf32>
    %95 = vector.broadcast %93 : vector<1x8x1xf32> to vector<1x8x16xf32>
    %96 = arith.mulf %95, %94 : vector<1x8x16xf32>
    %cst_28 = arith.constant dense<0.000000e+00> : vector<1x16xf32>
    %97 = vector.multi_reduction <add>, %96, %cst_28 [1] : vector<1x8x16xf32> to vector<1x16xf32>
    "tpu.trace_start"() <{level = 10 : i32, message = "npc,nco->npo"}> : () -> ()
    %cst_29 = arith.constant dense<0.000000e+00> : vector<1x256x16xf32>
    %98 = tpu.matmul %70, %92, %cst_29 {dimension_numbers = #tpu.dot_dimension_numbers<[2], [1], [1], [2], [0, 0, 0, 1, 1, 2], [0], [0]>} : vector<1x256x8xf32>, vector<1x8x16xf32>, vector<1x256x16xf32> -> vector<1x256x16xf32>
    "tpu.trace_stop"() : () -> ()
    %99 = tpu.transpose %98, [0, 2, 1] : vector<1x256x16xf32> -> vector<1x16x256xf32>
    %100 = vector.shape_cast %97 : vector<1x16xf32> to vector<1x16x1xf32>
    %101 = vector.broadcast %100 : vector<1x16x1xf32> to vector<1x16x256xf32>
    %102 = arith.addf %99, %101 : vector<1x16x256xf32>
    %c0_30 = arith.constant 0 : index
    %c0_31 = arith.constant 0 : index
    %c0_32 = arith.constant 0 : index
    %103 = vector.load %arg6[%c0_30, %c0_31, %c0_32] : memref<1x16x256xf32, #tpu.memory_space<vmem>>, vector<1x16x256xf32>
    tpu.vector_store %arg6[%c0_30, %c0_31, %c0_32], %102 {strides = array<i32>} : memref<1x16x256xf32, #tpu.memory_space<vmem>>, vector<1x16x256xf32>,
    return
  }
  func.func @transform_0(%arg0: i32) -> (i32, i32, i32, i32) {
    %c0_i32 = arith.constant 0 : i32
    %c0_i32_0 = arith.constant 0 : i32
    %c0_i32_1 = arith.constant 0 : i32
    %c0_i32_2 = arith.constant 0 : i32
    return %arg0, %c0_i32, %c0_i32_0, %c0_i32_1 : i32, i32, i32, i32
  }
  func.func @transform_1(%arg0: i32) -> (i32, i32, i32) {
    %c0_i32 = arith.constant 0 : i32
    %c0_i32_0 = arith.constant 0 : i32
    %c0_i32_1 = arith.constant 0 : i32
    %c0_i32_2 = arith.constant 0 : i32
    return %c0_i32, %c0_i32_0, %c0_i32_1 : i32, i32, i32
  }
  func.func @transform_2(%arg0: i32) -> (i32, i32) {
    %c0_i32 = arith.constant 0 : i32
    %c0_i32_0 = arith.constant 0 : i32
    %c0_i32_1 = arith.constant 0 : i32
    return %c0_i32, %c0_i32_0 : i32, i32
  }
  func.func @transform_3(%arg0: i32) -> (i32, i32) {
    %c0_i32 = arith.constant 0 : i32
    %c0_i32_0 = arith.constant 0 : i32
    %c0_i32_1 = arith.constant 0 : i32
    return %c0_i32, %c0_i32_0 : i32, i32
  }
  func.func @transform_4(%arg0: i32) -> (i32, i32) {
    %c0_i32 = arith.constant 0 : i32
    %c0_i32_0 = arith.constant 0 : i32
    %c0_i32_1 = arith.constant 0 : i32
    return %c0_i32, %c0_i32_0 : i32, i32
  }
  func.func @transform_5(%arg0: i32) -> (i32, i32, i32) {
    %c0_i32 = arith.constant 0 : i32
    %c0_i32_0 = arith.constant 0 : i32
    %c0_i32_1 = arith.constant 0 : i32
    return %arg0, %c0_i32, %c0_i32_0 : i32, i32, i32
  }
}

</mosaic_0001>

<bundles_post_ra>
// kernel: tpu_custom_call.1
= control target key start
LH: loop header
LB: loop body
LE: loop exit
PB: predicated region body
PF: predicated region fallthrough
CT: control target
= control target key end

     0   :  { %10 = vsyncpa [#allocation4], 0  ;;  %s7304_s0 = inlined_call_operand.vmem [shape: f32[2,16,16,8], index: 0, kind: input, shape index: {}]   ;;  %s7305_s1 = inlined_call_operand.vmem [shape: f32[3,3,8], index: 1, kind: input, shape index: {}]   ;;  %s7306_s2 = inlined_call_operand.vmem [shape: f32[1,8], index: 2, kind: input, shape index: {}]   ;;  %s7307_s3 = inlined_call_operand.vmem [shape: f32[1,8], index: 3, kind: input, shape index: {}]   ;;  %s7308_s4 = inlined_call_operand.vmem [shape: f32[8,16], index: 4, kind: input, shape index: {}]   ;;  %s7309_s5 = inlined_call_operand.hbm [shape: f32[2,16,256], index: 5, kind: output, shape index: {}]  }
   0x1   :  { %12 = vsyncpa [#allocation4 + $0x1], 0  ;;  %s3345_s18 = smov 0   ;;  %s3347_s19 = smov 0  }
   0x2   :  { %s3349_s20 = smov 0   ;;  %s3351_s21 = smov 0  }
   0x3 LB: > { %s3366_s22 = sadd.s32 4294967295, %s3309_s21   ;;  %s3014_s23 = sadd.s32 4294967294, %s3309_s21   ;;  %s3309_s21 = sphi %s3351_s21, %s8554_s21   ;;  %s3305_s20 = sphi %s3349_s20, %s8553_s20   ;;  %s3301_s19 = sphi %s3347_s19, %s8552_s19   ;;  %s3297_s18 = sphi %s3345_s18, %s8551_s18  }
   0x4   : > { %s3370_s24 = sadd.s32 1, %s3309_s21   ;;  %s135_s25 = sadd.s32 1, %s3305_s20 }
   0x5   : > { %s132_s26 = ssub.s32 %s3309_s21, %s3370_s24  ;;  %p145_p0 = scmp.ne.s32.totalorder %s3305_s20, %s3301_s19 }
   0x6   : > { %p133_p1 = scmp.eq.s32.totalorder %s132_s26, 0  ;;  %p146_p2 = scmp.eq.s32.totalorder %s3366_s22, 1 }
   0x7   : > { %p151_p3 = scmp.ne.s32.totalorder %s3301_s19, %s3297_s18  ;;  %p152_p4 = scmp.eq.s32.totalorder %s3014_s23, 1 }
   0x8   : > { %s3381_s27 = scalar_select %p133_p1, %s3305_s20, %s135_s25  }
   0x9   : > { %p3383_p5 = por %p146_p2, %p145_p0  ;;  %p3387_p6 = por %p152_p4, %p151_p3 }
   0xa   : > { %p3017_p7 = scmp.ge.s32.totalorder %s3309_s21, 1  ;;  %p190_p8 = scmp.lt.s32.totalorder %s3309_s21, 3 }
   0xc   : > { %p191_p9 = pnand %p3017_p7, %p190_p8 }
   0xe   : > { %194 = sbr.rel (%p191_p9) target bundleno = 1023 (0x3ff), region = 40 }
  0x13   : > { %p218_p10 = scmp.lt.s32.totalorder %s3366_s22, 1  ;;  %vm255_vm0 = vcmask 64512   ;;  %vm259_vm1 = vcmask 57344   ;;  %v3311_v0 = vmov 0.0   ;;  %v437_v25 = vlaneseq  ;;  %v434_v37 = vld [vmem:[%s7305_s1] sm:$0x7] }
  0x14   : > { %256 = vst.msk [vmem:[#allocation2] sm:$0xff] %vm255_vm0, %v3311_v0  ;;  %257 = vst.msk [vmem:[#allocation2 + $0x8] sm:$0xff] %vm255_vm0, %v3311_v0  ;;  %v435_v39 = vld [vmem:[%s7305_s1 + $0x4] sm:$0x7]  ;;  %vm605_vm2 = vcmask 1046528   ;;  %vm850_vm3 = vcmask 1045504  }
  0x15   : > { %258 = vst.msk [vmem:[#allocation2 + $0x10] sm:$0xff] %vm255_vm0, %v3311_v0  ;;  %261 = vst.msk [vmem:[#allocation2 + $0x20] sm:$0xff] %vm255_vm0, %v3311_v0  ;;  %s219_s30 = scalar_select %p218_p10, %s3366_s22, 1  ;;  %v438_v34 = vshrl.u32 %v437_v25, 7  ;;  %vm2251_vm4 = vcmask 1040384   ;;  %vm2562_vm5 = vcmask 130048  }
  0x16   : > { %260 = vst.msk [vmem:[#allocation2 + $0x18] sm:$0x1] %vm259_vm1, %v3311_v0  ;;  %264 = vst.msk [vmem:[#allocation2 + $0x38] sm:$0x1] %vm259_vm1, %v3311_v0  ;;  %s3059_s10 = sshll.u32 %s3366_s22, 9  ;;  %s3312_s15 = smov [#allocation3]  }
  0x17   : > { %262 = vst.msk [vmem:[#allocation2 + $0x28] sm:$0xff] %vm255_vm0, %v3311_v0  ;;  %263 = vst.msk [vmem:[#allocation2 + $0x30] sm:$0xff] %vm255_vm0, %v3311_v0  ;;  %s3058_s6 = sshll.u32 %s219_s30, 8  ;;  %v3610_v35 = vsub.s32 0, %v438_v34  ;;  %v3612_v36 = vsub.s32 1, %v438_v34  ;;  %v3617_v38 = vsub.s32 2, %v438_v34  ;;  %s7262_s13 = scalar_lea.hbm %s7309_s5, %s3059_s10 }
  0x18   : > { %265 = vst.msk [vmem:[#allocation2 + $0x40] sm:$0xff] %vm255_vm0, %v3311_v0  ;;  %266 = vst.msk [vmem:[#allocation2 + $0x48] sm:$0xff] %vm255_vm0, %v3311_v0  ;;  %s3544_s9 = scalar_lea.vmem %s7304_s0, %s3058_s6  ;;  %s215_s6 = sand.u32 1, %s3301_s19  }
  0x19   : > { %267 = vst.msk [vmem:[#allocation2 + $0x50] sm:$0xff] %vm255_vm0, %v3311_v0  ;;  %269 = vst.msk [vmem:[#allocation2 + $0x60] sm:$0xff] %vm255_vm0, %v3311_v0  ;;  %v223_v1 = vld [vmem:[%s3544_s9] sm:$0xff]  ;;  %v224_v2 = vld [vmem:[%s3544_s9 + $0x8] sm:$0xff]  ;;  %v3623_v40 = vrot.slane %v434_v37, %v3610_v35  ;;  %v3626_v41 = vrot.slane %v434_v37, %v3612_v36  ;;  %v3639_v48 = vrot.slane %v434_v37, %v3617_v38  ;;  %s3018_s7 = sshll.u32 %s215_s6, 5  ;;  %s7264_s14 = scalar_lea.sflag [#allocation4], %s215_s6 }
  0x1a   : > { %268 = vst.msk [vmem:[#allocation2 + $0x58] sm:$0x1] %vm259_vm1, %v3311_v0  ;;  %272 = vst.msk [vmem:[#allocation2 + $0x78] sm:$0x1] %vm259_vm1, %v3311_v0  ;;  %v225_v3 = vld [vmem:[%s3544_s9 + $0x10] sm:$0xff]  ;;  %v226_v4 = vld [vmem:[%s3544_s9 + $0x18] sm:$0xff]  ;;  %v3642_v49 = vrot.slane %v435_v39, %v3610_v35  ;;  %v3645_v50 = vrot.slane %v435_v39, %v3612_v36  ;;  %v3665_v57 = vrot.slane %v435_v39, %v3617_v38 }
  0x1b   : > { %270 = vst.msk [vmem:[#allocation2 + $0x68] sm:$0xff] %vm255_vm0, %v3311_v0  ;;  %271 = vst.msk [vmem:[#allocation2 + $0x70] sm:$0xff] %vm255_vm0, %v3311_v0  ;;  %v227_v5 = vld [vmem:[%s3544_s9 + $0x20] sm:$0xff]  ;;  %v228_v6 = vld [vmem:[%s3544_s9 + $0x28] sm:$0xff]  ;;  %s217_s8 = scalar_lea.vmem [#allocation3], %s3018_s7  ;;  %s3253_s16 = sshll.u32 %s3312_s15, 4  ;;  %s3254_s16 = int_to_ptr.vmem [resolvable:$false] %s3253_s16 }
  0x1c   : > { %273 = vst.msk [vmem:[#allocation2 + $0x80] sm:$0xff] %vm255_vm0, %v3311_v0  ;;  %274 = vst.msk [vmem:[#allocation2 + $0x88] sm:$0xff] %vm255_vm0, %v3311_v0  ;;  %v229_v7 = vld [vmem:[%s3544_s9 + $0x30] sm:$0xff]  ;;  %v230_v8 = vld [vmem:[%s3544_s9 + $0x38] sm:$0xff]  ;;  %s3255_s17 = scalar_lea.vmem %s3254_s16, 1024 }
  0x1d   : > { %275 = vst.msk [vmem:[#allocation2 + $0x90] sm:$0xff] %vm255_vm0, %v3311_v0  ;;  %277 = vst.msk [vmem:[#allocation2 + $0xa0] sm:$0xff] %vm255_vm0, %v3311_v0  ;;  %v231_v9 = vld [vmem:[%s3544_s9 + $0x40] sm:$0xff]  ;;  %v232_v10 = vld [vmem:[%s3544_s9 + $0x48] sm:$0xff] }
  0x1e   : > { %276 = vst.msk [vmem:[#allocation2 + $0x98] sm:$0x1] %vm259_vm1, %v3311_v0  ;;  %280 = vst.msk [vmem:[#allocation2 + $0xb8] sm:$0x1] %vm259_vm1, %v3311_v0  ;;  %v233_v11 = vld [vmem:[%s3544_s9 + $0x50] sm:$0xff]  ;;  %v234_v12 = vld [vmem:[%s3544_s9 + $0x58] sm:$0xff] }
  0x1f   : > { %278 = vst.msk [vmem:[#allocation2 + $0xa8] sm:$0xff] %vm255_vm0, %v3311_v0  ;;  %279 = vst.msk [vmem:[#allocation2 + $0xb0] sm:$0xff] %vm255_vm0, %v3311_v0  ;;  %v235_v13 = vld [vmem:[%s3544_s9 + $0x60] sm:$0xff]  ;;  %v236_v14 = vld [vmem:[%s3544_s9 + $0x68] sm:$0xff] }
  0x20   : > { %281 = vst.msk [vmem:[#allocation2 + $0xc0] sm:$0xff] %vm255_vm0, %v3311_v0  ;;  %282 = vst.msk [vmem:[#allocation2 + $0xc8] sm:$0xff] %vm255_vm0, %v3311_v0  ;;  %v237_v15 = vld [vmem:[%s3544_s9 + $0x70] sm:$0xff]  ;;  %v238_v16 = vld [vmem:[%s3544_s9 + $0x78] sm:$0xff] }
  0x21   : > { %283 = vst.msk [vmem:[#allocation2 + $0xd0] sm:$0xff] %vm255_vm0, %v3311_v0  ;;  %285 = vst.msk [vmem:[#allocation2 + $0xe0] sm:$0xff] %vm255_vm0, %v3311_v0  ;;  %v239_v17 = vld [vmem:[%s3544_s9 + $0x80] sm:$0xff]  ;;  %v240_v18 = vld [vmem:[%s3544_s9 + $0x88] sm:$0xff] }
  0x22   : > { %284 = vst.msk [vmem:[#allocation2 + $0xd8] sm:$0x1] %vm259_vm1, %v3311_v0  ;;  %288 = vst.msk [vmem:[#allocation2 + $0xf8] sm:$0x1] %vm259_vm1, %v3311_v0  ;;  %v241_v19 = vld [vmem:[%s3544_s9 + $0x90] sm:$0xff]  ;;  %v242_v20 = vld [vmem:[%s3544_s9 + $0x98] sm:$0xff] }
  0x23   : > { %286 = vst.msk [vmem:[#allocation2 + $0xe8] sm:$0xff] %vm255_vm0, %v3311_v0  ;;  %287 = vst.msk [vmem:[#allocation2 + $0xf0] sm:$0xff] %vm255_vm0, %v3311_v0  ;;  %v243_v21 = vld [vmem:[%s3544_s9 + $0xa0] sm:$0xff]  ;;  %v244_v22 = vld [vmem:[%s3544_s9 + $0xa8] sm:$0xff] }
  0x24   : > { %289 = vst.msk [vmem:[#allocation2 + $0x100] sm:$0xff] %vm255_vm0, %v3311_v0  ;;  %290 = vst.msk [vmem:[#allocation2 + $0x108] sm:$0xff] %vm255_vm0, %v3311_v0  ;;  %v245_v23 = vld [vmem:[%s3544_s9 + $0xb0] sm:$0xff]  ;;  %v246_v24 = vld [vmem:[%s3544_s9 + $0xb8] sm:$0xff] }
  0x25   : > { %291 = vst.msk [vmem:[#allocation2 + $0x110] sm:$0xff] %vm255_vm0, %v3311_v0  ;;  %293 = vst.msk [vmem:[#allocation2 + $0x120] sm:$0xff] %vm255_vm0, %v3311_v0  ;;  %v247_v26 = vld [vmem:[%s3544_s9 + $0xc0] sm:$0xff]  ;;  %v248_v27 = vld [vmem:[%s3544_s9 + $0xc8] sm:$0xff] }
  0x26   : > { %292 = vst.msk [vmem:[#allocation2 + $0x118] sm:$0x1] %vm259_vm1, %v3311_v0  ;;  %296 = vst.msk [vmem:[#allocation2 + $0x138] sm:$0x1] %vm259_vm1, %v3311_v0  ;;  %v249_v28 = vld [vmem:[%s3544_s9 + $0xd0] sm:$0xff]  ;;  %v250_v29 = vld [vmem:[%s3544_s9 + $0xd8] sm:$0xff] }
  0x27   : > { %294 = vst.msk [vmem:[#allocation2 + $0x128] sm:$0xff] %vm255_vm0, %v3311_v0  ;;  %295 = vst.msk [vmem:[#allocation2 + $0x130] sm:$0xff] %vm255_vm0, %v3311_v0  ;;  %v251_v30 = vld [vmem:[%s3544_s9 + $0xe0] sm:$0xff]  ;;  %v252_v31 = vld [vmem:[%s3544_s9 + $0xe8] sm:$0xff] }
  0x28   : > { %297 = vst.msk [vmem:[#allocation2 + $0x140] sm:$0xff] %vm255_vm0, %v3311_v0  ;;  %298 = vst.msk [vmem:[#allocation2 + $0x148] sm:$0xff] %vm255_vm0, %v3311_v0  ;;  %v253_v32 = vld [vmem:[%s3544_s9 + $0xf0] sm:$0xff]  ;;  %v254_v33 = vld [vmem:[%s3544_s9 + $0xf8] sm:$0xff]  ;;  %s2952_s9 = sshll.u32 %s217_s8, 4  ;;  %s7257_s9 = int_to_ptr.vmem [resolvable:$true] %s2952_s9 }
  0x29   : > { %299 = vst.msk [vmem:[#allocation2 + $0x150] sm:$0xff] %vm255_vm0, %v3311_v0  ;;  %301 = vst.msk [vmem:[#allocation2 + $0x160] sm:$0xff] %vm255_vm0, %v3311_v0  ;;  %v362_v42 = vld [vmem:[#allocation2] sm:$0xff]  ;;  %v3628_v43 = vld [vmem:[#allocation2 + $0x8] sm:$0xff]  ;;  %s3249_s22 = scalar_lea.vmem %s7257_s9, 512  ;;  %p3256_p0 = scmp.lt.s32.totalorder %s7257_s9, %s3254_s16 }
  0x2a   : > { %300 = vst.msk [vmem:[#allocation2 + $0x158] sm:$0x1] %vm259_vm1, %v3311_v0  ;;  %304 = vst.msk [vmem:[#allocation2 + $0x178] sm:$0x1] %vm259_vm1, %v3311_v0  ;;  %v3630_v44 = vld [vmem:[#allocation2 + $0x10] sm:$0xff]  ;;  %v3632_v45 = vld [vmem:[#allocation2 + $0x20] sm:$0xff]  ;;  %v3654_v54 = vmul.f32 %v3623_v40, %v362_v42  ;;  %v3658_v55 = vmul.f32 %v3623_v40, %v3628_v43  ;;  %v3662_v56 = vmul.f32 %v3626_v41, %v3628_v43  ;;  %p3250_p11 = scmp.ne.s32.totalorder %s7257_s9, %s3249_s22  ;;  %p3257_p1 = scmp.lt.s32.totalorder %s3255_s17, %s3249_s22 }
  0x2b   : > { %302 = vst.msk [vmem:[#allocation2 + $0x168] sm:$0xff] %vm255_vm0, %v3311_v0  ;;  %303 = vst.msk [vmem:[#allocation2 + $0x170] sm:$0xff] %vm255_vm0, %v3311_v0  ;;  %v3636_v47 = vld [vmem:[#allocation2 + $0x40] sm:$0xff]  ;;  %v3671_v59 = vmul.f32 %v3623_v40, %v3630_v44  ;;  %v3675_v60 = vmul.f32 %v3623_v40, %v3632_v45  ;;  %v3683_v62 = vmul.f32 %v3626_v41, %v3630_v44 }
  0x2c   : > { %305 = vst.msk [vmem:[#allocation2 + $0x180] sm:$0xff] %vm255_vm0, %v3311_v0  ;;  %306 = vst.msk [vmem:[#allocation2 + $0x188] sm:$0xff] %vm255_vm0, %v3311_v0  ;;  %v3651_v53 = vld [vmem:[#allocation2 + $0x60] sm:$0xff]  ;;  %p3251_p12 = pnand %p3250_p11, %p3383_p5  ;;  %p3258_p2 = por %p3257_p1, %p3256_p0 }
  0x2d   : > { %307 = vst.msk [vmem:[#allocation2 + $0x190] sm:$0xff] %vm255_vm0, %v3311_v0  ;;  %309 = vst.msk [vmem:[#allocation2 + $0x1a0] sm:$0xff] %vm255_vm0, %v3311_v0  ;;  %v3789_v34 = vld [vmem:[#allocation2 + $0x120] sm:$0xff] }
  0x2e   : > { %308 = vst.msk [vmem:[#allocation2 + $0x198] sm:$0x1] %vm259_vm1, %v3311_v0  ;;  %312 = vst.msk [vmem:[#allocation2 + $0x1b8] sm:$0x1] %vm259_vm1, %v3311_v0  ;;  %p3252_p13 = pneg %p3251_p12 }
  0x2f   : > { %310 = vst.msk [vmem:[#allocation2 + $0x1a8] sm:$0xff] %vm255_vm0, %v3311_v0  ;;  %311 = vst.msk [vmem:[#allocation2 + $0x1b0] sm:$0xff] %vm255_vm0, %v3311_v0 }
  0x30   : > { %313 = vst.msk [vmem:[#allocation2 + $0x1c0] sm:$0xff] %vm255_vm0, %v3311_v0  ;;  %314 = vst.msk [vmem:[#allocation2 + $0x1c8] sm:$0xff] %vm255_vm0, %v3311_v0  ;;  %p3259_p3 = pnand %p3258_p2, %p3252_p13 }
  0x31   : > { %315 = vst.msk [vmem:[#allocation2 + $0x1d0] sm:$0xff] %vm255_vm0, %v3311_v0  ;;  %317 = vst.msk [vmem:[#allocation2 + $0x1e0] sm:$0xff] %vm255_vm0, %v3311_v0 }
  0x32   : > { %316 = vst.msk [vmem:[#allocation2 + $0x1d8] sm:$0x1] %vm259_vm1, %v3311_v0  ;;  %320 = vst.msk [vmem:[#allocation2 + $0x1f8] sm:$0x1] %vm259_vm1, %v3311_v0 }
  0x33   : > { %318 = vst.msk [vmem:[#allocation2 + $0x1e8] sm:$0xff] %vm255_vm0, %v3311_v0  ;;  %319 = vst.msk [vmem:[#allocation2 + $0x1f0] sm:$0xff] %vm255_vm0, %v3311_v0 }
  0x34   : > { %321 = vst.msk [vmem:[#allocation2 + $0x200] sm:$0xff] %vm255_vm0, %v3311_v0  ;;  %322 = vst.msk [vmem:[#allocation2 + $0x208] sm:$0xff] %vm255_vm0, %v3311_v0 }
  0x35   : > { %323 = vst.msk [vmem:[#allocation2 + $0x210] sm:$0xff] %vm255_vm0, %v3311_v0  ;;  %325 = vst.msk [vmem:[#allocation2 + $0x220] sm:$0xff] %vm255_vm0, %v3311_v0 }
  0x36   : > { %324 = vst.msk [vmem:[#allocation2 + $0x218] sm:$0x1] %vm259_vm1, %v3311_v0  ;;  %328 = vst.msk [vmem:[#allocation2 + $0x238] sm:$0x1] %vm259_vm1, %v3311_v0 }
  0x37   : > { %326 = vst.msk [vmem:[#allocation2 + $0x228] sm:$0xff] %vm255_vm0, %v3311_v0  ;;  %327 = vst.msk [vmem:[#allocation2 + $0x230] sm:$0xff] %vm255_vm0, %v3311_v0 }
  0x38   : > { %330 = vst.msk [vmem:[#allocation2 + $0x28] sm:$0xff] %vm255_vm0, %v223_v1  ;;  %331 = vst.msk [vmem:[#allocation2 + $0x30] sm:$0xff] %vm255_vm0, %v224_v2  ;;  %v3689_v1 = vld [vmem:[#allocation2 + $0x80] sm:$0xff] }
  0x39   : > { %332 = vst.msk [vmem:[#allocation2 + $0x48] sm:$0xff] %vm255_vm0, %v225_v3  ;;  %333 = vst.msk [vmem:[#allocation2 + $0x50] sm:$0xff] %vm255_vm0, %v226_v4  ;;  %v3697_v3 = vmul.f32 %v3623_v40, %v3636_v47 }
  0x3a   : > { %334 = vst.msk [vmem:[#allocation2 + $0x68] sm:$0xff] %vm255_vm0, %v227_v5  ;;  %335 = vst.msk [vmem:[#allocation2 + $0x70] sm:$0xff] %vm255_vm0, %v228_v6 }
  0x3b   : > { %336 = vst.msk [vmem:[#allocation2 + $0x88] sm:$0xff] %vm255_vm0, %v229_v7  ;;  %337 = vst.msk [vmem:[#allocation2 + $0x90] sm:$0xff] %vm255_vm0, %v230_v8  ;;  %v3709_v7 = vld [vmem:[#allocation2 + $0xa0] sm:$0xff] }
  0x3c   : > { %338 = vst.msk [vmem:[#allocation2 + $0xa8] sm:$0xff] %vm255_vm0, %v231_v9  ;;  %339 = vst.msk [vmem:[#allocation2 + $0xb0] sm:$0xff] %vm255_vm0, %v232_v10  ;;  %v3717_v9 = vmul.f32 %v3623_v40, %v3651_v53 }
  0x3d   : > { %340 = vst.msk [vmem:[#allocation2 + $0xc8] sm:$0xff] %vm255_vm0, %v233_v11  ;;  %341 = vst.msk [vmem:[#allocation2 + $0xd0] sm:$0xff] %vm255_vm0, %v234_v12 }
  0x3e   : > { %342 = vst.msk [vmem:[#allocation2 + $0xe8] sm:$0xff] %vm255_vm0, %v235_v13  ;;  %343 = vst.msk [vmem:[#allocation2 + $0xf0] sm:$0xff] %vm255_vm0, %v236_v14 }
  0x3f   : > { %344 = vst.msk [vmem:[#allocation2 + $0x108] sm:$0xff] %vm255_vm0, %v237_v15  ;;  %345 = vst.msk [vmem:[#allocation2 + $0x110] sm:$0xff] %vm255_vm0, %v238_v16  ;;  %v3634_v46 = vld [vmem:[#allocation2 + $0x28] sm:$0xff]  ;;  %v3647_v51 = vld [vmem:[#allocation2 + $0x30] sm:$0xff] }
  0x40   : > { %346 = vst.msk [vmem:[#allocation2 + $0x128] sm:$0xff] %vm255_vm0, %v239_v17  ;;  %347 = vst.msk [vmem:[#allocation2 + $0x130] sm:$0xff] %vm255_vm0, %v240_v18  ;;  %v3649_v52 = vld [vmem:[#allocation2 + $0x48] sm:$0xff]  ;;  %v3667_v58 = vld [vmem:[#allocation2 + $0x50] sm:$0xff]  ;;  %v3679_v61 = vmul.f32 %v3623_v40, %v3634_v46  ;;  %v3693_v2 = vmul.f32 %v3623_v40, %v3647_v51  ;;  %v3705_v5 = vmul.f32 %v3626_v41, %v3634_v46 }
  0x41   : > { %348 = vst.msk [vmem:[#allocation2 + $0x148] sm:$0xff] %vm255_vm0, %v241_v19  ;;  %349 = vst.msk [vmem:[#allocation2 + $0x150] sm:$0xff] %vm255_vm0, %v242_v20  ;;  %v3685_v63 = vld [vmem:[#allocation2 + $0x68] sm:$0xff]  ;;  %v3687_v0 = vld [vmem:[#allocation2 + $0x70] sm:$0xff]  ;;  %v3701_v4 = vmul.f32 %v3623_v40, %v3649_v52  ;;  %v3713_v8 = vmul.f32 %v3623_v40, %v3667_v58  ;;  %v3721_v10 = vmul.f32 %v3626_v41, %v3647_v51 }
  0x42   : > { %350 = vst.msk [vmem:[#allocation2 + $0x168] sm:$0xff] %vm255_vm0, %v243_v21  ;;  %351 = vst.msk [vmem:[#allocation2 + $0x170] sm:$0xff] %vm255_vm0, %v244_v22  ;;  %v3707_v6 = vld [vmem:[#allocation2 + $0x88] sm:$0xff]  ;;  %v3725_v11 = vmul.f32 %v3626_v41, %v3649_v52  ;;  %v3727_v12 = vld [vmem:[#allocation2 + $0x90] sm:$0xff]  ;;  %v3733_v14 = vmul.f32 %v3623_v40, %v3685_v63  ;;  %v3737_v15 = vmul.f32 %v3623_v40, %v3687_v0 }
  0x43   : > { %352 = vst.msk [vmem:[#allocation2 + $0x188] sm:$0xff] %vm255_vm0, %v245_v23  ;;  %353 = vst.msk [vmem:[#allocation2 + $0x190] sm:$0xff] %vm255_vm0, %v246_v24  ;;  %v3729_v13 = vld [vmem:[#allocation2 + $0xa8] sm:$0xff]  ;;  %v3741_v16 = vmul.f32 %v3626_v41, %v3667_v58  ;;  %v3744_v18 = vld [vmem:[#allocation2 + $0xb0] sm:$0xff]  ;;  %v3752_v21 = vmul.f32 %v3623_v40, %v3689_v1  ;;  %v3756_v22 = vmul.f32 %v3623_v40, %v3707_v6 }
  0x44   : > { %354 = vst.msk [vmem:[#allocation2 + $0x1a8] sm:$0xff] %vm255_vm0, %v247_v26  ;;  %355 = vst.msk [vmem:[#allocation2 + $0x1b0] sm:$0xff] %vm255_vm0, %v248_v27  ;;  %v3746_v19 = vld [vmem:[#allocation2 + $0xc0] sm:$0xff]  ;;  %v3748_v20 = vld [vmem:[#allocation2 + $0xc8] sm:$0xff]  ;;  %v3760_v23 = vmul.f32 %v3626_v41, %v3685_v63  ;;  %v3764_v24 = vmul.f32 %v3626_v41, %v3687_v0  ;;  %v3793_v37 = vmul.f32 %v3623_v40, %v3729_v13 }
  0x45   : > { %356 = vst.msk [vmem:[#allocation2 + $0x1c8] sm:$0xff] %vm255_vm0, %v249_v28  ;;  %357 = vst.msk [vmem:[#allocation2 + $0x1d0] sm:$0xff] %vm255_vm0, %v250_v29  ;;  %v3766_v25 = vld [vmem:[#allocation2 + $0xd0] sm:$0xff]  ;;  %v3768_v26 = vld [vmem:[#allocation2 + $0xe8] sm:$0xff]  ;;  %v3774_v28 = vmul.f32 %v3623_v40, %v3727_v12  ;;  %v3778_v29 = vmul.f32 %v3623_v40, %v3709_v7  ;;  %v3797_v39 = vmul.f32 %v3623_v40, %v3744_v18 }
  0x46   : > { %358 = vst.msk [vmem:[#allocation2 + $0x1e8] sm:$0xff] %vm255_vm0, %v251_v30  ;;  %359 = vst.msk [vmem:[#allocation2 + $0x1f0] sm:$0xff] %vm255_vm0, %v252_v31  ;;  %v3770_v27 = vld [vmem:[#allocation2 + $0xf0] sm:$0xff]  ;;  %v3782_v30 = vmul.f32 %v3626_v41, %v3707_v6  ;;  %v3801_v42 = vmul.f32 %v3626_v41, %v3727_v12  ;;  %v3805_v17 = vmul.f32 %v3626_v41, %v3729_v13 }
  0x47   : > { %360 = vst.msk [vmem:[#allocation2 + $0x208] sm:$0xff] %vm255_vm0, %v253_v32  ;;  %361 = vst.msk [vmem:[#allocation2 + $0x210] sm:$0xff] %vm255_vm0, %v254_v33  ;;  %v3785_v32 = vld [vmem:[#allocation2 + $0x108] sm:$0xff]  ;;  %v3787_v33 = vld [vmem:[#allocation2 + $0x110] sm:$0xff] }
  0x48   : > { %7534 = vst [vmem:[#allocation6_spill] sm:$0xff] %v3610_v35  ;;  %7535 = vst [vmem:[#allocation7_spill] sm:$0xff] %v3612_v36  ;;  %v3807_v31 = vld [vmem:[#allocation2 + $0x128] sm:$0xff]  ;;  %v3813_v36 = vmul.f32 %v3623_v40, %v3746_v19  ;;  %v3817_v35 = vmul.f32 %v3623_v40, %v3748_v20 }
  0x49   : > { %7536 = vst [vmem:[#allocation8_spill] sm:$0xff] %v3617_v38  ;;  %7537 = vst [vmem:[#allocation9_spill] sm:$0xff] %v3628_v43  ;;  %v3809_v38 = vld [vmem:[#allocation2 + $0x130] sm:$0xff] }
  0x4a   : > { %7538 = vst [vmem:[#allocation10_spill] sm:$0xff] %v3630_v44  ;;  %7539 = vst [vmem:[#allocation11_spill] sm:$0xff] %v3632_v45  ;;  %v3847_v45 = vld [vmem:[#allocation2 + $0x150] sm:$0xff] }
  0x4b   : > { %7540 = vst [vmem:[#allocation12_spill] sm:$0xff] %v3634_v46  ;;  %7541 = vst [vmem:[#allocation13_spill] sm:$0xff] %v3636_v47  ;;  %v3841_v47 = vmul.f32 %v3626_v41, %v3768_v26  ;;  %v3886_v46 = vmul.f32 %v3626_v41, %v3807_v31  ;;  %v3894_v44 = vld [vmem:[#allocation2 + $0x190] sm:$0xff] }
  0x4c   : > { %7542 = vst [vmem:[#allocation14_spill] sm:$0xff] %v3639_v48  ;;  %7543 = vst [vmem:[#allocation15_spill] sm:$0xff] %v3642_v49  ;;  %v3845_v49 = vmul.f32 %v3626_v41, %v3770_v27 }
  0x4d   : > { %7544 = vst [vmem:[#allocation16_spill] sm:$0xff] %v3645_v50  ;;  %7545 = vst [vmem:[#allocation17_spill] sm:$0xff] %v3647_v51  ;;  %v3825_v50 = vmul.f32 %v3626_v41, %v3744_v18  ;;  %v3882_v51 = vmul.f32 %v3623_v40, %v3809_v38 }
  0x4e   : > { %7546 = vst [vmem:[#allocation18_spill] sm:$0xff] %v3649_v52  ;;  %7547 = vst [vmem:[#allocation19_spill] sm:$0xff] %v3651_v53  ;;  %v3837_v53 = vmul.f32 %v3626_v41, %v3766_v25  ;;  %v3874_v52 = vld [vmem:[#allocation2 + $0x180] sm:$0xff] }
  0x4f   : > { %7548 = vst [vmem:[#allocation20_spill] sm:$0xff] %v3654_v54  ;;  %7549 = vst [vmem:[#allocation21_spill] sm:$0xff] %v3658_v55 }
  0x50   : > { %7550 = vst [vmem:[#allocation22_spill] sm:$0xff] %v3662_v56  ;;  %7551 = vst [vmem:[#allocation23_spill] sm:$0xff] %v3665_v57  ;;  %v3821_v57 = vmul.f32 %v3623_v40, %v3766_v25 }
  0x51   : > { %7552 = vst [vmem:[#allocation24_spill] sm:$0xff] %v3667_v58  ;;  %7553 = vst [vmem:[#allocation25_spill] sm:$0xff] %v3671_v59  ;;  %v3872_v58 = vld [vmem:[#allocation2 + $0x170] sm:$0xff] }
  0x52   : > { %7554 = vst [vmem:[#allocation26_spill] sm:$0xff] %v3675_v60  ;;  %7555 = vst [vmem:[#allocation27_spill] sm:$0xff] %v3679_v61 }
  0x53   : > { %7556 = vst [vmem:[#allocation28_spill] sm:$0xff] %v3683_v62  ;;  %7557 = vst [vmem:[#allocation29_spill] sm:$0xff] %v3685_v63 }
  0x54   : > { %7558 = vst [vmem:[#allocation30_spill] sm:$0xff] %v3687_v0  ;;  %7559 = vst [vmem:[#allocation31_spill] sm:$0xff] %v3689_v1  ;;  %v3829_v1 = vld [vmem:[#allocation2 + $0x148] sm:$0xff]  ;;  %v7600_v0 = vrot.slane %v3662_v56, 1 }
  0x55   : > { %7560 = vst [vmem:[#allocation32_spill] sm:$0xff] %v3693_v2  ;;  %7561 = vst [vmem:[#allocation33_spill] sm:$0xff] %v3697_v3  ;;  %v3902_v43 = vmul.f32 %v3623_v40, %v3829_v1 }
  0x56   : > { %7562 = vst [vmem:[#allocation34_spill] sm:$0xff] %v3701_v4  ;;  %7563 = vst [vmem:[#allocation35_spill] sm:$0xff] %v3705_v5  ;;  %v3965_v4 = vld [vmem:[#allocation2 + $0x1f0] sm:$0xff] }
  0x57   : > { %7564 = vst [vmem:[#allocation36_spill] sm:$0xff] %v3707_v6  ;;  %7565 = vst [vmem:[#allocation37_spill] sm:$0xff] %v3709_v7  ;;  %v3827_v7 = vld [vmem:[#allocation2 + $0x140] sm:$0xff]  ;;  %v7599_v6 = vrot.slane %v3683_v62, 1  ;;  %v572_v55 = vmul.f32 %v3626_v41, %v3965_v4 }
  0x58   : > { %7566 = vst [vmem:[#allocation38_spill] sm:$0xff] %v3713_v8  ;;  %7567 = vst [vmem:[#allocation39_spill] sm:$0xff] %v3717_v9  ;;  %v3898_v48 = vmul.f32 %v3623_v40, %v3827_v7  ;;  %v479_v9 = vmul.f32 %v3623_v40, %v3894_v44  ;;  %v566_v8 = vmul.f32 %v3626_v41, %v3894_v44 }
  0x59   : > { %7568 = vst [vmem:[#allocation40_spill] sm:$0xff] %v3721_v10  ;;  %7569 = vst [vmem:[#allocation41_spill] sm:$0xff] %v3725_v11  ;;  %v3870_v63 = vsel %vm605_vm2, %v7600_v0, %v7599_v6  ;;  %v3890_v0 = vmul.f32 %v3626_v41, %v3809_v38  ;;  %v3892_v6 = vld [vmem:[#allocation2 + $0x188] sm:$0xff] }
  0x5a   : > { %7570 = vst [vmem:[#allocation42_spill] sm:$0xff] %v3727_v12  ;;  %7571 = vst [vmem:[#allocation43_spill] sm:$0xff] %v3729_v13  ;;  %v3851_v13 = vld [vmem:[#allocation2 + $0x168] sm:$0xff]  ;;  %v3863_v12 = vmul.f32 %v3626_v41, %v3787_v33 }
  0x5b   : > { %7572 = vst [vmem:[#allocation44_spill] sm:$0xff] %v3733_v14  ;;  %7573 = vst [vmem:[#allocation45_spill] sm:$0xff] %v3737_v15  ;;  %v3953_v15 = vld [vmem:[#allocation2 + $0x1e0] sm:$0xff]  ;;  %v478_v14 = vmul.f32 %v3623_v40, %v3892_v6 }
  0x5c   : > { %7574 = vst [vmem:[#allocation46_spill] sm:$0xff] %v3744_v18  ;;  %7575 = vst [vmem:[#allocation47_spill] sm:$0xff] %v3746_v19  ;;  %v3833_v19 = vmul.f32 %v3626_v41, %v3748_v20  ;;  %v3849_v18 = vld [vmem:[#allocation2 + $0x160] sm:$0xff]  ;;  %v486_v59 = vmul.f32 %v3623_v40, %v3953_v15 }
  0x5d   : > { %7576 = vst [vmem:[#allocation48_spill] sm:$0xff] %v3748_v20  ;;  %7577 = vst [vmem:[#allocation49_spill] sm:$0xff] %v3752_v21  ;;  %v3855_v20 = vmul.f32 %v3623_v40, %v3789_v34  ;;  %v3951_v21 = vld [vmem:[#allocation2 + $0x1d0] sm:$0xff] }
  0x5e   : > { %7578 = vst [vmem:[#allocation50_spill] sm:$0xff] %v3756_v22  ;;  %7579 = vst [vmem:[#allocation51_spill] sm:$0xff] %v3766_v25  ;;  %v3859_v25 = vmul.f32 %v3626_v41, %v3785_v32  ;;  %v3944_v22 = vmul.f32 %v3623_v40, %v3874_v52  ;;  %v485_v62 = vmul.f32 %v3623_v40, %v3951_v21 }
  0x5f   : > { %7580 = vst [vmem:[#allocation52_spill] sm:$0xff] %v3768_v26  ;;  %7581 = vst [vmem:[#allocation53_spill] sm:$0xff] %v3770_v27 }
  0x60   : > { %7582 = vst [vmem:[#allocation54_spill] sm:$0xff] %v3774_v28  ;;  %7583 = vst [vmem:[#allocation55_spill] sm:$0xff] %v3778_v29  ;;  %v3934_v29 = vld [vmem:[#allocation2 + $0x1c0] sm:$0xff]  ;;  %v3936_v28 = vld [vmem:[#allocation2 + $0x1c8] sm:$0xff] }
  0x61   : > { %7584 = vst [vmem:[#allocation56_spill] sm:$0xff] %v3785_v32  ;;  %7585 = vst [vmem:[#allocation57_spill] sm:$0xff] %v3787_v33  ;;  %v643_v32 = vrot.slane %v566_v8, 1 }
  0x62   : > { %7586 = vst [vmem:[#allocation58_spill] sm:$0xff] %v3789_v34  ;;  %7587 = vst [vmem:[#allocation59_spill] sm:$0xff] %v3793_v37  ;;  %v3878_v34 = vmul.f32 %v3623_v40, %v3807_v31  ;;  %v3932_v37 = vld [vmem:[#allocation2 + $0x1b0] sm:$0xff] }
  0x63   : > { %7588 = vst [vmem:[#allocation60_spill] sm:$0xff] %v3797_v39  ;;  %7589 = vst [vmem:[#allocation61_spill] sm:$0xff] %v3807_v31  ;;  %v3906_v31 = vmul.f32 %v3623_v40, %v3847_v45  ;;  %v3926_v39 = vmul.f32 %v3626_v41, %v3847_v45  ;;  %v482_v2 = vmul.f32 %v3623_v40, %v3932_v37 }
  0x64   : > { %7590 = vst [vmem:[#allocation62_spill] sm:$0xff] %v3809_v38  ;;  %7591 = vst [vmem:[#allocation63_spill] sm:$0xff] %v3813_v36  ;;  %v3910_v38 = vmul.f32 %v3626_v41, %v3829_v1  ;;  %v3922_v36 = vmul.f32 %v3623_v40, %v3851_v13  ;;  %v568_v60 = vmul.f32 %v3626_v41, %v3932_v37 }
  0x65   : > { %7592 = vst [vmem:[#allocation64_spill] sm:$0xff] %v3817_v35  ;;  %7593 = vst [vmem:[#allocation65_spill] sm:$0xff] %v3821_v57  ;;  %v3912_v57 = vld [vmem:[#allocation2 + $0x1a0] sm:$0xff]  ;;  %v3914_v35 = vld [vmem:[#allocation2 + $0x1a8] sm:$0xff]  ;;  %v637_v5 = vrot.slane %v3926_v39, 1 }
  0x66   : > { %7594 = vst [vmem:[#allocation66_spill] sm:$0xff] %v3827_v7  ;;  %7595 = vst [vmem:[#allocation67_spill] sm:$0xff] %v3829_v1  ;;  %v3918_v7 = vmul.f32 %v3623_v40, %v3849_v18  ;;  %v3930_v1 = vmul.f32 %v3626_v41, %v3851_v13  ;;  %v481_v3 = vmul.f32 %v3623_v40, %v3914_v35  ;;  %v636_v54 = vrot.slane %v3910_v38, 1 }
  0x67   : > { %7596 = vst [vmem:[#allocation68_spill] sm:$0xff] %v3847_v45  ;;  %7597 = vst [vmem:[#allocation69_spill] sm:$0xff] %v3849_v18  ;;  %v3940_v18 = vmul.f32 %v3623_v40, %v3872_v58  ;;  %v3948_v45 = vmul.f32 %v3626_v41, %v3872_v58  ;;  %v567_v61 = vmul.f32 %v3626_v41, %v3914_v35 }
  0x68   : > { %7598 = vst [vmem:[#allocation70_spill] sm:$0xff] %v3851_v13  ;;  %7601 = vst [vmem:[#allocation71_spill] sm:$0xff] %v3870_v63  ;;  %v480_v13 = vmul.f32 %v3623_v40, %v3912_v57  ;;  %v639_v10 = vrot.slane %v3930_v1, 1 }
  0x69   : > { %7602 = vst [vmem:[#allocation72_spill] sm:$0xff] %v3872_v58  ;;  %7603 = vst [vmem:[#allocation73_spill] sm:$0xff] %v3874_v52  ;;  %v565_v52 = vmul.f32 %v3626_v41, %v3892_v6  ;;  %v3963_v58 = vld [vmem:[#allocation2 + $0x1e8] sm:$0xff]  ;;  %v640_v33 = vrot.slane %v3948_v45, 1  ;;  %v645_v27 = vrot.slane %v567_v61, 1 }
  0x6a   : > { %7604 = vst [vmem:[#allocation74_spill] sm:$0xff] %v3892_v6  ;;  %7605 = vst [vmem:[#allocation75_spill] sm:$0xff] %v3894_v44  ;;  %v483_v6 = vmul.f32 %v3623_v40, %v3934_v29  ;;  %v484_v44 = vmul.f32 %v3623_v40, %v3936_v28  ;;  %v487_v63 = vmul.f32 %v3623_v40, %v3963_v58 }
  0x6b   : > { %7606 = vst [vmem:[#allocation76_spill] sm:$0xff] %v3912_v57  ;;  %7607 = vst [vmem:[#allocation77_spill] sm:$0xff] %v3914_v35  ;;  %v569_v57 = vmul.f32 %v3626_v41, %v3936_v28  ;;  %v570_v35 = vmul.f32 %v3626_v41, %v3951_v21 }
  0x6c   : > { %7608 = vst [vmem:[#allocation78_spill] sm:$0xff] %v3932_v37  ;;  %7609 = vst [vmem:[#allocation79_spill] sm:$0xff] %v3934_v29  ;;  %v488_v37 = vmul.f32 %v3623_v40, %v3965_v4  ;;  %v634_v29 = vrot.slane %v3890_v0, 1  ;;  %v4039_v0 = vadd.f32 %v639_v10, %v3918_v7  ;;  %v4060_v7 = vld [vmem:[#allocation2 + $0x100] sm:$0xff] }
  0x6d   : > { %7610 = vst [vmem:[#allocation80_spill] sm:$0xff] %v3936_v28  ;;  %7611 = vst [vmem:[#allocation81_spill] sm:$0xff] %v3951_v21  ;;  %v571_v28 = vmul.f32 %v3626_v41, %v3963_v58  ;;  %v633_v21 = vrot.slane %v3886_v46, 1  ;;  %v646_v41 = vrot.slane %v568_v60, 1  ;;  %v649_v56 = vrot.slane %v570_v35, 1 }
  0x6e   : > { %7612 = vst [vmem:[#allocation82_spill] sm:$0xff] %v3953_v15  ;;  %7613 = vst [vmem:[#allocation83_spill] sm:$0xff] %v3963_v58  ;;  %v642_v58 = vrot.slane %v565_v52, 1  ;;  %v652_v15 = vrot.slane %v572_v55, 1  ;;  %v638_v60 = vsel %vm605_vm2, %v636_v54, %v637_v5  ;;  %v641_v55 = vsel %vm605_vm2, %v639_v10, %v640_v33 }
  0x6f   : > { %7614 = vst [vmem:[#allocation84_spill] sm:$0xff] %v3965_v4  ;;  %v648_v4 = vrot.slane %v569_v57, 1  ;;  %v651_v11 = vrot.slane %v571_v28, 1  ;;  %v635_v39 = vsel %vm605_vm2, %v633_v21, %v634_v29  ;;  %v647_v61 = vsel %vm605_vm2, %v645_v27, %v646_v41  ;;  %7620 = vst [vmem:[#allocation90_spill] sm:$0xff] %v4060_v7 }
  0x70   : > { %v644_v57 = vsel %vm605_vm2, %v642_v58, %v643_v32  ;;  %v4021_v38 = vadd.f32 %v633_v21, %v3855_v20  ;;  %v4024_v45 = vadd.f32 %v635_v39, %v3878_v34  ;;  %v4027_v52 = vadd.f32 %v634_v29, %v3882_v51  ;;  %v4058_v29 = vld [vmem:[#allocation2 + $0xe0] sm:$0xff]  ;;  %v7640_v39 = vld [vmem:[#allocation41_spill] sm:$0xff] }
  0x71   : > { %v650_v8 = vsel %vm605_vm2, %v648_v4, %v649_v56  ;;  %v653_v28 = vsel %vm605_vm2, %v651_v11, %v652_v15  ;;  %v4030_v35 = vadd.f32 %v636_v54, %v3898_v48  ;;  %v4033_v1 = vadd.f32 %v638_v60, %v3902_v43  ;;  %7619 = vst [vmem:[#allocation89_spill] sm:$0xff] %v4058_v29  ;;  %v7636_v34 = vld [vmem:[#allocation22_spill] sm:$0xff] }
  0x72   : > { %v4036_v46 = vadd.f32 %v637_v5, %v3906_v31  ;;  %v4042_v20 = vadd.f32 %v641_v55, %v3922_v36  ;;  %v4045_v21 = vadd.f32 %v640_v33, %v3940_v18  ;;  %v4048_v51 = vadd.f32 %v642_v58, %v3944_v22  ;;  %v7635_v33 = vld [vmem:[#allocation20_spill] sm:$0xff] }
  0x73   : > { %v4050_v48 = vadd.f32 %v644_v57, %v478_v14  ;;  %v4052_v54 = vadd.f32 %v643_v32, %v479_v9  ;;  %v4054_v43 = vadd.f32 %v645_v27, %v480_v13  ;;  %v4056_v5 = vadd.f32 %v647_v61, %v481_v3 }
  0x74   : > { %v4062_v36 = vadd.f32 %v646_v41, %v482_v2  ;;  %v4064_v10 = vadd.f32 %v648_v4, %v483_v6  ;;  %v4066_v18 = vadd.f32 %v650_v8, %v484_v44  ;;  %v4068_v58 = vadd.f32 %v649_v56, %v485_v62  ;;  %v7628_v56 = vld [vmem:[#allocation53_spill] sm:$0xff] }
  0x75   : > { %7615 = vst [vmem:[#allocation85_spill] sm:$0xff] %v4050_v48  ;;  %7616 = vst [vmem:[#allocation86_spill] sm:$0xff] %v4052_v54  ;;  %v625_v14 = vrot.slane %v3837_v53, 1  ;;  %v4071_v9 = vadd.f32 %v651_v11, %v486_v59  ;;  %v4073_v13 = vadd.f32 %v653_v28, %v487_v63  ;;  %v4075_v3 = vadd.f32 %v652_v15, %v488_v37  ;;  %v7629_v63 = vld [vmem:[#allocation56_spill] sm:$0xff] }
  0x76   : > { %7617 = vst [vmem:[#allocation87_spill] sm:$0xff] %v4054_v43  ;;  %7618 = vst [vmem:[#allocation88_spill] sm:$0xff] %v4056_v5  ;;  %v627_v22 = vrot.slane %v3841_v47, 1  ;;  %v628_v27 = vrot.slane %v3845_v49, 1  ;;  %v630_v2 = vrot.slane %v3859_v25, 1  ;;  %v631_v4 = vrot.slane %v3863_v12, 1 }
  0x77   : > { %7621 = vst [vmem:[#allocation91_spill] sm:$0xff] %v4062_v36  ;;  %7622 = vst [vmem:[#allocation92_spill] sm:$0xff] %v4064_v10  ;;  %v462_v44 = vmul.f32 %v3623_v40, %v4058_v29  ;;  %v463_v53 = vmul.f32 %v3623_v40, %v3768_v26  ;;  %v464_v59 = vmul.f32 %v3623_v40, %v7628_v56  ;;  %v7630_v49 = vld [vmem:[#allocation57_spill] sm:$0xff]  ;;  %v7631_v15 = vld [vmem:[#allocation40_spill] sm:$0xff]  ;;  %v7637_v37 = vrot.slane %v7636_v34, 1 }
  0x78   : > { %7623 = vst [vmem:[#allocation93_spill] sm:$0xff] %v4066_v18  ;;  %7624 = vst [vmem:[#allocation94_spill] sm:$0xff] %v4068_v58  ;;  %v465_v62 = vmul.f32 %v3623_v40, %v4060_v7  ;;  %v466_v47 = vmul.f32 %v3623_v40, %v7629_v63  ;;  %v467_v11 = vmul.f32 %v3623_v40, %v7630_v49  ;;  %v7632_v12 = vrot.slane %v7631_v15, 1  ;;  %v7633_v25 = vld [vmem:[#allocation35_spill] sm:$0xff]  ;;  %v7664_v58 = vld [vmem:[#allocation33_spill] sm:$0xff] }
  0x79   : > { %7625 = vst [vmem:[#allocation95_spill] sm:$0xff] %v4071_v9  ;;  %7626 = vst [vmem:[#allocation96_spill] sm:$0xff] %v4073_v13  ;;  %v7634_v31 = vrot.slane %v7633_v25, 1  ;;  %v4101_v6 = vadd.f32 %v7637_v37, %v7635_v33  ;;  %v7639_v41 = vrot.slane %v3741_v16, 1  ;;  %v7641_v60 = vrot.slane %v7640_v39, 1  ;;  %v7647_v33 = vld [vmem:[#allocation71_spill] sm:$0xff] }
  0x7a   : > { %7627 = vst [vmem:[#allocation97_spill] sm:$0xff] %v4075_v3  ;;  %v7642_v57 = vrot.slane %v3764_v24, 1  ;;  %v7643_v40 = vrot.slane %v3760_v23, 1  ;;  %v7644_v8 = vrot.slane %v3801_v42, 1  ;;  %v7645_v28 = vrot.slane %v3782_v30, 1  ;;  %v7659_v13 = vld [vmem:[#allocation27_spill] sm:$0xff] }
  0x7b   : > { %v611_v32 = vsel %vm605_vm2, %v7634_v31, %v7632_v12  ;;  %7638 = vst [vmem:[#allocation40_spill] sm:$0xff] %v4101_v6  ;;  %v614_v55 = vsel %vm605_vm2, %v7641_v60, %v7639_v41  ;;  %v7646_v31 = vld [vmem:[#allocation21_spill] sm:$0xff]  ;;  %v7649_v37 = vrot.slane %v3825_v50, 1  ;;  %v7650_v41 = vrot.slane %v3805_v17, 1  ;;  %v7756_v5 = vld [vmem:[#allocation83_spill] sm:$0xff] }
  0x7c   : > { %v617_v61 = vsel %vm605_vm2, %v7643_v40, %v7642_v57  ;;  %v620_v12 = vsel %vm605_vm2, %v7645_v28, %v7644_v8  ;;  %v4120_v34 = vadd.f32 %v7647_v33, %v7646_v31  ;;  %v7651_v7 = vrot.slane %v3833_v19, 1  ;;  %v7652_v6 = vld [vmem:[#allocation25_spill] sm:$0xff]  ;;  %v7653_v8 = vld [vmem:[#allocation28_spill] sm:$0xff]  ;;  %v7656_v31 = vld [vmem:[#allocation26_spill] sm:$0xff] }
  0x7d   : > { %v623_v60 = vsel %vm605_vm2, %v7650_v41, %v7649_v37  ;;  %v629_v40 = vsel %vm605_vm2, %v627_v22, %v628_v27  ;;  %v632_v29 = vsel %vm605_vm2, %v630_v2, %v631_v4  ;;  %v7654_v28 = vrot.slane %v7653_v8, 1  ;;  %v7661_v41 = vld [vmem:[#allocation32_spill] sm:$0xff]  ;;  %v7755_v36 = vld [vmem:[#allocation81_spill] sm:$0xff] }
  0x7e   : > { %7648 = vst [vmem:[#allocation35_spill] sm:$0xff] %v4120_v34  ;;  %v626_v57 = vsel %vm605_vm2, %v7651_v7, %v625_v14  ;;  %v7657_v33 = vrot.slane %v7633_v25, 1  ;;  %v4143_v37 = vadd.f32 %v611_v32, %v7659_v13  ;;  %v7662_v7 = vrot.slane %v7631_v15, 1  ;;  %v7672_v13 = vld [vmem:[#allocation39_spill] sm:$0xff]  ;;  %v7675_v15 = vld [vmem:[#allocation44_spill] sm:$0xff] }
  0x7f   : > { %v4135_v3 = vadd.f32 %v7654_v28, %v7652_v6  ;;  %v7665_v18 = vrot.slane %v7640_v39, 1  ;;  %v7667_v6 = vld [vmem:[#allocation34_spill] sm:$0xff]  ;;  %v7670_v25 = vrot.slane %v3741_v16, 1  ;;  %v7673_v32 = vrot.slane %v3760_v23, 1  ;;  %v7680_v39 = vld [vmem:[#allocation49_spill] sm:$0xff] }
  0x80   : > { %v4140_v34 = vadd.f32 %v7657_v33, %v7656_v31  ;;  %7660 = vst [vmem:[#allocation41_spill] sm:$0xff] %v4143_v37  ;;  %v4148_v9 = vadd.f32 %v7662_v7, %v7661_v41  ;;  %v4156_v8 = vadd.f32 %v614_v55, %v7667_v6  ;;  %v7669_v28 = vld [vmem:[#allocation38_spill] sm:$0xff]  ;;  %v4169_v41 = vadd.f32 %v617_v61, %v7675_v15  ;;  %v7677_v7 = vld [vmem:[#allocation45_spill] sm:$0xff]  ;;  %v7688_v61 = vld [vmem:[#allocation55_spill] sm:$0xff] }
  0x81   : > { %7655 = vst [vmem:[#allocation20_spill] sm:$0xff] %v4135_v3  ;;  %v4153_v10 = vadd.f32 %v7665_v18, %v7664_v58  ;;  %v4161_v31 = vadd.f32 %v7670_v25, %v7669_v28  ;;  %v4166_v33 = vadd.f32 %v7673_v32, %v7672_v13  ;;  %v7678_v18 = vrot.slane %v3764_v24, 1  ;;  %v7683_v16 = vld [vmem:[#allocation50_spill] sm:$0xff]  ;;  %v365_v25 = vld [vmem:[#allocation2 + $0x18] sm:$0x1] }
  0x82   : > { %7658 = vst [vmem:[#allocation22_spill] sm:$0xff] %v4140_v34  ;;  %7663 = vst [vmem:[#allocation21_spill] sm:$0xff] %v4148_v9  ;;  %v7681_v55 = vrot.slane %v3782_v30, 1  ;;  %v4182_v28 = vadd.f32 %v620_v12, %v7683_v16  ;;  %v7685_v23 = vld [vmem:[#allocation54_spill] sm:$0xff]  ;;  %v7686_v13 = vrot.slane %v3801_v42, 1  ;;  %v7689_v15 = vrot.slane %v3805_v17, 1 }
  0x83   : > { %7666 = vst [vmem:[#allocation71_spill] sm:$0xff] %v4153_v10  ;;  %7668 = vst [vmem:[#allocation25_spill] sm:$0xff] %v4156_v8  ;;  %v4174_v58 = vadd.f32 %v7678_v18, %v7677_v7  ;;  %v7691_v7 = vld [vmem:[#allocation59_spill] sm:$0xff]  ;;  %v7693_v30 = vld [vmem:[#allocation60_spill] sm:$0xff]  ;;  %v7698_v42 = vrot.slane %v3833_v19, 1 }
  0x84   : > { %7671 = vst [vmem:[#allocation28_spill] sm:$0xff] %v4161_v31  ;;  %7674 = vst [vmem:[#allocation26_spill] sm:$0xff] %v4166_v33  ;;  %v4179_v6 = vadd.f32 %v7681_v55, %v7680_v39  ;;  %v4187_v32 = vadd.f32 %v7686_v13, %v7685_v23  ;;  %v4192_v24 = vadd.f32 %v7689_v15, %v7688_v61  ;;  %v7694_v39 = vrot.slane %v3825_v50, 1  ;;  %v4202_v12 = vld [vmem:[#allocation2 + $0x38] sm:$0x1]  ;;  %v7697_v16 = vld [vmem:[#allocation63_spill] sm:$0xff] }
  0x85   : > { %7676 = vst [vmem:[#allocation27_spill] sm:$0xff] %v4169_v41  ;;  %7679 = vst [vmem:[#allocation32_spill] sm:$0xff] %v4174_v58  ;;  %v4195_v18 = vadd.f32 %v623_v60, %v7691_v7  ;;  %v4207_v23 = vadd.f32 %v7698_v42, %v7697_v16  ;;  %v7700_v13 = vld [vmem:[#allocation64_spill] sm:$0xff]  ;;  %v7702_v17 = vld [vmem:[#allocation65_spill] sm:$0xff]  ;;  %v4215_v60 = vadd.f32 %v627_v22, %v462_v44 }
  0x86   : > { %7682 = vst [vmem:[#allocation33_spill] sm:$0xff] %v4179_v6  ;;  %7684 = vst [vmem:[#allocation34_spill] sm:$0xff] %v4182_v28  ;;  %v4200_v55 = vadd.f32 %v7694_v39, %v7693_v30  ;;  %v4213_v61 = vadd.f32 %v625_v14, %v7702_v17  ;;  %v4217_v15 = vld [vmem:[#allocation2 + $0x58] sm:$0x1]  ;;  %v4219_v50 = vadd.f32 %v629_v40, %v463_v53  ;;  %v7713_v42 = vld [vmem:[#allocation14_spill] sm:$0xff] }
  0x87   : > { %7687 = vst [vmem:[#allocation38_spill] sm:$0xff] %v4187_v32  ;;  %7690 = vst [vmem:[#allocation39_spill] sm:$0xff] %v4192_v24  ;;  %v4210_v32 = vadd.f32 %v626_v57, %v7700_v13  ;;  %v4221_v7 = vadd.f32 %v628_v27, %v464_v59  ;;  %v4223_v30 = vadd.f32 %v630_v2, %v465_v62  ;;  %v4227_v19 = vld [vmem:[#allocation2 + $0x78] sm:$0x1]  ;;  %v7715_v44 = vld [vmem:[#allocation10_spill] sm:$0xff] }
  0x88   : > { %7692 = vst [vmem:[#allocation44_spill] sm:$0xff] %v4195_v18  ;;  %7695 = vst [vmem:[#allocation45_spill] sm:$0xff] %v4200_v55  ;;  %v4225_v39 = vadd.f32 %v632_v29, %v466_v47  ;;  %v4229_v16 = vld [vmem:[#allocation2 + $0x98] sm:$0x1]  ;;  %v4231_v57 = vadd.f32 %v631_v4, %v467_v11  ;;  %v4239_v53 = vmul.f32 %v7713_v42, %v7715_v44  ;;  %v7717_v29 = vld [vmem:[#allocation12_spill] sm:$0xff] }
  0x89   : > { %7696 = vst [vmem:[#allocation49_spill] sm:$0xff] %v4202_v12  ;;  %7699 = vst [vmem:[#allocation50_spill] sm:$0xff] %v4207_v23  ;;  %v7712_v14 = vld [vmem:[#allocation9_spill] sm:$0xff]  ;;  %v4242_v27 = vmul.f32 %v7713_v42, %v365_v25  ;;  %v4248_v59 = vmul.f32 %v7713_v42, %v7717_v29  ;;  %v4256_v47 = vmul.f32 %v7713_v42, %v4202_v12  ;;  %v7719_v11 = vld [vmem:[#allocation18_spill] sm:$0xff] }
  0x8a   : > { %7701 = vst [vmem:[#allocation54_spill] sm:$0xff] %v4210_v32  ;;  %7703 = vst [vmem:[#allocation55_spill] sm:$0xff] %v4213_v61  ;;  %v4235_v22 = vmul.f32 %v7713_v42, %v7712_v14  ;;  %v4244_v2 = vld [vmem:[#allocation2 + $0xb8] sm:$0x1]  ;;  %v4260_v40 = vmul.f32 %v7713_v42, %v7719_v11  ;;  %v7721_v13 = vld [vmem:[#allocation24_spill] sm:$0xff]  ;;  %v4270_v14 = vmul.f32 %v7713_v42, %v4217_v15 }
  0x8b   : > { %7704 = vst [vmem:[#allocation59_spill] sm:$0xff] %v4215_v60  ;;  %7705 = vst [vmem:[#allocation60_spill] sm:$0xff] %v4217_v15  ;;  %v7718_v62 = vld [vmem:[#allocation17_spill] sm:$0xff]  ;;  %v4266_v17 = vmul.f32 %v7713_v42, %v7721_v13  ;;  %v7723_v12 = vld [vmem:[#allocation30_spill] sm:$0xff]  ;;  %v4286_v13 = vmul.f32 %v7713_v42, %v4227_v19 }
  0x8c   : > { %7706 = vst [vmem:[#allocation63_spill] sm:$0xff] %v4219_v50  ;;  %7707 = vst [vmem:[#allocation64_spill] sm:$0xff] %v4221_v7  ;;  %v4252_v4 = vmul.f32 %v7713_v42, %v7718_v62  ;;  %v4262_v25 = vld [vmem:[#allocation2 + $0xd8] sm:$0x1]  ;;  %v4278_v29 = vmul.f32 %v7713_v42, %v7723_v12  ;;  %v7727_v7 = vld [vmem:[#allocation42_spill] sm:$0xff]  ;;  %v4298_v12 = vmul.f32 %v7713_v42, %v4229_v16 }
  0x8d   : > { %7708 = vst [vmem:[#allocation65_spill] sm:$0xff] %v4223_v30  ;;  %7709 = vst [vmem:[#allocation98_spill] sm:$0xff] %v4225_v39  ;;  %v7722_v44 = vld [vmem:[#allocation29_spill] sm:$0xff]  ;;  %v7726_v30 = vld [vmem:[#allocation36_spill] sm:$0xff] }
  0x8e   : > { %7710 = vst [vmem:[#allocation99_spill] sm:$0xff] %v4227_v19  ;;  %7711 = vst [vmem:[#allocation100_spill] sm:$0xff] %v4229_v16  ;;  %v4274_v62 = vmul.f32 %v7713_v42, %v7722_v44  ;;  %v4280_v11 = vld [vmem:[#allocation2 + $0xf8] sm:$0x1]  ;;  %v4290_v15 = vmul.f32 %v7713_v42, %v7726_v30  ;;  %v4294_v44 = vmul.f32 %v7713_v42, %v7727_v7  ;;  %v7729_v60 = vld [vmem:[#allocation43_spill] sm:$0xff] }
  0x8f   : > { %7714 = vst [vmem:[#allocation9_spill] sm:$0xff] %v4235_v22  ;;  %7716 = vst [vmem:[#allocation14_spill] sm:$0xff] %v4244_v2  ;;  %v4282_v39 = vld [vmem:[#allocation2 + $0x118] sm:$0x1]  ;;  %v4304_v61 = vmul.f32 %v7713_v42, %v7729_v60  ;;  %v7730_v19 = vld [vmem:[#allocation46_spill] sm:$0xff]  ;;  %v4312_v30 = vmul.f32 %v7713_v42, %v4244_v2  ;;  %v4326_v60 = vmul.f32 %v7713_v42, %v4262_v25 }
  0x90   : > { %7720 = vst [vmem:[#allocation10_spill] sm:$0xff] %v4262_v25  ;;  %7724 = vst [vmem:[#allocation101_spill] sm:$0xff] %v4280_v11  ;;  %v4300_v50 = vld [vmem:[#allocation2 + $0x138] sm:$0x1]  ;;  %v4308_v32 = vmul.f32 %v7713_v42, %v7730_v19  ;;  %v7731_v7 = vld [vmem:[#allocation48_spill] sm:$0xff]  ;;  %v4330_v19 = vmul.f32 %v7713_v42, %v3768_v26  ;;  %v4334_v2 = vmul.f32 %v7713_v42, %v7628_v56 }
  0x91   : > { %7725 = vst [vmem:[#allocation102_spill] sm:$0xff] %v4282_v39  ;;  %7728 = vst [vmem:[#allocation103_spill] sm:$0xff] %v4300_v50  ;;  %v4316_v23 = vmul.f32 %v7713_v42, %v7731_v7  ;;  %v4318_v16 = vld [vmem:[#allocation2 + $0x158] sm:$0x1]  ;;  %v7733_v55 = vld [vmem:[#allocation51_spill] sm:$0xff]  ;;  %v4346_v25 = vmul.f32 %v7713_v42, %v7629_v63  ;;  %v4350_v26 = vmul.f32 %v7713_v42, %v7630_v49 }
  0x92   : > { %7732 = vst [vmem:[#allocation104_spill] sm:$0xff] %v4318_v16  ;;  %v4322_v18 = vmul.f32 %v7713_v42, %v7733_v55  ;;  %7734 = vst [vmem:[#allocation105_spill] sm:$0xff] %v4326_v60  ;;  %v4336_v7 = vld [vmem:[#allocation2 + $0x178] sm:$0x1]  ;;  %v4342_v55 = vmul.f32 %v7713_v42, %v4280_v11  ;;  %v4354_v56 = vmul.f32 %v7713_v42, %v4282_v39  ;;  %v7742_v58 = vld [vmem:[#allocation62_spill] sm:$0xff] }
  0x93   : > { %7735 = vst [vmem:[#allocation106_spill] sm:$0xff] %v4330_v19  ;;  %7736 = vst [vmem:[#allocation107_spill] sm:$0xff] %v4334_v2  ;;  %v4338_v24 = vld [vmem:[#allocation2 + $0x198] sm:$0x1]  ;;  %v4362_v11 = vmul.f32 %v7713_v42, %v7742_v58  ;;  %v4366_v63 = vmul.f32 %v7713_v42, %v4300_v50  ;;  %v7743_v41 = vld [vmem:[#allocation67_spill] sm:$0xff]  ;;  %v854_v2 = vrot.slane %v4242_v27, 2 }
  0x94   : > { %7737 = vst [vmem:[#allocation108_spill] sm:$0xff] %v4336_v7  ;;  %7738 = vst [vmem:[#allocation109_spill] sm:$0xff] %v4338_v24  ;;  %v7741_v28 = vld [vmem:[#allocation61_spill] sm:$0xff]  ;;  %v4370_v49 = vmul.f32 %v7713_v42, %v7743_v41  ;;  %v7745_v39 = vld [vmem:[#allocation68_spill] sm:$0xff] }
  0x95   : > { %7739 = vst [vmem:[#allocation110_spill] sm:$0xff] %v4342_v55  ;;  %7740 = vst [vmem:[#allocation111_spill] sm:$0xff] %v4346_v25  ;;  %v4358_v6 = vmul.f32 %v7713_v42, %v7741_v28  ;;  %v4372_v33 = vld [vmem:[#allocation2 + $0x1b8] sm:$0x1]  ;;  %v4376_v31 = vmul.f32 %v7713_v42, %v7745_v39  ;;  %v4380_v28 = vmul.f32 %v7713_v42, %v4318_v16  ;;  %v7746_v58 = vld [vmem:[#allocation70_spill] sm:$0xff] }
  0x96   : > { %7744 = vst [vmem:[#allocation112_spill] sm:$0xff] %v4372_v33  ;;  %v4384_v8 = vmul.f32 %v7713_v42, %v7746_v58  ;;  %v7747_v50 = vld [vmem:[#allocation72_spill] sm:$0xff]  ;;  %v4390_v41 = vld [vmem:[#allocation2 + $0x1d8] sm:$0x1]  ;;  %v4396_v39 = vmul.f32 %v7713_v42, %v4336_v7  ;;  %v7750_v37 = vld [vmem:[#allocation74_spill] sm:$0xff]  ;;  %v852_v7 = vrot.slane %v4239_v53, 2  ;;  %v4431_v53 = vmul.f32 %v7713_v42, %v7756_v5 }
  0x97   : > { %v4388_v10 = vmul.f32 %v7713_v42, %v7747_v50  ;;  %7748 = vst [vmem:[#allocation113_spill] sm:$0xff] %v4390_v41  ;;  %v4392_v9 = vld [vmem:[#allocation2 + $0x1f8] sm:$0x1]  ;;  %v4400_v16 = vmul.f32 %v7713_v42, %v7750_v37  ;;  %v7751_v34 = vld [vmem:[#allocation75_spill] sm:$0xff]  ;;  %v4408_v50 = vmul.f32 %v7713_v42, %v4338_v24  ;;  %v7753_v37 = vld [vmem:[#allocation78_spill] sm:$0xff]  ;;  %v798_v55 = vmul.f32 %v7713_v42, %v4390_v41 }
  0x98   : > { %7749 = vst [vmem:[#allocation114_spill] sm:$0xff] %v4392_v9  ;;  %v4404_v58 = vmul.f32 %v7713_v42, %v7751_v34  ;;  %v7752_v3 = vld [vmem:[#allocation77_spill] sm:$0xff]  ;;  %v794_v19 = vmul.f32 %v7713_v42, %v7753_v37  ;;  %v795_v34 = vmul.f32 %v7713_v42, %v4372_v33  ;;  %v7754_v60 = vld [vmem:[#allocation80_spill] sm:$0xff]  ;;  %v801_v33 = vmul.f32 %v7713_v42, %v4392_v9 }
  0x99   : > { %v4412_v25 = vmul.f32 %v7713_v42, %v7752_v3  ;;  %v4423_v24 = vmul.f32 %v7713_v42, %v7754_v60  ;;  %v797_v3 = vmul.f32 %v7713_v42, %v7755_v36  ;;  %v7757_v27 = vld [vmem:[#allocation84_spill] sm:$0xff]  ;;  %v7758_v41 = vrot.slane %v4235_v22, 2 }
  0x9a   : > { %v800_v37 = vmul.f32 %v7713_v42, %v7757_v27  ;;  %v4447_v5 = vsel %vm850_vm3, %v852_v7, %v854_v2  ;;  %v894_v60 = vrot.slane %v4354_v56, 2  ;;  %v896_v54 = vrot.slane %v4358_v6, 2 }
  0x9b   : > { %v4444_v48 = vsel %vm850_vm3, %v7758_v41, %v852_v7  ;;  %7760 = vst [vmem:[#allocation116_spill] sm:$0xff] %v4447_v5  ;;  %v897_v36 = vrot.slane %v4362_v11, 2  ;;  %v899_v9 = vrot.slane %v4366_v63, 2  ;;  %v901_v41 = vrot.slane %v4370_v49, 2 }
  0x9c   : > { %7759 = vst [vmem:[#allocation115_spill] sm:$0xff] %v4444_v48  ;;  %v902_v48 = vrot.slane %v4376_v31, 2  ;;  %v904_v7 = vrot.slane %v4380_v28, 2  ;;  %v906_v2 = vrot.slane %v4384_v8, 2  ;;  %v907_v42 = vrot.slane %v4388_v10, 2 }
  0x9d   : > { %v909_v27 = vrot.slane %v4396_v39, 2  ;;  %v911_v56 = vrot.slane %v4400_v16, 2  ;;  %v912_v6 = vrot.slane %v4404_v58, 2  ;;  %v914_v11 = vrot.slane %v4408_v50, 2 }
  0x9e   : > { %v916_v63 = vrot.slane %v4412_v25, 2  ;;  %v917_v43 = vrot.slane %v794_v19, 2  ;;  %v919_v49 = vrot.slane %v795_v34, 2  ;;  %v921_v31 = vrot.slane %v4423_v24, 2 }
  0x9f   : > { %v922_v5 = vrot.slane %v797_v3, 2  ;;  %v924_v28 = vrot.slane %v798_v55, 2  ;;  %v926_v8 = vrot.slane %v4431_v53, 2  ;;  %v927_v22 = vrot.slane %v800_v37, 2 }
  0xa0   : > { %v882_v10 = vrot.slane %v4322_v18, 2  ;;  %v7761_v39 = vrot.slane %v4350_v26, 2  ;;  %v898_v58 = vsel %vm850_vm3, %v896_v54, %v897_v36  ;;  %v929_v50 = vrot.slane %v801_v33, 2 }
  0xa1   : > { %v900_v25 = vsel %vm850_vm3, %v897_v36, %v899_v9  ;;  %v903_v34 = vsel %vm850_vm3, %v901_v41, %v902_v48  ;;  %v905_v24 = vsel %vm850_vm3, %v902_v48, %v904_v7  ;;  %v908_v3 = vsel %vm850_vm3, %v906_v2, %v907_v42 }
  0xa2   : > { %v895_v16 = vsel %vm850_vm3, %v7761_v39, %v894_v60  ;;  %v910_v55 = vsel %vm850_vm3, %v907_v42, %v909_v27  ;;  %v913_v37 = vsel %vm850_vm3, %v911_v56, %v912_v6  ;;  %v915_v18 = vsel %vm850_vm3, %v912_v6, %v914_v11 }
  0xa3   : > { %v918_v19 = vsel %vm850_vm3, %v916_v63, %v917_v43  ;;  %v920_v60 = vsel %vm850_vm3, %v917_v43, %v919_v49  ;;  %v923_v33 = vsel %vm850_vm3, %v921_v31, %v922_v5  ;;  %v925_v36 = vsel %vm850_vm3, %v922_v5, %v924_v28  ;;  %v7769_v28 = vld [vmem:[#allocation94_spill] sm:$0xff] }
  0xa4   : > { %v928_v9 = vsel %vm850_vm3, %v926_v8, %v927_v22  ;;  %v930_v48 = vsel %vm850_vm3, %v927_v22, %v929_v50  ;;  %v4497_v53 = vadd.f32 %v895_v16, %v4231_v57  ;;  %v4500_v27 = vadd.f32 %v896_v54, %v4021_v38  ;;  %v7770_v16 = vld [vmem:[#allocation105_spill] sm:$0xff]  ;;  %v7771_v50 = vld [vmem:[#allocation95_spill] sm:$0xff] }
  0xa5   : > { %v4503_v42 = vadd.f32 %v898_v58, %v4024_v45  ;;  %v4506_v7 = vadd.f32 %v900_v25, %v4027_v52  ;;  %v4509_v43 = vadd.f32 %v901_v41, %v4030_v35  ;;  %v4512_v5 = vadd.f32 %v903_v34, %v4033_v1  ;;  %v7762_v35 = vld [vmem:[#allocation85_spill] sm:$0xff]  ;;  %v7763_v1 = vld [vmem:[#allocation86_spill] sm:$0xff]  ;;  %v7772_v25 = vld [vmem:[#allocation96_spill] sm:$0xff] }
  0xa6   : > { %v4515_v22 = vadd.f32 %v905_v24, %v4036_v46  ;;  %v4518_v57 = vadd.f32 %v906_v2, %v4039_v0  ;;  %v4521_v38 = vadd.f32 %v908_v3, %v4042_v20  ;;  %v4524_v45 = vadd.f32 %v910_v55, %v4045_v21  ;;  %v7764_v46 = vld [vmem:[#allocation87_spill] sm:$0xff]  ;;  %v7765_v0 = vld [vmem:[#allocation88_spill] sm:$0xff]  ;;  %v7773_v24 = vld [vmem:[#allocation97_spill] sm:$0xff] }
  0xa7   : > { %v4527_v52 = vadd.f32 %v911_v56, %v4048_v51  ;;  %v4530_v54 = vadd.f32 %v913_v37, %v7762_v35  ;;  %v4533_v41 = vadd.f32 %v915_v18, %v7763_v1  ;;  %v4536_v6 = vadd.f32 %v916_v63, %v7764_v46  ;;  %v7766_v20 = vld [vmem:[#allocation91_spill] sm:$0xff]  ;;  %v7767_v21 = vld [vmem:[#allocation92_spill] sm:$0xff]  ;;  %v7768_v51 = vld [vmem:[#allocation93_spill] sm:$0xff] }
  0xa8   : > { %v4539_v2 = vadd.f32 %v918_v19, %v7765_v0  ;;  %v4542_v11 = vadd.f32 %v920_v60, %v7766_v20  ;;  %v4545_v49 = vadd.f32 %v921_v31, %v7767_v21  ;;  %v4548_v56 = vadd.f32 %v923_v33, %v7768_v51  ;;  %v7774_v55 = vld [vmem:[#allocation106_spill] sm:$0xff]  ;;  %v7775_v37 = vld [vmem:[#allocation107_spill] sm:$0xff] }
  0xa9   : > { %v4551_v39 = vadd.f32 %v925_v36, %v7769_v28  ;;  %v884_v58 = vrot.slane %v7770_v16, 2  ;;  %v4555_v63 = vadd.f32 %v926_v8, %v7771_v50  ;;  %v4558_v34 = vadd.f32 %v928_v9, %v7772_v25  ;;  %v7776_v19 = vld [vmem:[#allocation110_spill] sm:$0xff]  ;;  %v7777_v33 = vld [vmem:[#allocation111_spill] sm:$0xff] }
  0xaa   : > { %v4561_v3 = vadd.f32 %v930_v48, %v7773_v24  ;;  %v886_v31 = vrot.slane %v7774_v55, 2  ;;  %v887_v18 = vrot.slane %v7775_v37, 2  ;;  %v889_v60 = vrot.slane %v7776_v19, 2 }
  0xab   : > { %v891_v36 = vrot.slane %v7777_v33, 2  ;;  %v7778_v35 = vrot.slane %v4252_v4, 2  ;;  %v7779_v1 = vrot.slane %v4248_v59, 2  ;;  %v7780_v9 = vrot.slane %v4256_v47, 2 }
  0xac   : > { %v7782_v0 = vrot.slane %v4266_v17, 2  ;;  %v7783_v20 = vrot.slane %v4260_v40, 2  ;;  %v7784_v51 = vrot.slane %v4270_v14, 2  ;;  %v7786_v50 = vrot.slane %v4278_v29, 2 }
  0xad   : > { %v858_v8 = vsel %vm850_vm3, %v7779_v1, %v7778_v35  ;;  %v7781_v46 = vmov %v7778_v35  ;;  %v7787_v47 = vrot.slane %v4274_v62, 2  ;;  %v7788_v25 = vrot.slane %v4286_v13, 2 }
  0xae   : > { %v860_v48 = vsel %vm850_vm3, %v7781_v46, %v7780_v9  ;;  %v863_v21 = vsel %vm850_vm3, %v7783_v20, %v7782_v0  ;;  %v7785_v28 = vmov %v7782_v0  ;;  %v7789_v24 = vmov %v7786_v50 }
  0xaf   : > { %v865_v16 = vsel %vm850_vm3, %v7785_v28, %v7784_v51  ;;  %v868_v4 = vsel %vm850_vm3, %v7787_v47, %v7786_v50  ;;  %v870_v55 = vsel %vm850_vm3, %v7789_v24, %v7788_v25  ;;  %v7790_v37 = vrot.slane %v4294_v44, 2  ;;  %v7800_v25 = vld [vmem:[#allocation40_spill] sm:$0xff] }
  0xb0   : > { %v7791_v14 = vrot.slane %v4290_v15, 2  ;;  %v7792_v19 = vrot.slane %v4298_v12, 2  ;;  %v7794_v1 = vrot.slane %v4308_v32, 2  ;;  %v7795_v13 = vrot.slane %v4304_v61, 2 }
  0xb1   : > { %v7793_v33 = vmov %v7790_v37  ;;  %v7796_v9 = vrot.slane %v4312_v30, 2  ;;  %v7798_v20 = vrot.slane %v4316_v23, 2  ;;  %v885_v44 = vsel %vm850_vm3, %v882_v10, %v884_v58  ;;  %v7801_v30 = vld [vmem:[#allocation9_spill] sm:$0xff]  ;;  %v7807_v58 = vld [vmem:[#allocation22_spill] sm:$0xff] }
  0xb2   : > { %v873_v17 = vsel %vm850_vm3, %v7791_v14, %v7790_v37  ;;  %v875_v35 = vsel %vm850_vm3, %v7793_v33, %v7792_v19  ;;  %v878_v29 = vsel %vm850_vm3, %v7795_v13, %v7794_v1  ;;  %v7797_v46 = vmov %v7794_v1  ;;  %v7803_v37 = vld [vmem:[#allocation35_spill] sm:$0xff]  ;;  %v7805_v33 = vld [vmem:[#allocation20_spill] sm:$0xff] }
  0xb3   : > { %v880_v0 = vsel %vm850_vm3, %v7797_v46, %v7796_v9  ;;  %v883_v12 = vsel %vm850_vm3, %v7798_v20, %v882_v10  ;;  %v888_v51 = vsel %vm850_vm3, %v886_v31, %v887_v18  ;;  %v890_v28 = vsel %vm850_vm3, %v887_v18, %v889_v60  ;;  %v7804_v14 = vld [vmem:[#allocation115_spill] sm:$0xff]  ;;  %v7806_v1 = vld [vmem:[#allocation116_spill] sm:$0xff]  ;;  %v7810_v9 = vld [vmem:[#allocation21_spill] sm:$0xff] }
  0xb4   : > { %v7799_v50 = vrot.slane %v4350_v26, 2  ;;  %v7802_v24 = vrot.slane %v7801_v30, 2  ;;  %v4633_v19 = vadd.f32 %v7804_v14, %v7803_v37  ;;  %v4637_v10 = vadd.f32 %v7806_v1, %v7805_v33  ;;  %v7809_v26 = vld [vmem:[#allocation41_spill] sm:$0xff]  ;;  %v7811_v20 = vld [vmem:[#allocation71_spill] sm:$0xff]  ;;  %v7816_v37 = vld [vmem:[#allocation28_spill] sm:$0xff] }
  0xb5   : > { %v7808_v18 = vrot.slane %v4248_v59, 2  ;;  %v4645_v13 = vadd.f32 %v858_v8, %v7809_v26  ;;  %v4648_v46 = vadd.f32 %v860_v48, %v7810_v9  ;;  %v7814_v30 = vld [vmem:[#allocation25_spill] sm:$0xff]  ;;  %v4659_v14 = vadd.f32 %v865_v16, %v7816_v37  ;;  %v7818_v59 = vld [vmem:[#allocation26_spill] sm:$0xff]  ;;  %v7821_v8 = vld [vmem:[#allocation27_spill] sm:$0xff] }
  0xb6   : > { %v893_v47 = vsel %vm850_vm3, %v891_v36, %v7799_v50  ;;  %v4629_v32 = vadd.f32 %v7802_v24, %v7800_v25  ;;  %v7812_v50 = vrot.slane %v4260_v40, 2  ;;  %v4656_v24 = vadd.f32 %v863_v21, %v7814_v30  ;;  %v7823_v48 = vld [vmem:[#allocation32_spill] sm:$0xff]  ;;  %v7825_v40 = vld [vmem:[#allocation33_spill] sm:$0xff]  ;;  %v7828_v21 = vld [vmem:[#allocation34_spill] sm:$0xff] }
  0xb7   : > { %v4642_v60 = vadd.f32 %v7808_v18, %v7807_v58  ;;  %7817 = vst [vmem:[#allocation87_spill] sm:$0xff] %v4659_v14  ;;  %v7819_v33 = vrot.slane %v4274_v62, 2  ;;  %v4667_v58 = vadd.f32 %v868_v4, %v7821_v8  ;;  %v4670_v18 = vadd.f32 %v870_v55, %v7823_v48  ;;  %v7830_v16 = vld [vmem:[#allocation38_spill] sm:$0xff]  ;;  %v7832_v62 = vld [vmem:[#allocation39_spill] sm:$0xff]  ;;  %v7835_v4 = vld [vmem:[#allocation44_spill] sm:$0xff] }
  0xb8   : > { %v4653_v25 = vadd.f32 %v7812_v50, %v7811_v20  ;;  %7815 = vst [vmem:[#allocation86_spill] sm:$0xff] %v4656_v24  ;;  %v7826_v26 = vrot.slane %v4290_v15, 2  ;;  %v4678_v20 = vadd.f32 %v873_v17, %v7828_v21  ;;  %v4681_v50 = vadd.f32 %v875_v35, %v7830_v16  ;;  %v7837_v55 = vld [vmem:[#allocation45_spill] sm:$0xff]  ;;  %v7839_v15 = vld [vmem:[#allocation50_spill] sm:$0xff]  ;;  %v7844_v35 = vld [vmem:[#allocation55_spill] sm:$0xff] }
  0xb9   : > { %v4664_v1 = vadd.f32 %v7819_v33, %v7818_v59  ;;  %7822 = vst [vmem:[#allocation91_spill] sm:$0xff] %v4667_v58  ;;  %7824 = vst [vmem:[#allocation92_spill] sm:$0xff] %v4670_v18  ;;  %v7833_v30 = vrot.slane %v4304_v61, 2  ;;  %v4689_v59 = vadd.f32 %v878_v29, %v7835_v4  ;;  %v4692_v33 = vadd.f32 %v880_v0, %v7837_v55  ;;  %v7842_v17 = vld [vmem:[#allocation54_spill] sm:$0xff]  ;;  %v7846_v61 = vld [vmem:[#allocation59_spill] sm:$0xff] }
  0xba   : > { %7813 = vst [vmem:[#allocation85_spill] sm:$0xff] %v4653_v25  ;;  %v4675_v9 = vadd.f32 %v7826_v26, %v7825_v40  ;;  %7829 = vst [vmem:[#allocation94_spill] sm:$0xff] %v4678_v20  ;;  %v7840_v8 = vrot.slane %v4316_v23, 2  ;;  %v4700_v40 = vadd.f32 %v883_v12, %v7842_v17  ;;  %v4703_v26 = vadd.f32 %v885_v44, %v7844_v35  ;;  %v7848_v16 = vld [vmem:[#allocation63_spill] sm:$0xff]  ;;  %v7854_v23 = vld [vmem:[#allocation98_spill] sm:$0xff] }
  0xbb   : > { %7820 = vst [vmem:[#allocation88_spill] sm:$0xff] %v4664_v1  ;;  %7831 = vst [vmem:[#allocation105_spill] sm:$0xff] %v4681_v50  ;;  %v4686_v37 = vadd.f32 %v7833_v30, %v7832_v62  ;;  %v4706_v21 = vadd.f32 %v886_v31, %v7846_v61  ;;  %v4709_v29 = vadd.f32 %v888_v51, %v7848_v16  ;;  %v7850_v62 = vld [vmem:[#allocation64_spill] sm:$0xff]  ;;  %v7852_v30 = vld [vmem:[#allocation65_spill] sm:$0xff] }
  0xbc   : > { %7827 = vst [vmem:[#allocation93_spill] sm:$0xff] %v4675_v9  ;;  %7836 = vst [vmem:[#allocation96_spill] sm:$0xff] %v4689_v59  ;;  %v4697_v48 = vadd.f32 %v7840_v8, %v7839_v15  ;;  %v4712_v0 = vadd.f32 %v890_v28, %v7850_v62  ;;  %v4715_v4 = vadd.f32 %v891_v36, %v7852_v30  ;;  %v7856_v12 = vld [vmem:[#allocation11_spill] sm:$0xff]  ;;  %v7858_v44 = vld [vmem:[#allocation12_spill] sm:$0xff] }
  0xbd   : > { %7834 = vst [vmem:[#allocation95_spill] sm:$0xff] %v4686_v37  ;;  %7838 = vst [vmem:[#allocation97_spill] sm:$0xff] %v4692_v33  ;;  %v4718_v55 = vadd.f32 %v893_v47, %v7854_v23  ;;  %v7857_v15 = vld [vmem:[#allocation15_spill] sm:$0xff]  ;;  %v7859_v17 = vld [vmem:[#allocation17_spill] sm:$0xff] }
  0xbe   : > { %7841 = vst [vmem:[#allocation106_spill] sm:$0xff] %v4697_v48  ;;  %7843 = vst [vmem:[#allocation107_spill] sm:$0xff] %v4700_v40  ;;  %v4722_v8 = vmul.f32 %v7857_v15, %v7856_v12  ;;  %v4726_v31 = vmul.f32 %v7857_v15, %v7858_v44  ;;  %v4730_v51 = vmul.f32 %v7857_v15, %v7859_v17  ;;  %v7860_v28 = vld [vmem:[#allocation13_spill] sm:$0xff]  ;;  %v7861_v36 = vld [vmem:[#allocation18_spill] sm:$0xff] }
  0xbf   : > { %7845 = vst [vmem:[#allocation110_spill] sm:$0xff] %v4703_v26  ;;  %7847 = vst [vmem:[#allocation111_spill] sm:$0xff] %v4706_v21  ;;  %v4734_v35 = vmul.f32 %v7857_v15, %v7860_v28  ;;  %v4738_v47 = vmul.f32 %v7857_v15, %v7861_v36  ;;  %v7862_v61 = vld [vmem:[#allocation24_spill] sm:$0xff]  ;;  %v7863_v62 = vld [vmem:[#allocation62_spill] sm:$0xff] }
  0xc0   : > { %7849 = vst [vmem:[#allocation40_spill] sm:$0xff] %v4709_v29  ;;  %7851 = vst [vmem:[#allocation9_spill] sm:$0xff] %v4712_v0  ;;  %v4742_v16 = vmul.f32 %v7857_v15, %v7862_v61  ;;  %v1057_v30 = vmul.f32 %v7857_v15, %v7863_v62  ;;  %v7864_v23 = vld [vmem:[#allocation66_spill] sm:$0xff]  ;;  %v7865_v44 = vld [vmem:[#allocation67_spill] sm:$0xff] }
  0xc1   : > { %7853 = vst [vmem:[#allocation35_spill] sm:$0xff] %v4715_v4  ;;  %7855 = vst [vmem:[#allocation115_spill] sm:$0xff] %v4718_v55  ;;  %v1058_v12 = vmul.f32 %v7857_v15, %v7864_v23  ;;  %v1059_v55 = vmul.f32 %v7857_v15, %v7865_v44  ;;  %v7866_v4 = vld [vmem:[#allocation68_spill] sm:$0xff]  ;;  %v7867_v0 = vld [vmem:[#allocation69_spill] sm:$0xff] }
  0xc2   : > { %v1060_v28 = vmul.f32 %v7857_v15, %v7866_v4  ;;  %v1061_v29 = vmul.f32 %v7857_v15, %v7867_v0  ;;  %v4754_v21 = vld [vmem:[#allocation2 + $0x200] sm:$0xff]  ;;  %v4756_v36 = vld [vmem:[#allocation2 + $0x208] sm:$0xff]  ;;  %v7871_v62 = vld [vmem:[#allocation72_spill] sm:$0xff]  ;;  %v4795_v25 = vadd.f32 %v1057_v30, %v4497_v53 }
  0xc3   : > { %7868 = vst [vmem:[#allocation20_spill] sm:$0xff] %v4754_v21  ;;  %7869 = vst [vmem:[#allocation116_spill] sm:$0xff] %v4756_v36  ;;  %v7870_v61 = vld [vmem:[#allocation70_spill] sm:$0xff]  ;;  %v1063_v26 = vmul.f32 %v7857_v15, %v7871_v62  ;;  %v7872_v23 = vld [vmem:[#allocation73_spill] sm:$0xff] }
  0xc4   : > { %v1062_v17 = vmul.f32 %v7857_v15, %v7870_v61  ;;  %v1064_v40 = vmul.f32 %v7857_v15, %v7872_v23  ;;  %v7873_v44 = vld [vmem:[#allocation74_spill] sm:$0xff]  ;;  %v7874_v4 = vld [vmem:[#allocation75_spill] sm:$0xff]  ;;  %v7875_v0 = vld [vmem:[#allocation76_spill] sm:$0xff]  ;;  %7885 = vst [vmem:[#allocation41_spill] sm:$0xff] %v4795_v25 }
  0xc5   : > { %v1065_v48 = vmul.f32 %v7857_v15, %v7873_v44  ;;  %v1066_v33 = vmul.f32 %v7857_v15, %v7874_v4  ;;  %v1067_v59 = vmul.f32 %v7857_v15, %v7875_v0  ;;  %v7876_v37 = vld [vmem:[#allocation77_spill] sm:$0xff]  ;;  %v7877_v20 = vld [vmem:[#allocation78_spill] sm:$0xff]  ;;  %v7878_v9 = vld [vmem:[#allocation79_spill] sm:$0xff] }
  0xc6   : > { %v1068_v50 = vmul.f32 %v7857_v15, %v7876_v37  ;;  %v1069_v61 = vmul.f32 %v7857_v15, %v7877_v20  ;;  %v1070_v62 = vmul.f32 %v7857_v15, %v7878_v9  ;;  %v7879_v18 = vld [vmem:[#allocation80_spill] sm:$0xff]  ;;  %v7880_v58 = vld [vmem:[#allocation81_spill] sm:$0xff]  ;;  %v7881_v1 = vld [vmem:[#allocation82_spill] sm:$0xff]  ;;  %v1076_v9 = vmul.f32 %v7857_v15, %v4754_v21 }
  0xc7   : > { %v1071_v23 = vmul.f32 %v7857_v15, %v7879_v18  ;;  %v1072_v44 = vmul.f32 %v7857_v15, %v7880_v58  ;;  %v1073_v4 = vmul.f32 %v7857_v15, %v7881_v1  ;;  %v4782_v14 = vld [vmem:[#allocation2 + $0x210] sm:$0xff]  ;;  %v7883_v0 = vld [vmem:[#allocation83_spill] sm:$0xff]  ;;  %v1077_v18 = vmul.f32 %v7857_v15, %v4756_v36 }
  0xc8   : > { %7882 = vst [vmem:[#allocation22_spill] sm:$0xff] %v4782_v14  ;;  %v1074_v37 = vmul.f32 %v7857_v15, %v7883_v0  ;;  %v7884_v24 = vld [vmem:[#allocation84_spill] sm:$0xff]  ;;  %v1078_v58 = vmul.f32 %v7857_v15, %v4782_v14  ;;  %v4798_v1 = vadd.f32 %v1058_v12, %v4500_v27  ;;  %v4801_v0 = vadd.f32 %v1059_v55, %v4503_v42  ;;  %v7903_v12 = vld [vmem:[#allocation89_spill] sm:$0xff] }
  0xc9   : > { %v1075_v20 = vmul.f32 %v7857_v15, %v7884_v24  ;;  %v4804_v24 = vadd.f32 %v1060_v28, %v4506_v7  ;;  %v4807_v21 = vadd.f32 %v1061_v29, %v4509_v43  ;;  %v4810_v36 = vadd.f32 %v1062_v17, %v4512_v5  ;;  %v7901_v17 = vld [vmem:[#allocation48_spill] sm:$0xff] }
  0xca   : > { %v4813_v14 = vadd.f32 %v1063_v26, %v4515_v22  ;;  %v4816_v53 = vadd.f32 %v1064_v40, %v4518_v57  ;;  %v4819_v27 = vadd.f32 %v1065_v48, %v4521_v38  ;;  %v4822_v42 = vadd.f32 %v1066_v33, %v4524_v45  ;;  %v7895_v33 = vld [vmem:[#allocation36_spill] sm:$0xff]  ;;  %v7899_v26 = vld [vmem:[#allocation46_spill] sm:$0xff] }
  0xcb   : > { %v4825_v7 = vadd.f32 %v1067_v59, %v4527_v52  ;;  %v4828_v43 = vadd.f32 %v1068_v50, %v4530_v54  ;;  %v4831_v5 = vadd.f32 %v1069_v61, %v4533_v41  ;;  %v4834_v22 = vadd.f32 %v1070_v62, %v4536_v6  ;;  %v7888_v41 = vld [vmem:[#allocation19_spill] sm:$0xff]  ;;  %v7904_v28 = vld [vmem:[#allocation52_spill] sm:$0xff] }
  0xcc   : > { %v4837_v57 = vadd.f32 %v1071_v23, %v4539_v2  ;;  %v4840_v38 = vadd.f32 %v1072_v44, %v4542_v11  ;;  %v4843_v45 = vadd.f32 %v1073_v4, %v4545_v49  ;;  %v4846_v52 = vadd.f32 %v1074_v37, %v4548_v56  ;;  %v7892_v49 = vld [vmem:[#allocation29_spill] sm:$0xff]  ;;  %v7893_v56 = vld [vmem:[#allocation30_spill] sm:$0xff]  ;;  %v7900_v4 = vld [vmem:[#allocation47_spill] sm:$0xff] }
  0xcd   : > { %v4849_v54 = vadd.f32 %v1075_v20, %v4551_v39  ;;  %v1037_v50 = vmul.f32 %v7857_v15, %v7888_v41  ;;  %v4854_v6 = vadd.f32 %v1076_v9, %v4555_v63  ;;  %v4857_v2 = vadd.f32 %v1077_v18, %v4558_v34  ;;  %v7894_v39 = vld [vmem:[#allocation31_spill] sm:$0xff]  ;;  %v7896_v63 = vld [vmem:[#allocation42_spill] sm:$0xff]  ;;  %v7897_v34 = vld [vmem:[#allocation37_spill] sm:$0xff] }
  0xce   : > { %7886 = vst [vmem:[#allocation21_spill] sm:$0xff] %v4846_v52  ;;  %v4860_v11 = vadd.f32 %v1078_v58, %v4561_v3  ;;  %v1038_v59 = vmul.f32 %v7857_v15, %v7892_v49  ;;  %v1039_v37 = vmul.f32 %v7857_v15, %v7893_v56  ;;  %v1040_v20 = vmul.f32 %v7857_v15, %v7894_v39  ;;  %v7898_v3 = vld [vmem:[#allocation43_spill] sm:$0xff]  ;;  %v7905_v9 = vld [vmem:[#allocation53_spill] sm:$0xff]  ;;  %v7906_v39 = vld [vmem:[#allocation90_spill] sm:$0xff] }
  0xcf   : > { %7887 = vst [vmem:[#allocation71_spill] sm:$0xff] %v4849_v54  ;;  %7889 = vst [vmem:[#allocation25_spill] sm:$0xff] %v4854_v6  ;;  %v1041_v48 = vmul.f32 %v7857_v15, %v7895_v33  ;;  %v1042_v40 = vmul.f32 %v7857_v15, %v7896_v63  ;;  %v1043_v18 = vmul.f32 %v7857_v15, %v7897_v34  ;;  %v7902_v62 = vld [vmem:[#allocation51_spill] sm:$0xff]  ;;  %v7911_v6 = vld [vmem:[#allocation58_spill] sm:$0xff] }
  0xd0   : > { %7890 = vst [vmem:[#allocation28_spill] sm:$0xff] %v4857_v2  ;;  %7891 = vst [vmem:[#allocation26_spill] sm:$0xff] %v4860_v11  ;;  %v1044_v58 = vmul.f32 %v7857_v15, %v7898_v3  ;;  %v1045_v29 = vmul.f32 %v7857_v15, %v7899_v26  ;;  %v1046_v55 = vmul.f32 %v7857_v15, %v7900_v4  ;;  %v7908_v4 = vld [vmem:[#allocation56_spill] sm:$0xff]  ;;  %v7910_v11 = vld [vmem:[#allocation57_spill] sm:$0xff] }
  0xd1   : > { %v1047_v61 = vmul.f32 %v7857_v15, %v7901_v17  ;;  %v1048_v30 = vmul.f32 %v7857_v15, %v7902_v62  ;;  %v1049_v44 = vmul.f32 %v7857_v15, %v7903_v12  ;;  %v1050_v23 = vmul.f32 %v7857_v15, %v7904_v28  ;;  %v7913_v54 = vld [vmem:[#allocation61_spill] sm:$0xff] }
  0xd2   : > { %v1051_v41 = vmul.f32 %v7857_v15, %v7905_v9  ;;  %v4892_v34 = vmul.f32 %v7857_v15, %v7906_v39  ;;  %v4896_v25 = vmul.f32 %v7857_v15, %v7908_v4  ;;  %v4900_v2 = vmul.f32 %v7857_v15, %v7910_v11 }
  0xd3   : > { %v4904_v12 = vmul.f32 %v7857_v15, %v7911_v6  ;;  %v4908_v52 = vmul.f32 %v7857_v15, %v7913_v54  ;;  %v4912_v39 = vadd.f32 %v4722_v8, %v4629_v32  ;;  %v4924_v6 = vadd.f32 %v4734_v35, %v4642_v60  ;;  %v7921_v8 = vld [vmem:[#allocation85_spill] sm:$0xff]  ;;  %v7929_v35 = vld [vmem:[#allocation91_spill] sm:$0xff] }
  0xd4   : > { %7907 = vst [vmem:[#allocation27_spill] sm:$0xff] %v4892_v34  ;;  %7909 = vst [vmem:[#allocation32_spill] sm:$0xff] %v4896_v25  ;;  %v4916_v34 = vadd.f32 %v4726_v31, %v4633_v19  ;;  %v4920_v25 = vadd.f32 %v4730_v51, %v4637_v10  ;;  %v4928_v15 = vadd.f32 %v4738_v47, %v4645_v13  ;;  %v7923_v19 = vld [vmem:[#allocation86_spill] sm:$0xff]  ;;  %v7925_v10 = vld [vmem:[#allocation87_spill] sm:$0xff] }
  0xd5   : > { %7912 = vst [vmem:[#allocation33_spill] sm:$0xff] %v4904_v12  ;;  %7914 = vst [vmem:[#allocation34_spill] sm:$0xff] %v4908_v52  ;;  %v4932_v32 = vadd.f32 %v4742_v16, %v4648_v46  ;;  %v4938_v31 = vadd.f32 %v1038_v59, %v7923_v19  ;;  %v4941_v51 = vadd.f32 %v1039_v37, %v7925_v10  ;;  %v7931_v13 = vld [vmem:[#allocation92_spill] sm:$0xff]  ;;  %v7933_v46 = vld [vmem:[#allocation93_spill] sm:$0xff] }
  0xd6   : > { %7915 = vst [vmem:[#allocation38_spill] sm:$0xff] %v4912_v39  ;;  %7916 = vst [vmem:[#allocation39_spill] sm:$0xff] %v4916_v34  ;;  %v4935_v39 = vadd.f32 %v1037_v50, %v7921_v8  ;;  %v4950_v47 = vadd.f32 %v1042_v40, %v7931_v13  ;;  %v4953_v16 = vadd.f32 %v1043_v18, %v7933_v46  ;;  %v7935_v50 = vld [vmem:[#allocation94_spill] sm:$0xff]  ;;  %v7937_v59 = vld [vmem:[#allocation105_spill] sm:$0xff] }
  0xd7   : > { %7917 = vst [vmem:[#allocation44_spill] sm:$0xff] %v4920_v25  ;;  %7918 = vst [vmem:[#allocation45_spill] sm:$0xff] %v4924_v6  ;;  %v7927_v25 = vld [vmem:[#allocation88_spill] sm:$0xff]  ;;  %v4947_v6 = vadd.f32 %v1041_v48, %v7929_v35  ;;  %v4956_v8 = vadd.f32 %v1044_v58, %v7935_v50  ;;  %v4959_v19 = vadd.f32 %v1045_v29, %v7937_v59  ;;  %v7939_v37 = vld [vmem:[#allocation95_spill] sm:$0xff] }
  0xd8   : > { %7919 = vst [vmem:[#allocation50_spill] sm:$0xff] %v4928_v15  ;;  %7920 = vst [vmem:[#allocation54_spill] sm:$0xff] %v4932_v32  ;;  %v4944_v60 = vadd.f32 %v1040_v20, %v7927_v25  ;;  %v4962_v10 = vadd.f32 %v1046_v55, %v7939_v37  ;;  %v7941_v25 = vld [vmem:[#allocation96_spill] sm:$0xff]  ;;  %v7943_v48 = vld [vmem:[#allocation97_spill] sm:$0xff] }
  0xd9   : > { %7922 = vst [vmem:[#allocation55_spill] sm:$0xff] %v4935_v39  ;;  %7924 = vst [vmem:[#allocation59_spill] sm:$0xff] %v4938_v31  ;;  %v4965_v20 = vadd.f32 %v1047_v61, %v7941_v25  ;;  %v4968_v35 = vadd.f32 %v1048_v30, %v7943_v48  ;;  %v7945_v40 = vld [vmem:[#allocation106_spill] sm:$0xff]  ;;  %v7947_v18 = vld [vmem:[#allocation107_spill] sm:$0xff] }
  0xda   : > { %7926 = vst [vmem:[#allocation63_spill] sm:$0xff] %v4941_v51  ;;  %7928 = vst [vmem:[#allocation64_spill] sm:$0xff] %v4944_v60  ;;  %v4971_v13 = vadd.f32 %v1049_v44, %v7945_v40  ;;  %v4974_v46 = vadd.f32 %v1050_v23, %v7947_v18  ;;  %v7949_v58 = vld [vmem:[#allocation110_spill] sm:$0xff]  ;;  %v4979_v29 = vld [vmem:[#allocation2 + $0x28] sm:$0xff] }
  0xdb   : > { %7930 = vst [vmem:[#allocation65_spill] sm:$0xff] %v4947_v6  ;;  %7932 = vst [vmem:[#allocation98_spill] sm:$0xff] %v4950_v47  ;;  %v4977_v50 = vadd.f32 %v1051_v41, %v7949_v58  ;;  %v7952_v59 = vld [vmem:[#allocation16_spill] sm:$0xff]  ;;  %v7954_v61 = vld [vmem:[#allocation17_spill] sm:$0xff] }
  0xdc   : > { %7934 = vst [vmem:[#allocation11_spill] sm:$0xff] %v4953_v16  ;;  %7936 = vst [vmem:[#allocation15_spill] sm:$0xff] %v4956_v8  ;;  %v4983_v55 = vmul.f32 %v4979_v29, %v7952_v59  ;;  %v4987_v37 = vmul.f32 %v7952_v59, %v7954_v61  ;;  %v7956_v30 = vld [vmem:[#allocation18_spill] sm:$0xff]  ;;  %v7957_v25 = vld [vmem:[#allocation24_spill] sm:$0xff]  ;;  %v4999_v41 = vmul.f32 %v7952_v59, %v7892_v49 }
  0xdd   : > { %7938 = vst [vmem:[#allocation12_spill] sm:$0xff] %v4959_v19  ;;  %7940 = vst [vmem:[#allocation13_spill] sm:$0xff] %v4962_v10  ;;  %v4991_v44 = vmul.f32 %v7952_v59, %v7956_v30  ;;  %v4995_v23 = vmul.f32 %v7952_v59, %v7957_v25  ;;  %v5003_v48 = vmul.f32 %v7952_v59, %v7893_v56  ;;  %v7958_v61 = vld [vmem:[#allocation62_spill] sm:$0xff]  ;;  %v7959_v30 = vld [vmem:[#allocation67_spill] sm:$0xff] }
  0xde   : > { %7942 = vst [vmem:[#allocation66_spill] sm:$0xff] %v4965_v20  ;;  %7944 = vst [vmem:[#allocation69_spill] sm:$0xff] %v4968_v35  ;;  %v5007_v40 = vmul.f32 %v7952_v59, %v7895_v33  ;;  %v5011_v18 = vmul.f32 %v7952_v59, %v7896_v63  ;;  %v5015_v58 = vmul.f32 %v7952_v59, %v7898_v3  ;;  %v7960_v25 = vld [vmem:[#allocation68_spill] sm:$0xff]  ;;  %v7964_v35 = vld [vmem:[#allocation75_spill] sm:$0xff] }
  0xdf   : > { %7946 = vst [vmem:[#allocation73_spill] sm:$0xff] %v4971_v13  ;;  %7948 = vst [vmem:[#allocation76_spill] sm:$0xff] %v4974_v46  ;;  %v5019_v49 = vmul.f32 %v7952_v59, %v7899_v26  ;;  %v5023_v56 = vmul.f32 %v7952_v59, %v7901_v17  ;;  %v5027_v33 = vmul.f32 %v7952_v59, %v7902_v62  ;;  %v7962_v46 = vld [vmem:[#allocation72_spill] sm:$0xff]  ;;  %v7963_v13 = vld [vmem:[#allocation74_spill] sm:$0xff] }
  0xe0   : > { %7950 = vst [vmem:[#allocation79_spill] sm:$0xff] %v4977_v50  ;;  %7951 = vst [vmem:[#allocation82_spill] sm:$0xff] %v4979_v29  ;;  %v5031_v63 = vmul.f32 %v7952_v59, %v7904_v28  ;;  %v5035_v3 = vmul.f32 %v7952_v59, %v7905_v9  ;;  %v5039_v26 = vmul.f32 %v7952_v59, %v7908_v4  ;;  %v7961_v4 = vld [vmem:[#allocation70_spill] sm:$0xff]  ;;  %v7967_v8 = vld [vmem:[#allocation80_spill] sm:$0xff]  ;;  %v7433_v39 = vrot.slane %v5011_v18, 1 }
  0xe1   : > { %7953 = vst [vmem:[#allocation19_spill] sm:$0xff] %v4983_v55  ;;  %7955 = vst [vmem:[#allocation29_spill] sm:$0xff] %v4987_v37  ;;  %v5043_v17 = vmul.f32 %v7952_v59, %v7910_v11  ;;  %v5047_v62 = vmul.f32 %v7952_v59, %v7913_v54  ;;  %v5051_v28 = vmul.f32 %v7952_v59, %v7958_v61  ;;  %v7965_v61 = vld [vmem:[#allocation77_spill] sm:$0xff]  ;;  %v7966_v19 = vld [vmem:[#allocation78_spill] sm:$0xff] }
  0xe2   : > { %v1149_v9 = vmul.f32 %v7952_v59, %v7959_v30  ;;  %v1150_v29 = vmul.f32 %v7952_v59, %v7960_v25  ;;  %v1151_v50 = vmul.f32 %v7952_v59, %v7961_v4  ;;  %v1152_v11 = vmul.f32 %v7952_v59, %v7962_v46  ;;  %v7968_v16 = vld [vmem:[#allocation81_spill] sm:$0xff]  ;;  %v7969_v47 = vld [vmem:[#allocation83_spill] sm:$0xff]  ;;  %v7970_v6 = vld [vmem:[#allocation84_spill] sm:$0xff] }
  0xe3   : > { %v1153_v54 = vmul.f32 %v7952_v59, %v7963_v13  ;;  %v1154_v20 = vmul.f32 %v7952_v59, %v7964_v35  ;;  %v1155_v10 = vmul.f32 %v7952_v59, %v7965_v61  ;;  %v1156_v30 = vmul.f32 %v7952_v59, %v7966_v19  ;;  %v7971_v60 = vld [vmem:[#allocation116_spill] sm:$0xff]  ;;  %v7972_v51 = vld [vmem:[#allocation22_spill] sm:$0xff] }
  0xe4   : > { %v1157_v25 = vmul.f32 %v7952_v59, %v7967_v8  ;;  %v1158_v4 = vmul.f32 %v7952_v59, %v7968_v16  ;;  %v1159_v46 = vmul.f32 %v7952_v59, %v7969_v47  ;;  %v1160_v13 = vmul.f32 %v7952_v59, %v7970_v6 }
  0xe5   : > { %v1161_v35 = vmul.f32 %v7952_v59, %v7971_v60  ;;  %v1162_v61 = vmul.f32 %v7952_v59, %v7972_v51  ;;  %v1222_v32 = vrot.slane %v1149_v9, 1  ;;  %v1223_v6 = vrot.slane %v1150_v29, 1 }
  0xe6   : > { %v1225_v15 = vrot.slane %v1151_v50, 1  ;;  %v1226_v34 = vrot.slane %v1152_v11, 1  ;;  %v1228_v60 = vrot.slane %v1153_v54, 1  ;;  %v1229_v52 = vrot.slane %v1154_v20, 1 }
  0xe7   : > { %v1231_v12 = vrot.slane %v1155_v10, 1  ;;  %v1232_v59 = vrot.slane %v1156_v30, 1  ;;  %v1234_v51 = vrot.slane %v1157_v25, 1  ;;  %v1235_v19 = vrot.slane %v1158_v4, 1 }
  0xe8   : > { %v1237_v55 = vrot.slane %v1159_v46, 1  ;;  %v1238_v31 = vrot.slane %v1160_v13, 1  ;;  %v1240_v37 = vrot.slane %v1161_v35, 1  ;;  %v1241_v8 = vrot.slane %v1162_v61, 1 }
  0xe9   : > { %v7434_v16 = vrot.slane %v5007_v40, 1  ;;  %v1224_v29 = vsel %vm605_vm2, %v1222_v32, %v1223_v6  ;;  %v7432_v50 = vrot.slane %v5019_v49, 1  ;;  %v1227_v9 = vsel %vm605_vm2, %v1225_v15, %v1226_v34 }
  0xea   : > { %v1230_v54 = vsel %vm605_vm2, %v1228_v60, %v1229_v52  ;;  %v1233_v30 = vsel %vm605_vm2, %v1231_v12, %v1232_v59  ;;  %v1236_v25 = vsel %vm605_vm2, %v1234_v51, %v1235_v19  ;;  %v1239_v4 = vsel %vm605_vm2, %v1237_v55, %v1238_v31 }
  0xeb   : > { %v1242_v46 = vsel %vm605_vm2, %v1240_v37, %v1241_v8  ;;  %v5102_v13 = vadd.f32 %v1222_v32, %v4798_v1  ;;  %v5105_v35 = vadd.f32 %v1224_v29, %v4801_v0  ;;  %v5108_v61 = vadd.f32 %v1223_v6, %v4804_v24  ;;  %v7987_v32 = vld [vmem:[#allocation26_spill] sm:$0xff]  ;;  %v7991_v6 = vld [vmem:[#allocation40_spill] sm:$0xff]  ;;  %v7993_v29 = vld [vmem:[#allocation9_spill] sm:$0xff] }
  0xec   : > { %v5111_v11 = vadd.f32 %v1225_v15, %v4807_v21  ;;  %v5114_v20 = vadd.f32 %v1227_v9, %v4810_v36  ;;  %v5117_v10 = vadd.f32 %v1226_v34, %v4813_v14  ;;  %v5120_v47 = vadd.f32 %v1228_v60, %v4816_v53  ;;  %v7985_v15 = vld [vmem:[#allocation28_spill] sm:$0xff] }
  0xed   : > { %v5123_v1 = vadd.f32 %v1230_v54, %v4819_v27  ;;  %v5126_v0 = vadd.f32 %v1229_v52, %v4822_v42  ;;  %v5129_v24 = vadd.f32 %v1231_v12, %v4825_v7  ;;  %v5132_v21 = vadd.f32 %v1233_v30, %v4828_v43  ;;  %v7979_v7 = vld [vmem:[#allocation21_spill] sm:$0xff]  ;;  %v7981_v43 = vld [vmem:[#allocation71_spill] sm:$0xff] }
  0xee   : > { %v5135_v36 = vadd.f32 %v1232_v59, %v4831_v5  ;;  %v5138_v14 = vadd.f32 %v1234_v51, %v4834_v22  ;;  %v5141_v53 = vadd.f32 %v1236_v25, %v4837_v57  ;;  %v5144_v27 = vadd.f32 %v1235_v19, %v4840_v38  ;;  %v7983_v12 = vld [vmem:[#allocation25_spill] sm:$0xff]  ;;  %v7990_v19 = vld [vmem:[#allocation27_spill] sm:$0xff] }
  0xef   : > { %7973 = vst [vmem:[#allocation30_spill] sm:$0xff] %v5132_v21  ;;  %v5147_v42 = vadd.f32 %v1237_v55, %v4843_v45  ;;  %v5150_v52 = vadd.f32 %v1239_v4, %v7979_v7  ;;  %v5153_v34 = vadd.f32 %v1238_v31, %v7981_v43  ;;  %v1214_v5 = vrot.slane %v5035_v3, 1  ;;  %v7989_v55 = vld [vmem:[#allocation111_spill] sm:$0xff]  ;;  %v7994_v54 = vld [vmem:[#allocation29_spill] sm:$0xff] }
  0xf0   : > { %7974 = vst [vmem:[#allocation31_spill] sm:$0xff] %v5135_v36  ;;  %7975 = vst [vmem:[#allocation36_spill] sm:$0xff] %v5138_v14  ;;  %v5157_v22 = vadd.f32 %v1240_v37, %v7983_v12  ;;  %v5160_v57 = vadd.f32 %v1242_v46, %v7985_v15  ;;  %v5163_v38 = vadd.f32 %v1241_v8, %v7987_v32  ;;  %v1216_v45 = vrot.slane %v5039_v26, 1  ;;  %v7992_v37 = vld [vmem:[#allocation32_spill] sm:$0xff]  ;;  %v7996_v30 = vld [vmem:[#allocation19_spill] sm:$0xff] }
  0xf1   : > { %7976 = vst [vmem:[#allocation42_spill] sm:$0xff] %v5141_v53  ;;  %7977 = vst [vmem:[#allocation37_spill] sm:$0xff] %v5144_v27  ;;  %v1217_v51 = vrot.slane %v5043_v17, 1  ;;  %v1219_v60 = vrot.slane %v5047_v62, 1  ;;  %v1220_v31 = vrot.slane %v5051_v28, 1  ;;  %v1100_v3 = vadd.f32 %v7990_v19, %v7989_v55  ;;  %v7998_v17 = vld [vmem:[#allocation35_spill] sm:$0xff] }
  0xf2   : > { %7978 = vst [vmem:[#allocation43_spill] sm:$0xff] %v5147_v42  ;;  %7980 = vst [vmem:[#allocation46_spill] sm:$0xff] %v5150_v52  ;;  %v1101_v59 = vadd.f32 %v7992_v37, %v7991_v6  ;;  %v1102_v9 = vadd.f32 %v4900_v2, %v7993_v29  ;;  %v7995_v8 = vrot.slane %v7994_v54, 1  ;;  %v7997_v25 = vrot.slane %v7996_v30, 1  ;;  %v7999_v4 = vld [vmem:[#allocation33_spill] sm:$0xff]  ;;  %v8000_v46 = vld [vmem:[#allocation115_spill] sm:$0xff] }
  0xf3   : > { %7982 = vst [vmem:[#allocation47_spill] sm:$0xff] %v5153_v34  ;;  %7984 = vst [vmem:[#allocation48_spill] sm:$0xff] %v5157_v22  ;;  %v1103_v62 = vadd.f32 %v7999_v4, %v7998_v17  ;;  %v8001_v28 = vld [vmem:[#allocation34_spill] sm:$0xff]  ;;  %v8002_v43 = vrot.slane %v4995_v23, 1  ;;  %v8003_v12 = vrot.slane %v4991_v44, 1  ;;  %v8004_v2 = vrot.slane %v5003_v48, 1 }
  0xf4   : > { %7986 = vst [vmem:[#allocation51_spill] sm:$0xff] %v5160_v57  ;;  %7988 = vst [vmem:[#allocation89_spill] sm:$0xff] %v5163_v38  ;;  %v1197_v26 = vsel %vm605_vm2, %v7997_v25, %v7995_v8  ;;  %v1104_v7 = vadd.f32 %v8001_v28, %v8000_v46  ;;  %v8005_v32 = vrot.slane %v4999_v41, 1  ;;  %v1206_v19 = vsel %vm605_vm2, %v7434_v16, %v7433_v39  ;;  %v8021_v38 = vld [vmem:[#allocation50_spill] sm:$0xff]  ;;  %v5540_v34 = vld [vmem:[#allocation2 + $0x1e8] sm:$0xff] }
  0xf5   : > { %v1200_v15 = vsel %vm605_vm2, %v8003_v12, %v8002_v43  ;;  %v8006_v6 = vrot.slane %v5015_v58, 1  ;;  %v8007_v29 = vrot.slane %v5027_v33, 1  ;;  %v8008_v8 = vrot.slane %v5023_v56, 1  ;;  %v8010_v43 = vld [vmem:[#allocation38_spill] sm:$0xff] }
  0xf6   : > { %v1203_v55 = vsel %vm605_vm2, %v8005_v32, %v8004_v2  ;;  %v8009_v17 = vrot.slane %v5031_v63, 1  ;;  %v1218_v46 = vsel %vm605_vm2, %v1216_v45, %v1217_v51  ;;  %v1221_v28 = vsel %vm605_vm2, %v1219_v60, %v1220_v31  ;;  %v8013_v32 = vld [vmem:[#allocation39_spill] sm:$0xff]  ;;  %v8023_v22 = vld [vmem:[#allocation54_spill] sm:$0xff] }
  0xf7   : > { %v1209_v37 = vsel %vm605_vm2, %v8006_v6, %v7432_v50  ;;  %v1212_v25 = vsel %vm605_vm2, %v8008_v8, %v8007_v29  ;;  %v8011_v12 = vrot.slane %v7996_v30, 1  ;;  %v5220_v6 = vadd.f32 %v1197_v26, %v8013_v32  ;;  %v8015_v50 = vld [vmem:[#allocation44_spill] sm:$0xff]  ;;  %v8018_v8 = vld [vmem:[#allocation45_spill] sm:$0xff]  ;;  %v8026_v26 = vld [vmem:[#allocation55_spill] sm:$0xff] }
  0xf8   : > { %v1215_v4 = vsel %vm605_vm2, %v8009_v17, %v1214_v5  ;;  %v8016_v39 = vrot.slane %v7994_v54, 1  ;;  %v8019_v17 = vrot.slane %v4991_v44, 1  ;;  %v5233_v57 = vadd.f32 %v1200_v15, %v8021_v38  ;;  %v8031_v54 = vld [vmem:[#allocation63_spill] sm:$0xff]  ;;  %v8034_v38 = vld [vmem:[#allocation64_spill] sm:$0xff]  ;;  %8119 = vst [vmem:[#allocation45_spill] sm:$0xff] %v5540_v34 }
  0xf9   : > { %v5217_v2 = vadd.f32 %v8011_v12, %v8010_v43  ;;  %8014 = vst [vmem:[#allocation53_spill] sm:$0xff] %v5220_v6  ;;  %v8024_v30 = vrot.slane %v4995_v23, 1  ;;  %v8027_v12 = vrot.slane %v4999_v41, 1  ;;  %v8032_v44 = vrot.slane %v5003_v48, 1  ;;  %v8037_v23 = vld [vmem:[#allocation65_spill] sm:$0xff]  ;;  %v8045_v48 = vld [vmem:[#allocation15_spill] sm:$0xff] }
  0xfa   : > { %v5225_v29 = vadd.f32 %v8016_v39, %v8015_v50  ;;  %v5230_v16 = vadd.f32 %v8019_v17, %v8018_v8  ;;  %8022 = vst [vmem:[#allocation57_spill] sm:$0xff] %v5233_v57  ;;  %v8029_v39 = vld [vmem:[#allocation59_spill] sm:$0xff]  ;;  %v8035_v15 = vrot.slane %v5007_v40, 1  ;;  %v8040_v41 = vrot.slane %v5011_v18, 1  ;;  %v8053_v18 = vld [vmem:[#allocation66_spill] sm:$0xff] }
  0xfb   : > { %8012 = vst [vmem:[#allocation52_spill] sm:$0xff] %v5217_v2  ;;  %v5238_v43 = vadd.f32 %v8024_v30, %v8023_v22  ;;  %v5243_v32 = vadd.f32 %v8027_v12, %v8026_v26  ;;  %v5246_v50 = vadd.f32 %v1203_v55, %v8029_v39  ;;  %v5251_v8 = vadd.f32 %v8032_v44, %v8031_v54  ;;  %v8039_v30 = vld [vmem:[#allocation98_spill] sm:$0xff]  ;;  %v8042_v55 = vld [vmem:[#allocation11_spill] sm:$0xff]  ;;  %v8047_v44 = vld [vmem:[#allocation12_spill] sm:$0xff] }
  0xfc   : > { %8017 = vst [vmem:[#allocation90_spill] sm:$0xff] %v5225_v29  ;;  %8020 = vst [vmem:[#allocation56_spill] sm:$0xff] %v5230_v16  ;;  %v5256_v17 = vadd.f32 %v8035_v15, %v8034_v38  ;;  %v5259_v22 = vadd.f32 %v1206_v19, %v8037_v23  ;;  %v5264_v26 = vadd.f32 %v8040_v41, %v8039_v30  ;;  %v8043_v12 = vrot.slane %v5015_v58, 1  ;;  %v8050_v19 = vld [vmem:[#allocation13_spill] sm:$0xff] }
  0xfd   : > { %8025 = vst [vmem:[#allocation58_spill] sm:$0xff] %v5238_v43  ;;  %8028 = vst [vmem:[#allocation61_spill] sm:$0xff] %v5243_v32  ;;  %v5272_v54 = vadd.f32 %v1209_v37, %v8045_v48  ;;  %v8048_v40 = vrot.slane %v5019_v49, 1  ;;  %v8051_v15 = vrot.slane %v5023_v56, 1  ;;  %v5285_v30 = vadd.f32 %v1212_v25, %v8053_v18  ;;  %v8055_v41 = vld [vmem:[#allocation69_spill] sm:$0xff]  ;;  %v8061_v49 = vld [vmem:[#allocation76_spill] sm:$0xff] }
  0xfe   : > { %8030 = vst [vmem:[#allocation85_spill] sm:$0xff] %v5246_v50  ;;  %8033 = vst [vmem:[#allocation86_spill] sm:$0xff] %v5251_v8  ;;  %v5269_v39 = vadd.f32 %v8043_v12, %v8042_v55  ;;  %v8056_v58 = vrot.slane %v5027_v33, 1  ;;  %v8058_v37 = vld [vmem:[#allocation73_spill] sm:$0xff]  ;;  %v8059_v12 = vrot.slane %v5031_v63, 1  ;;  %v5305_v25 = vadd.f32 %v1218_v46, %v1101_v59  ;;  %v5477_v8 = vld [vmem:[#allocation2 + $0x170] sm:$0xff] }
  0xff   : > { %8036 = vst [vmem:[#allocation87_spill] sm:$0xff] %v5256_v17  ;;  %8038 = vst [vmem:[#allocation88_spill] sm:$0xff] %v5259_v22  ;;  %v5277_v38 = vadd.f32 %v8048_v40, %v8047_v44  ;;  %v5282_v23 = vadd.f32 %v8051_v15, %v8050_v19  ;;  %v5298_v44 = vadd.f32 %v1215_v4, %v8061_v49  ;;  %v8063_v40 = vld [vmem:[#allocation79_spill] sm:$0xff]  ;;  %v8105_v22 = vld [vmem:[#allocation104_spill] sm:$0xff] }
 0x100   : > { %8041 = vst [vmem:[#allocation91_spill] sm:$0xff] %v5264_v26  ;;  %8044 = vst [vmem:[#allocation92_spill] sm:$0xff] %v5269_v39  ;;  %v5290_v55 = vadd.f32 %v8056_v58, %v8055_v41  ;;  %v5295_v48 = vadd.f32 %v8059_v12, %v8058_v37  ;;  %v5301_v56 = vadd.f32 %v1214_v5, %v8063_v40  ;;  %v8070_v41 = vld [vmem:[#allocation41_spill] sm:$0xff]  ;;  %v8071_v58 = vld [vmem:[#allocation23_spill] sm:$0xff] }
 0x101   : > { %8046 = vst [vmem:[#allocation93_spill] sm:$0xff] %v5272_v54  ;;  %8049 = vst [vmem:[#allocation94_spill] sm:$0xff] %v5277_v38  ;;  %v5303_v19 = vadd.f32 %v1216_v45, %v1100_v3  ;;  %v5307_v15 = vadd.f32 %v1217_v51, %v1102_v9  ;;  %v5309_v33 = vadd.f32 %v1219_v60, %v1103_v62  ;;  %v8072_v37 = vld [vmem:[#allocation82_spill] sm:$0xff]  ;;  %v3190_v12 = vld [vmem:[#allocation2 + $0x30] sm:$0xff] }
 0x102   : > { %8052 = vst [vmem:[#allocation105_spill] sm:$0xff] %v5282_v23  ;;  %8054 = vst [vmem:[#allocation95_spill] sm:$0xff] %v5285_v30  ;;  %v5311_v18 = vadd.f32 %v1221_v28, %v1104_v7  ;;  %v5314_v63 = vadd.f32 %v1220_v31, %v8070_v41  ;;  %v5318_v4 = vmul.f32 %v8072_v37, %v8071_v58  ;;  %v8073_v45 = vld [vmem:[#allocation49_spill] sm:$0xff]  ;;  %v5327_v51 = vld [vmem:[#allocation2 + $0x48] sm:$0xff] }
 0x103   : > { %8057 = vst [vmem:[#allocation96_spill] sm:$0xff] %v5290_v55  ;;  %8060 = vst [vmem:[#allocation97_spill] sm:$0xff] %v5295_v48  ;;  %v5321_v5 = vmul.f32 %v3190_v12, %v8071_v58  ;;  %v5325_v3 = vmul.f32 %v8071_v58, %v8073_v45  ;;  %v5331_v60 = vmul.f32 %v5327_v51, %v8071_v58  ;;  %v5333_v31 = vld [vmem:[#allocation2 + $0x50] sm:$0xff]  ;;  %v5343_v7 = vld [vmem:[#allocation2 + $0x68] sm:$0xff] }
 0x104   : > { %8062 = vst [vmem:[#allocation106_spill] sm:$0xff] %v5298_v44  ;;  %8064 = vst [vmem:[#allocation107_spill] sm:$0xff] %v5301_v56  ;;  %v5337_v59 = vmul.f32 %v5333_v31, %v8071_v58  ;;  %v8076_v9 = vld [vmem:[#allocation60_spill] sm:$0xff]  ;;  %v5347_v46 = vmul.f32 %v5343_v7, %v8071_v58  ;;  %v8079_v40 = vld [vmem:[#allocation99_spill] sm:$0xff] }
 0x105   : > { %8065 = vst [vmem:[#allocation110_spill] sm:$0xff] %v5303_v19  ;;  %8066 = vst [vmem:[#allocation16_spill] sm:$0xff] %v5305_v25  ;;  %v5341_v62 = vmul.f32 %v8071_v58, %v8076_v9  ;;  %v5349_v28 = vld [vmem:[#allocation2 + $0x70] sm:$0xff]  ;;  %v5357_v41 = vmul.f32 %v8071_v58, %v8079_v40  ;;  %v5359_v37 = vld [vmem:[#allocation2 + $0x88] sm:$0xff] }
 0x106   : > { %8067 = vst [vmem:[#allocation17_spill] sm:$0xff] %v5307_v15  ;;  %8068 = vst [vmem:[#allocation18_spill] sm:$0xff] %v5309_v33  ;;  %v5353_v49 = vmul.f32 %v5349_v28, %v8071_v58  ;;  %v5363_v12 = vmul.f32 %v5359_v37, %v8071_v58  ;;  %v5365_v45 = vld [vmem:[#allocation2 + $0x90] sm:$0xff]  ;;  %v5391_v33 = vld [vmem:[#allocation2 + $0xc8] sm:$0xff] }
 0x107   : > { %8069 = vst [vmem:[#allocation24_spill] sm:$0xff] %v5311_v18  ;;  %8074 = vst [vmem:[#allocation62_spill] sm:$0xff] %v5327_v51  ;;  %v5369_v9 = vmul.f32 %v5365_v45, %v8071_v58  ;;  %v5381_v51 = vld [vmem:[#allocation2 + $0xb0] sm:$0xff]  ;;  %v8085_v18 = vld [vmem:[#allocation14_spill] sm:$0xff] }
 0x108   : > { %8075 = vst [vmem:[#allocation67_spill] sm:$0xff] %v5333_v31  ;;  %8077 = vst [vmem:[#allocation68_spill] sm:$0xff] %v5343_v7  ;;  %v8082_v7 = vld [vmem:[#allocation100_spill] sm:$0xff]  ;;  %v5375_v31 = vld [vmem:[#allocation2 + $0xa8] sm:$0xff] }
 0x109   : > { %8078 = vst [vmem:[#allocation70_spill] sm:$0xff] %v5349_v28  ;;  %8080 = vst [vmem:[#allocation72_spill] sm:$0xff] %v5359_v37  ;;  %v5373_v28 = vmul.f32 %v8071_v58, %v8082_v7  ;;  %v5379_v40 = vmul.f32 %v5375_v31, %v8071_v58  ;;  %v5385_v37 = vmul.f32 %v5381_v51, %v8071_v58  ;;  %v5397_v15 = vld [vmem:[#allocation2 + $0xd0] sm:$0xff]  ;;  %v8088_v25 = vld [vmem:[#allocation10_spill] sm:$0xff] }
 0x10a   : > { %8081 = vst [vmem:[#allocation74_spill] sm:$0xff] %v5365_v45  ;;  %8083 = vst [vmem:[#allocation75_spill] sm:$0xff] %v5375_v31  ;;  %v5389_v45 = vmul.f32 %v8071_v58, %v8085_v18  ;;  %v5395_v7 = vmul.f32 %v5391_v33, %v8071_v58  ;;  %v5401_v31 = vmul.f32 %v5397_v15, %v8071_v58  ;;  %v5407_v19 = vld [vmem:[#allocation2 + $0xe8] sm:$0xff]  ;;  %v5413_v56 = vld [vmem:[#allocation2 + $0xf0] sm:$0xff] }
 0x10b   : > { %8084 = vst [vmem:[#allocation77_spill] sm:$0xff] %v5381_v51  ;;  %8086 = vst [vmem:[#allocation78_spill] sm:$0xff] %v5391_v33  ;;  %v5405_v51 = vmul.f32 %v8071_v58, %v8088_v25  ;;  %v5411_v18 = vmul.f32 %v5407_v19, %v8071_v58  ;;  %v5417_v33 = vmul.f32 %v5413_v56, %v8071_v58  ;;  %v8091_v44 = vld [vmem:[#allocation101_spill] sm:$0xff]  ;;  %v5423_v48 = vld [vmem:[#allocation2 + $0x108] sm:$0xff] }
 0x10c   : > { %8087 = vst [vmem:[#allocation80_spill] sm:$0xff] %v5397_v15  ;;  %8089 = vst [vmem:[#allocation81_spill] sm:$0xff] %v5407_v19  ;;  %v5421_v15 = vmul.f32 %v8071_v58, %v8091_v44  ;;  %v5427_v25 = vmul.f32 %v5423_v48, %v8071_v58  ;;  %v5429_v55 = vld [vmem:[#allocation2 + $0x110] sm:$0xff]  ;;  %v8097_v30 = vld [vmem:[#allocation102_spill] sm:$0xff] }
 0x10d   : > { %8090 = vst [vmem:[#allocation83_spill] sm:$0xff] %v5413_v56  ;;  %8093 = vst [vmem:[#allocation21_spill] sm:$0xff] %v5423_v48  ;;  %v5433_v19 = vmul.f32 %v5429_v55, %v8071_v58  ;;  %v5437_v56 = vmul.f32 %v8071_v58, %v8097_v30  ;;  %v5439_v23 = vld [vmem:[#allocation2 + $0x128] sm:$0xff]  ;;  %v5445_v38 = vld [vmem:[#allocation2 + $0x130] sm:$0xff] }
 0x10e   : > { %8092 = vst [vmem:[#allocation84_spill] sm:$0xff] %v5421_v15  ;;  %8094 = vst [vmem:[#allocation71_spill] sm:$0xff] %v5427_v25  ;;  %v5443_v44 = vmul.f32 %v5439_v23, %v8071_v58  ;;  %v5449_v48 = vmul.f32 %v5445_v38, %v8071_v58  ;;  %v8102_v54 = vld [vmem:[#allocation103_spill] sm:$0xff]  ;;  %v5461_v26 = vld [vmem:[#allocation2 + $0x150] sm:$0xff] }
 0x10f   : > { %8095 = vst [vmem:[#allocation25_spill] sm:$0xff] %v5429_v55  ;;  %8096 = vst [vmem:[#allocation28_spill] sm:$0xff] %v5433_v19  ;;  %v5453_v55 = vmul.f32 %v8071_v58, %v8102_v54  ;;  %v5455_v39 = vld [vmem:[#allocation2 + $0x148] sm:$0xff]  ;;  %v8108_v50 = vld [vmem:[#allocation108_spill] sm:$0xff]  ;;  %v1442_v19 = vrot.slane %v5325_v3, 2 }
 0x110   : > { %8098 = vst [vmem:[#allocation26_spill] sm:$0xff] %v5437_v56  ;;  %8099 = vst [vmem:[#allocation111_spill] sm:$0xff] %v5439_v23  ;;  %v5459_v30 = vmul.f32 %v5455_v39, %v8071_v58  ;;  %v5465_v23 = vmul.f32 %v5461_v26, %v8071_v58  ;;  %v5471_v17 = vld [vmem:[#allocation2 + $0x168] sm:$0xff]  ;;  %v5493_v43 = vld [vmem:[#allocation2 + $0x190] sm:$0xff] }
 0x111   : > { %8100 = vst [vmem:[#allocation27_spill] sm:$0xff] %v5443_v44  ;;  %8101 = vst [vmem:[#allocation40_spill] sm:$0xff] %v5445_v38  ;;  %v5469_v38 = vmul.f32 %v8071_v58, %v8105_v22  ;;  %v5475_v54 = vmul.f32 %v5471_v17, %v8071_v58  ;;  %v5487_v32 = vld [vmem:[#allocation2 + $0x188] sm:$0xff]  ;;  %v5499_v57 = vld [vmem:[#allocation2 + $0x218] sm:$0x1]  ;;  %v1482_v14 = vrot.slane %v5453_v55, 2 }
 0x112   : > { %8103 = vst [vmem:[#allocation32_spill] sm:$0xff] %v5455_v39  ;;  %8104 = vst [vmem:[#allocation9_spill] sm:$0xff] %v5461_v26  ;;  %v5481_v39 = vmul.f32 %v5477_v8, %v8071_v58  ;;  %v5485_v26 = vmul.f32 %v8071_v58, %v8108_v50  ;;  %v5491_v22 = vmul.f32 %v5487_v32, %v8071_v58  ;;  %v5505_v50 = vld [vmem:[#allocation2 + $0x1a8] sm:$0xff]  ;;  %v5530_v25 = vld [vmem:[#allocation2 + $0x1d0] sm:$0xff]  ;;  %v1484_v36 = vrot.slane %v5459_v30, 2 }
 0x113   : > { %8106 = vst [vmem:[#allocation29_spill] sm:$0xff] %v5471_v17  ;;  %8107 = vst [vmem:[#allocation19_spill] sm:$0xff] %v5477_v8  ;;  %v5497_v17 = vmul.f32 %v5493_v43, %v8071_v58  ;;  %v8112_v8 = vld [vmem:[#allocation109_spill] sm:$0xff]  ;;  %v5509_v29 = vmul.f32 %v5505_v50, %v8071_v58  ;;  %v5521_v44 = vld [vmem:[#allocation2 + $0x1c8] sm:$0xff]  ;;  %v1390_v53 = vmul.f32 %v8071_v58, %v5499_v57 }
 0x114   : > { %8109 = vst [vmem:[#allocation35_spill] sm:$0xff] %v5487_v32  ;;  %8110 = vst [vmem:[#allocation33_spill] sm:$0xff] %v5493_v43  ;;  %v5503_v16 = vmul.f32 %v8071_v58, %v8112_v8  ;;  %v5511_v32 = vld [vmem:[#allocation2 + $0x1b0] sm:$0xff]  ;;  %v5525_v8 = vmul.f32 %v5521_v44, %v8071_v58  ;;  %v8121_v3 = vld [vmem:[#allocation114_spill] sm:$0xff] }
 0x115   : > { %8111 = vst [vmem:[#allocation115_spill] sm:$0xff] %v5499_v57  ;;  %8113 = vst [vmem:[#allocation34_spill] sm:$0xff] %v5505_v50  ;;  %v5515_v6 = vmul.f32 %v5511_v32, %v8071_v58  ;;  %v8115_v43 = vld [vmem:[#allocation112_spill] sm:$0xff]  ;;  %v1440_v50 = vrot.slane %v5321_v5, 2  ;;  %v1387_v52 = vmul.f32 %v8071_v58, %v8121_v3  ;;  %v8124_v3 = vrot.slane %v5318_v4, 2 }
 0x116   : > { %8114 = vst [vmem:[#allocation38_spill] sm:$0xff] %v5511_v32  ;;  %v5519_v2 = vmul.f32 %v8071_v58, %v8115_v43  ;;  %8116 = vst [vmem:[#allocation39_spill] sm:$0xff] %v5521_v44  ;;  %v5534_v32 = vmul.f32 %v5530_v25, %v8071_v58  ;;  %v8118_v43 = vld [vmem:[#allocation113_spill] sm:$0xff]  ;;  %v5544_v44 = vmul.f32 %v5540_v34, %v8071_v58  ;;  %v5546_v56 = vld [vmem:[#allocation2 + $0x1f0] sm:$0xff]  ;;  %v1487_v57 = vrot.slane %v5469_v38, 2 }
 0x117   : > { %8117 = vst [vmem:[#allocation44_spill] sm:$0xff] %v5530_v25  ;;  %v5538_v15 = vmul.f32 %v8071_v58, %v8118_v43  ;;  %8120 = vst [vmem:[#allocation50_spill] sm:$0xff] %v5546_v56  ;;  %v1386_v5 = vmul.f32 %v5546_v56, %v8071_v58  ;;  %v8122_v25 = vld [vmem:[#allocation116_spill] sm:$0xff]  ;;  %v8123_v43 = vld [vmem:[#allocation22_spill] sm:$0xff]  ;;  %v5567_v21 = vsel %vm850_vm3, %v8124_v3, %v1440_v50  ;;  %v1485_v56 = vrot.slane %v5465_v23, 2 }
 0x118   : > { %v5554_v42 = vmul.f32 %v8071_v58, %v8122_v25  ;;  %v1389_v27 = vmul.f32 %v8071_v58, %v8123_v43  ;;  %8125 = vst [vmem:[#allocation54_spill] sm:$0xff] %v5567_v21  ;;  %v5570_v25 = vsel %vm850_vm3, %v1440_v50, %v1442_v19  ;;  %v1489_v3 = vrot.slane %v5475_v54, 2 }
 0x119   : > { %8126 = vst [vmem:[#allocation55_spill] sm:$0xff] %v5570_v25  ;;  %v1490_v21 = vrot.slane %v5481_v39, 2  ;;  %v1492_v19 = vrot.slane %v5485_v26, 2  ;;  %v1494_v50 = vrot.slane %v5491_v22, 2  ;;  %v1495_v58 = vrot.slane %v5497_v17, 2 }
 0x11a   : > { %v1497_v43 = vrot.slane %v5503_v16, 2  ;;  %v1499_v55 = vrot.slane %v5509_v29, 2  ;;  %v1500_v30 = vrot.slane %v5515_v6, 2  ;;  %v1502_v23 = vrot.slane %v5519_v2, 2 }
 0x11b   : > { %v1504_v38 = vrot.slane %v5525_v8, 2  ;;  %v1505_v54 = vrot.slane %v5534_v32, 2  ;;  %v1507_v39 = vrot.slane %v5538_v15, 2  ;;  %v1509_v26 = vrot.slane %v5544_v44, 2 }
 0x11c   : > { %v1510_v34 = vrot.slane %v1386_v5, 2  ;;  %v1512_v22 = vrot.slane %v1387_v52, 2  ;;  %v1514_v17 = vrot.slane %v5554_v42, 2  ;;  %v1515_v25 = vrot.slane %v1389_v27, 2 }
 0x11d   : > { %v1470_v16 = vrot.slane %v5417_v33, 2  ;;  %v8127_v29 = vrot.slane %v5449_v48, 2  ;;  %v1486_v2 = vsel %vm850_vm3, %v1484_v36, %v1485_v56  ;;  %v1517_v8 = vrot.slane %v1390_v53, 2 }
 0x11e   : > { %v1488_v32 = vsel %vm850_vm3, %v1485_v56, %v1487_v57  ;;  %v1491_v15 = vsel %vm850_vm3, %v1489_v3, %v1490_v21  ;;  %v1493_v44 = vsel %vm850_vm3, %v1490_v21, %v1492_v19  ;;  %v1496_v52 = vsel %vm850_vm3, %v1494_v50, %v1495_v58 }
 0x11f   : > { %v1483_v6 = vsel %vm850_vm3, %v8127_v29, %v1482_v14  ;;  %v1498_v42 = vsel %vm850_vm3, %v1495_v58, %v1497_v43  ;;  %v1501_v27 = vsel %vm850_vm3, %v1499_v55, %v1500_v30  ;;  %v1503_v33 = vsel %vm850_vm3, %v1500_v30, %v1502_v23  ;;  %v8135_v29 = vld [vmem:[#allocation47_spill] sm:$0xff] }
 0x120   : > { %v1506_v5 = vsel %vm850_vm3, %v1504_v38, %v1505_v54  ;;  %v1508_v14 = vsel %vm850_vm3, %v1505_v54, %v1507_v39  ;;  %v1511_v53 = vsel %vm850_vm3, %v1509_v26, %v1510_v34  ;;  %v1513_v57 = vsel %vm850_vm3, %v1510_v34, %v1512_v22 }
 0x121   : > { %v1516_v56 = vsel %vm850_vm3, %v1514_v17, %v1515_v25  ;;  %v1518_v21 = vsel %vm850_vm3, %v1515_v25, %v1517_v8  ;;  %v5622_v19 = vadd.f32 %v1483_v6, %v5314_v63  ;;  %v5625_v43 = vadd.f32 %v1484_v36, %v5102_v13 }
 0x122   : > { %v5628_v58 = vadd.f32 %v1486_v2, %v5105_v35  ;;  %v5631_v30 = vadd.f32 %v1488_v32, %v5108_v61  ;;  %v5634_v23 = vadd.f32 %v1489_v3, %v5111_v11  ;;  %v5637_v34 = vadd.f32 %v1491_v15, %v5114_v20  ;;  %v8128_v11 = vld [vmem:[#allocation30_spill] sm:$0xff]  ;;  %v8129_v20 = vld [vmem:[#allocation31_spill] sm:$0xff]  ;;  %v8136_v2 = vld [vmem:[#allocation84_spill] sm:$0xff] }
 0x123   : > { %v5640_v25 = vadd.f32 %v1493_v44, %v5117_v10  ;;  %v5643_v63 = vadd.f32 %v1494_v50, %v5120_v47  ;;  %v5646_v13 = vadd.f32 %v1496_v52, %v5123_v1  ;;  %v5649_v35 = vadd.f32 %v1498_v42, %v5126_v0  ;;  %v8130_v10 = vld [vmem:[#allocation36_spill] sm:$0xff]  ;;  %v8131_v47 = vld [vmem:[#allocation42_spill] sm:$0xff]  ;;  %v8132_v1 = vld [vmem:[#allocation37_spill] sm:$0xff] }
 0x124   : > { %v5652_v61 = vadd.f32 %v1499_v55, %v5129_v24  ;;  %v5655_v36 = vadd.f32 %v1501_v27, %v8128_v11  ;;  %v5658_v3 = vadd.f32 %v1503_v33, %v8129_v20  ;;  %v5661_v54 = vadd.f32 %v1504_v38, %v8130_v10  ;;  %v8133_v0 = vld [vmem:[#allocation43_spill] sm:$0xff]  ;;  %v8134_v24 = vld [vmem:[#allocation46_spill] sm:$0xff]  ;;  %v8137_v32 = vld [vmem:[#allocation48_spill] sm:$0xff] }
 0x125   : > { %v5664_v50 = vadd.f32 %v1506_v5, %v8131_v47  ;;  %v5667_v39 = vadd.f32 %v1508_v14, %v8132_v1  ;;  %v5670_v22 = vadd.f32 %v1509_v26, %v8133_v0  ;;  %v5673_v55 = vadd.f32 %v1511_v53, %v8134_v24  ;;  %v8138_v15 = vld [vmem:[#allocation51_spill] sm:$0xff]  ;;  %v8139_v52 = vld [vmem:[#allocation89_spill] sm:$0xff]  ;;  %v8141_v33 = vld [vmem:[#allocation28_spill] sm:$0xff] }
 0x126   : > { %v5676_v6 = vadd.f32 %v1513_v57, %v8135_v29  ;;  %v1472_v8 = vrot.slane %v8136_v2, 2  ;;  %v5680_v38 = vadd.f32 %v1514_v17, %v8137_v32  ;;  %v5683_v44 = vadd.f32 %v1516_v56, %v8138_v15  ;;  %v8140_v27 = vld [vmem:[#allocation71_spill] sm:$0xff]  ;;  %v8142_v14 = vld [vmem:[#allocation26_spill] sm:$0xff] }
 0x127   : > { %v5686_v42 = vadd.f32 %v1518_v21, %v8139_v52  ;;  %v1474_v26 = vrot.slane %v8140_v27, 2  ;;  %v1475_v5 = vrot.slane %v8141_v33, 2  ;;  %v1477_v53 = vrot.slane %v8142_v14, 2  ;;  %v8143_v11 = vld [vmem:[#allocation27_spill] sm:$0xff] }
 0x128   : > { %v1479_v57 = vrot.slane %v8143_v11, 2  ;;  %v8144_v20 = vrot.slane %v5337_v59, 2  ;;  %v8145_v10 = vrot.slane %v5331_v60, 2  ;;  %v8146_v56 = vrot.slane %v5341_v62, 2 }
 0x129   : > { %v8148_v1 = vrot.slane %v5353_v49, 2  ;;  %v8149_v0 = vrot.slane %v5347_v46, 2  ;;  %v8150_v29 = vrot.slane %v5357_v41, 2  ;;  %v8152_v15 = vrot.slane %v5369_v9, 2 }
 0x12a   : > { %v1446_v17 = vsel %vm850_vm3, %v8145_v10, %v8144_v20  ;;  %v8147_v47 = vmov %v8144_v20  ;;  %v8153_v62 = vrot.slane %v5363_v12, 2  ;;  %v8154_v52 = vrot.slane %v5373_v28, 2 }
 0x12b   : > { %v1448_v21 = vsel %vm850_vm3, %v8147_v47, %v8146_v56  ;;  %v1451_v24 = vsel %vm850_vm3, %v8149_v0, %v8148_v1  ;;  %v8151_v2 = vmov %v8148_v1  ;;  %v8155_v27 = vmov %v8152_v15 }
 0x12c   : > { %v1453_v32 = vsel %vm850_vm3, %v8151_v2, %v8150_v29  ;;  %v1456_v59 = vsel %vm850_vm3, %v8153_v62, %v8152_v15  ;;  %v1458_v33 = vsel %vm850_vm3, %v8155_v27, %v8154_v52  ;;  %v8156_v14 = vrot.slane %v5385_v37, 2  ;;  %v8166_v27 = vld [vmem:[#allocation52_spill] sm:$0xff] }
 0x12d   : > { %v8157_v41 = vrot.slane %v5379_v40, 2  ;;  %v8158_v11 = vrot.slane %v5389_v45, 2  ;;  %v8160_v56 = vrot.slane %v5401_v31, 2  ;;  %v8161_v28 = vrot.slane %v5395_v7, 2 }
 0x12e   : > { %v8159_v20 = vmov %v8156_v14  ;;  %v8162_v47 = vrot.slane %v5405_v51, 2  ;;  %v8164_v29 = vrot.slane %v5411_v18, 2  ;;  %v1473_v37 = vsel %vm850_vm3, %v1470_v16, %v1472_v8  ;;  %v8170_v8 = vld [vmem:[#allocation90_spill] sm:$0xff] }
 0x12f   : > { %v1461_v49 = vsel %vm850_vm3, %v8157_v41, %v8156_v14  ;;  %v1463_v10 = vsel %vm850_vm3, %v8159_v20, %v8158_v11  ;;  %v1466_v9 = vsel %vm850_vm3, %v8161_v28, %v8160_v56  ;;  %v8163_v1 = vmov %v8160_v56  ;;  %v436_v14 = vld [vmem:[%s7305_s1 + $0x8] sm:$0x7]  ;;  %v8168_v41 = vld [vmem:[#allocation53_spill] sm:$0xff]  ;;  %v8169_v11 = vld [vmem:[#allocation54_spill] sm:$0xff] }
 0x130   : > { %v1468_v0 = vsel %vm850_vm3, %v8163_v1, %v8162_v47  ;;  %v1471_v45 = vsel %vm850_vm3, %v8164_v29, %v1470_v16  ;;  %v1476_v2 = vsel %vm850_vm3, %v1474_v26, %v1475_v5  ;;  %v1478_v15 = vsel %vm850_vm3, %v1475_v5, %v1477_v53  ;;  %v8171_v20 = vld [vmem:[#allocation55_spill] sm:$0xff]  ;;  %v8175_v47 = vld [vmem:[#allocation58_spill] sm:$0xff]  ;;  %v8176_v29 = vld [vmem:[#allocation61_spill] sm:$0xff] }
 0x131   : > { %v8165_v62 = vrot.slane %v5449_v48, 2  ;;  %v8167_v51 = vrot.slane %v5318_v4, 2  ;;  %v5761_v16 = vadd.f32 %v8169_v11, %v8168_v41  ;;  %v5765_v5 = vadd.f32 %v8171_v20, %v8170_v8  ;;  %v8172_v48 = vld [vmem:[#allocation56_spill] sm:$0xff]  ;;  %v8174_v4 = vld [vmem:[#allocation57_spill] sm:$0xff]  ;;  %v8181_v11 = vld [vmem:[#allocation86_spill] sm:$0xff] }
 0x132   : > { %v8173_v53 = vrot.slane %v5331_v60, 2  ;;  %v5773_v28 = vadd.f32 %v1446_v17, %v8174_v4  ;;  %v5776_v1 = vadd.f32 %v1448_v21, %v8175_v47  ;;  %v5787_v8 = vadd.f32 %v1453_v32, %v8181_v11  ;;  %v8183_v60 = vld [vmem:[#allocation87_spill] sm:$0xff]  ;;  %v8186_v17 = vld [vmem:[#allocation88_spill] sm:$0xff]  ;;  %v8195_v32 = vld [vmem:[#allocation94_spill] sm:$0xff] }
 0x133   : > { %v1481_v52 = vsel %vm850_vm3, %v1479_v57, %v8165_v62  ;;  %v5754_v31 = vadd.f32 %v8167_v51, %v8166_v27  ;;  %v8177_v62 = vrot.slane %v5347_v46, 2  ;;  %v8179_v51 = vld [vmem:[#allocation85_spill] sm:$0xff]  ;;  %v8184_v20 = vrot.slane %v5363_v12, 2  ;;  %v8188_v21 = vld [vmem:[#allocation91_spill] sm:$0xff]  ;;  %v8190_v46 = vld [vmem:[#allocation92_spill] sm:$0xff] }
 0x134   : > { %v5770_v56 = vadd.f32 %v8173_v53, %v8172_v48  ;;  %v5784_v41 = vadd.f32 %v1451_v24, %v8179_v51  ;;  %8182 = vst [vmem:[#allocation64_spill] sm:$0xff] %v5787_v8  ;;  %v5795_v53 = vadd.f32 %v1456_v59, %v8186_v17  ;;  %v5798_v4 = vadd.f32 %v1458_v33, %v8188_v21  ;;  %v8193_v24 = vld [vmem:[#allocation93_spill] sm:$0xff]  ;;  %v8200_v59 = vld [vmem:[#allocation6_spill] sm:$0xff]  ;;  %v8201_v33 = vld [vmem:[#allocation95_spill] sm:$0xff] }
 0x135   : > { %v5781_v27 = vadd.f32 %v8177_v62, %v8176_v29  ;;  %v5792_v48 = vadd.f32 %v8184_v20, %v8183_v60  ;;  %v8191_v47 = vrot.slane %v5379_v40, 2  ;;  %v5806_v62 = vadd.f32 %v1461_v49, %v8193_v24  ;;  %v8197_v12 = vld [vmem:[#allocation105_spill] sm:$0xff]  ;;  %v8203_v40 = vld [vmem:[#allocation96_spill] sm:$0xff] }
 0x136   : > { %8180 = vst [vmem:[#allocation63_spill] sm:$0xff] %v5784_v41  ;;  %8187 = vst [vmem:[#allocation98_spill] sm:$0xff] %v5795_v53  ;;  %v5809_v51 = vadd.f32 %v1463_v10, %v8195_v32  ;;  %v8198_v11 = vrot.slane %v5395_v7, 2  ;;  %v5817_v20 = vrot.slane %v436_v14, %v8200_v59  ;;  %v5820_v17 = vadd.f32 %v1466_v9, %v8201_v33  ;;  %v8208_v10 = vld [vmem:[#allocation106_spill] sm:$0xff]  ;;  %v8210_v7 = vld [vmem:[#allocation107_spill] sm:$0xff] }
 0x137   : > { %8178 = vst [vmem:[#allocation59_spill] sm:$0xff] %v5781_v27  ;;  %8185 = vst [vmem:[#allocation65_spill] sm:$0xff] %v5792_v48  ;;  %v5803_v29 = vadd.f32 %v8191_v47, %v8190_v46  ;;  %v5823_v21 = vadd.f32 %v1468_v0, %v8203_v40  ;;  %v8205_v46 = vld [vmem:[#allocation97_spill] sm:$0xff]  ;;  %v8206_v49 = vrot.slane %v5411_v18, 2  ;;  %v5831_v24 = vadd.f32 %v1471_v45, %v8208_v10  ;;  %v8214_v59 = vld [vmem:[#allocation16_spill] sm:$0xff] }
 0x138   : > { %8189 = vst [vmem:[#allocation11_spill] sm:$0xff] %v5798_v4  ;;  %8194 = vst [vmem:[#allocation12_spill] sm:$0xff] %v5806_v62  ;;  %v5814_v60 = vadd.f32 %v8198_v11, %v8197_v12  ;;  %v5834_v32 = vadd.f32 %v1473_v37, %v8210_v7  ;;  %v8212_v12 = vld [vmem:[#allocation110_spill] sm:$0xff]  ;;  %v5840_v9 = vadd.f32 %v1476_v2, %v8214_v59  ;;  %v8216_v33 = vld [vmem:[#allocation17_spill] sm:$0xff] }
 0x139   : > { %8192 = vst [vmem:[#allocation15_spill] sm:$0xff] %v5803_v29  ;;  %8196 = vst [vmem:[#allocation13_spill] sm:$0xff] %v5809_v51  ;;  %v5828_v47 = vadd.f32 %v8206_v49, %v8205_v46  ;;  %v5837_v11 = vadd.f32 %v1474_v26, %v8212_v12  ;;  %v5843_v0 = vadd.f32 %v1478_v15, %v8216_v33  ;;  %v8218_v40 = vld [vmem:[#allocation18_spill] sm:$0xff]  ;;  %v8220_v18 = vld [vmem:[#allocation24_spill] sm:$0xff] }
 0x13a   : > { %8199 = vst [vmem:[#allocation66_spill] sm:$0xff] %v5814_v60  ;;  %8202 = vst [vmem:[#allocation69_spill] sm:$0xff] %v5820_v17  ;;  %v5849_v46 = vadd.f32 %v1481_v52, %v8220_v18  ;;  %v8222_v45 = vld [vmem:[#allocation7_spill] sm:$0xff]  ;;  %v8224_v37 = vld [vmem:[#allocation8_spill] sm:$0xff] }
 0x13b   : > { %8204 = vst [vmem:[#allocation73_spill] sm:$0xff] %v5823_v21  ;;  %8207 = vst [vmem:[#allocation76_spill] sm:$0xff] %v5828_v47  ;;  %v5846_v21 = vadd.f32 %v1479_v57, %v8218_v40  ;;  %v5852_v49 = vrot.slane %v436_v14, %v8222_v45  ;;  %v5855_v10 = vrot.slane %v436_v14, %v8224_v37  ;;  %v3219_v26 = vld [vmem:[#allocation2 + $0x40] sm:$0xff]  ;;  %v8227_v57 = vld [vmem:[#allocation67_spill] sm:$0xff] }
 0x13c   : > { %8209 = vst [vmem:[#allocation79_spill] sm:$0xff] %v5831_v24  ;;  %8211 = vst [vmem:[#allocation41_spill] sm:$0xff] %v5834_v32  ;;  %v5858_v7 = vmul.f32 %v3219_v26, %v5817_v20  ;;  %v8226_v2 = vld [vmem:[#allocation62_spill] sm:$0xff]  ;;  %v5866_v59 = vmul.f32 %v8227_v57, %v5817_v20  ;;  %v8228_v33 = vld [vmem:[#allocation68_spill] sm:$0xff] }
 0x13d   : > { %8213 = vst [vmem:[#allocation23_spill] sm:$0xff] %v5837_v11  ;;  %8215 = vst [vmem:[#allocation82_spill] sm:$0xff] %v5840_v9  ;;  %v5862_v15 = vmul.f32 %v8226_v2, %v5817_v20  ;;  %v3220_v52 = vld [vmem:[#allocation2 + $0x60] sm:$0xff]  ;;  %v5873_v14 = vmul.f32 %v8228_v33, %v5817_v20  ;;  %v8232_v26 = vld [vmem:[#allocation72_spill] sm:$0xff] }
 0x13e   : > { %8217 = vst [vmem:[#allocation49_spill] sm:$0xff] %v5843_v0  ;;  %8219 = vst [vmem:[#allocation60_spill] sm:$0xff] %v5846_v21  ;;  %v5869_v12 = vmul.f32 %v3220_v52, %v5817_v20  ;;  %v8229_v40 = vld [vmem:[#allocation70_spill] sm:$0xff]  ;;  %v8235_v9 = vld [vmem:[#allocation29_spill] sm:$0xff] }
 0x13f   : > { %8221 = vst [vmem:[#allocation99_spill] sm:$0xff] %v5849_v46  ;;  %8223 = vst [vmem:[#allocation100_spill] sm:$0xff] %v5852_v49  ;;  %v5877_v18 = vmul.f32 %v8229_v40, %v5817_v20  ;;  %v3221_v45 = vld [vmem:[#allocation2 + $0x80] sm:$0xff]  ;;  %v8234_v46 = vld [vmem:[#allocation9_spill] sm:$0xff]  ;;  %v1647_v11 = vmul.f32 %v8235_v9, %v5817_v20 }
 0x140   : > { %8225 = vst [vmem:[#allocation14_spill] sm:$0xff] %v5855_v10  ;;  %v5880_v37 = vmul.f32 %v3221_v45, %v5817_v20  ;;  %v5884_v10 = vmul.f32 %v8232_v26, %v5817_v20  ;;  %v1645_v52 = vmul.f32 %v8234_v46, %v5817_v20  ;;  %v3222_v21 = vld [vmem:[#allocation2 + $0x160] sm:$0xff]  ;;  %v8236_v32 = vld [vmem:[#allocation19_spill] sm:$0xff]  ;;  %v8238_v49 = vld [vmem:[#allocation33_spill] sm:$0xff] }
 0x141   : > { %8230 = vst [vmem:[#allocation10_spill] sm:$0xff] %v5877_v18  ;;  %v1646_v0 = vmul.f32 %v3222_v21, %v5817_v20  ;;  %v1648_v40 = vmul.f32 %v8236_v32, %v5817_v20  ;;  %v430_v33 = vld [vmem:[#allocation2 + $0x220] sm:$0xff]  ;;  %v8237_v2 = vld [vmem:[#allocation35_spill] sm:$0xff]  ;;  %v1651_v24 = vmul.f32 %v8238_v49, %v5817_v20  ;;  %v8243_v29 = vld [vmem:[#allocation44_spill] sm:$0xff] }
 0x142   : > { %8231 = vst [vmem:[#allocation101_spill] sm:$0xff] %v5880_v37  ;;  %8233 = vst [vmem:[#allocation102_spill] sm:$0xff] %v5884_v10  ;;  %v3223_v57 = vld [vmem:[#allocation2 + $0x180] sm:$0xff]  ;;  %v1650_v26 = vmul.f32 %v8237_v2, %v5817_v20  ;;  %v5899_v21 = vld [vmem:[#allocation2 + $0x228] sm:$0xff]  ;;  %v1657_v49 = vmul.f32 %v8243_v29, %v5817_v20  ;;  %v1664_v27 = vmul.f32 %v5817_v20, %v430_v33 }
 0x143   : > { %v1649_v45 = vmul.f32 %v3223_v57, %v5817_v20  ;;  %v3224_v46 = vld [vmem:[#allocation2 + $0x1a0] sm:$0xff]  ;;  %8239 = vst [vmem:[#allocation103_spill] sm:$0xff] %v5899_v21  ;;  %v8242_v62 = vld [vmem:[#allocation39_spill] sm:$0xff]  ;;  %v8244_v53 = vld [vmem:[#allocation45_spill] sm:$0xff]  ;;  %v5932_v18 = vadd.f32 %v1646_v0, %v5625_v43 }
 0x144   : > { %v1652_v47 = vmul.f32 %v3224_v46, %v5817_v20  ;;  %v8240_v9 = vld [vmem:[#allocation34_spill] sm:$0xff]  ;;  %v1656_v2 = vmul.f32 %v8242_v62, %v5817_v20  ;;  %v1659_v48 = vmul.f32 %v8244_v53, %v5817_v20  ;;  %v5915_v10 = vld [vmem:[#allocation2 + $0x230] sm:$0xff]  ;;  %v8259_v0 = vld [vmem:[#allocation83_spill] sm:$0xff] }
 0x145   : > { %v1653_v17 = vmul.f32 %v8240_v9, %v5817_v20  ;;  %v8241_v32 = vld [vmem:[#allocation38_spill] sm:$0xff]  ;;  %8246 = vst [vmem:[#allocation104_spill] sm:$0xff] %v5915_v10  ;;  %v8248_v41 = vld [vmem:[#allocation116_spill] sm:$0xff]  ;;  %v1666_v53 = vmul.f32 %v5817_v20, %v5915_v10  ;;  %v5941_v33 = vadd.f32 %v1649_v45, %v5634_v23  ;;  %v5947_v10 = vadd.f32 %v1651_v24, %v5640_v25  ;;  %v8258_v24 = vld [vmem:[#allocation81_spill] sm:$0xff] }
 0x146   : > { %v1654_v60 = vmul.f32 %v8241_v32, %v5817_v20  ;;  %v3225_v51 = vld [vmem:[#allocation2 + $0x1c0] sm:$0xff]  ;;  %v8247_v32 = vld [vmem:[#allocation20_spill] sm:$0xff]  ;;  %v1662_v62 = vmul.f32 %v5817_v20, %v8248_v41  ;;  %v5938_v41 = vadd.f32 %v1648_v40, %v5631_v30  ;;  %v5962_v23 = vadd.f32 %v1656_v2, %v5655_v36  ;;  %v8261_v45 = vld [vmem:[#allocation25_spill] sm:$0xff] }
 0x147   : > { %v1655_v57 = vmul.f32 %v3225_v51, %v5817_v20  ;;  %v3226_v4 = vld [vmem:[#allocation2 + $0x1e0] sm:$0xff]  ;;  %v1661_v51 = vmul.f32 %v5817_v20, %v8247_v32  ;;  %v5935_v32 = vadd.f32 %v1647_v11, %v5628_v58  ;;  %v5953_v43 = vadd.f32 %v1653_v17, %v5646_v13 }
 0x148   : > { %v1658_v46 = vmul.f32 %v3226_v4, %v5817_v20  ;;  %v8245_v9 = vld [vmem:[#allocation50_spill] sm:$0xff]  ;;  %v1665_v4 = vmul.f32 %v5817_v20, %v5899_v21  ;;  %v5944_v21 = vadd.f32 %v1650_v26, %v5637_v34  ;;  %v5956_v58 = vadd.f32 %v1654_v60, %v5649_v35  ;;  %v8260_v26 = vld [vmem:[#allocation21_spill] sm:$0xff] }
 0x149   : > { %v1660_v8 = vmul.f32 %v8245_v9, %v5817_v20  ;;  %v8249_v37 = vld [vmem:[#allocation22_spill] sm:$0xff]  ;;  %v5929_v9 = vadd.f32 %v1645_v52, %v5622_v19  ;;  %v5950_v19 = vadd.f32 %v1652_v47, %v5643_v63  ;;  %v5959_v30 = vadd.f32 %v1655_v57, %v5652_v61 }
 0x14a   : > { %v1663_v29 = vmul.f32 %v5817_v20, %v8249_v37  ;;  %v5965_v34 = vadd.f32 %v1657_v49, %v5658_v3  ;;  %v5968_v25 = vadd.f32 %v1658_v46, %v5661_v54  ;;  %v5971_v63 = vadd.f32 %v1659_v48, %v5664_v50  ;;  %v3229_v17 = vld [vmem:[#allocation2 + $0xe0] sm:$0xff] }
 0x14b   : > { %8250 = vst [vmem:[#allocation108_spill] sm:$0xff] %v5929_v9  ;;  %v5974_v13 = vadd.f32 %v1660_v8, %v5667_v39  ;;  %v5977_v35 = vadd.f32 %v1661_v51, %v5670_v22  ;;  %v5980_v61 = vadd.f32 %v1662_v62, %v5673_v55  ;;  %v5986_v3 = vadd.f32 %v1664_v27, %v5680_v38  ;;  %v8253_v39 = vld [vmem:[#allocation74_spill] sm:$0xff]  ;;  %v8254_v55 = vld [vmem:[#allocation75_spill] sm:$0xff] }
 0x14c   : > { %v5983_v36 = vadd.f32 %v1663_v29, %v5676_v6  ;;  %v5989_v54 = vadd.f32 %v1665_v4, %v5683_v44  ;;  %v5992_v50 = vadd.f32 %v1666_v53, %v5686_v42  ;;  %v1627_v8 = vmul.f32 %v8253_v39, %v5817_v20  ;;  %v3227_v22 = vld [vmem:[#allocation2 + $0xa0] sm:$0xff]  ;;  %v8255_v6 = vld [vmem:[#allocation77_spill] sm:$0xff]  ;;  %v8257_v42 = vld [vmem:[#allocation80_spill] sm:$0xff] }
 0x14d   : > { %v1628_v48 = vmul.f32 %v3227_v22, %v5817_v20  ;;  %v1629_v62 = vmul.f32 %v8254_v55, %v5817_v20  ;;  %v1630_v29 = vmul.f32 %v8255_v6, %v5817_v20  ;;  %v3228_v38 = vld [vmem:[#allocation2 + $0xc0] sm:$0xff]  ;;  %v1633_v53 = vmul.f32 %v8257_v42, %v5817_v20  ;;  %v8263_v4 = vld [vmem:[#allocation111_spill] sm:$0xff] }
 0x14e   : > { %8251 = vst [vmem:[#allocation109_spill] sm:$0xff] %v5989_v54  ;;  %8252 = vst [vmem:[#allocation112_spill] sm:$0xff] %v5992_v50  ;;  %v1631_v27 = vmul.f32 %v3228_v38, %v5817_v20  ;;  %v8256_v44 = vld [vmem:[#allocation78_spill] sm:$0xff]  ;;  %v1634_v47 = vmul.f32 %v3229_v17, %v5817_v20  ;;  %v1635_v11 = vmul.f32 %v8258_v24, %v5817_v20  ;;  %v8265_v38 = vld [vmem:[#allocation40_spill] sm:$0xff] }
 0x14f   : > { %v1632_v60 = vmul.f32 %v8256_v44, %v5817_v20  ;;  %v1636_v49 = vmul.f32 %v8259_v0, %v5817_v20  ;;  %v3230_v2 = vld [vmem:[#allocation2 + $0x100] sm:$0xff]  ;;  %v1638_v52 = vmul.f32 %v8260_v26, %v5817_v20  ;;  %v6016_v57 = vmul.f32 %v8261_v45, %v5817_v20  ;;  %v8268_v50 = vld [vmem:[#allocation32_spill] sm:$0xff] }
 0x150   : > { %v1637_v40 = vmul.f32 %v3230_v2, %v5817_v20  ;;  %v3231_v46 = vld [vmem:[#allocation2 + $0x120] sm:$0xff]  ;;  %v6023_v22 = vmul.f32 %v8263_v4, %v5817_v20  ;;  %v6027_v17 = vmul.f32 %v8265_v38, %v5817_v20  ;;  %v6034_v54 = vmul.f32 %v8268_v50, %v5817_v20 }
 0x151   : > { %v6019_v51 = vmul.f32 %v3231_v46, %v5817_v20  ;;  %v3232_v2 = vld [vmem:[#allocation2 + $0x140] sm:$0xff]  ;;  %v6038_v46 = vadd.f32 %v5858_v7, %v5754_v31  ;;  %v8277_v7 = vld [vmem:[#allocation59_spill] sm:$0xff] }
 0x152   : > { %8264 = vst [vmem:[#allocation114_spill] sm:$0xff] %v6023_v22  ;;  %8266 = vst [vmem:[#allocation30_spill] sm:$0xff] %v6027_v17  ;;  %v6030_v9 = vmul.f32 %v3232_v2, %v5817_v20  ;;  %v6046_v22 = vadd.f32 %v5866_v59, %v5765_v5  ;;  %v6050_v2 = vadd.f32 %v5869_v12, %v5770_v56  ;;  %v8283_v59 = vld [vmem:[#allocation64_spill] sm:$0xff]  ;;  %v8285_v56 = vld [vmem:[#allocation65_spill] sm:$0xff] }
 0x153   : > { %8262 = vst [vmem:[#allocation113_spill] sm:$0xff] %v6019_v51  ;;  %8269 = vst [vmem:[#allocation36_spill] sm:$0xff] %v6034_v54  ;;  %v6042_v51 = vadd.f32 %v5862_v15, %v5761_v16  ;;  %v6054_v20 = vadd.f32 %v5873_v14, %v5773_v28  ;;  %v8275_v54 = vld [vmem:[#allocation10_spill] sm:$0xff]  ;;  %v8280_v15 = vld [vmem:[#allocation63_spill] sm:$0xff]  ;;  %v6072_v12 = vadd.f32 %v1628_v48, %v8285_v56 }
 0x154   : > { %8267 = vst [vmem:[#allocation31_spill] sm:$0xff] %v6030_v9  ;;  %8270 = vst [vmem:[#allocation42_spill] sm:$0xff] %v6038_v46  ;;  %v6058_v31 = vadd.f32 %v8275_v54, %v5776_v1  ;;  %v8278_v46 = vld [vmem:[#allocation101_spill] sm:$0xff]  ;;  %v8287_v28 = vld [vmem:[#allocation98_spill] sm:$0xff] }
 0x155   : > { %8271 = vst [vmem:[#allocation37_spill] sm:$0xff] %v6042_v51  ;;  %8272 = vst [vmem:[#allocation43_spill] sm:$0xff] %v6046_v22  ;;  %v6062_v16 = vadd.f32 %v8278_v46, %v8277_v7  ;;  %v8281_v51 = vld [vmem:[#allocation102_spill] sm:$0xff]  ;;  %v6069_v22 = vadd.f32 %v1627_v8, %v8283_v59  ;;  %v6075_v14 = vadd.f32 %v1629_v62, %v8287_v28  ;;  %v8291_v54 = vld [vmem:[#allocation15_spill] sm:$0xff] }
 0x156   : > { %8273 = vst [vmem:[#allocation46_spill] sm:$0xff] %v6050_v2  ;;  %8274 = vst [vmem:[#allocation47_spill] sm:$0xff] %v6054_v20  ;;  %v6066_v5 = vadd.f32 %v8281_v51, %v8280_v15  ;;  %v8289_v20 = vld [vmem:[#allocation11_spill] sm:$0xff]  ;;  %v8293_v46 = vld [vmem:[#allocation12_spill] sm:$0xff] }
 0x157   : > { %8276 = vst [vmem:[#allocation84_spill] sm:$0xff] %v6058_v31  ;;  %8279 = vst [vmem:[#allocation48_spill] sm:$0xff] %v6062_v16  ;;  %v6078_v1 = vadd.f32 %v1630_v29, %v8289_v20  ;;  %v6081_v31 = vadd.f32 %v1631_v27, %v8291_v54  ;;  %v6084_v7 = vadd.f32 %v1632_v60, %v8293_v46  ;;  %v8295_v51 = vld [vmem:[#allocation13_spill] sm:$0xff]  ;;  %v8297_v8 = vld [vmem:[#allocation66_spill] sm:$0xff] }
 0x158   : > { %8282 = vst [vmem:[#allocation51_spill] sm:$0xff] %v6066_v5  ;;  %8284 = vst [vmem:[#allocation89_spill] sm:$0xff] %v6069_v22  ;;  %v6087_v15 = vadd.f32 %v1633_v53, %v8295_v51  ;;  %v6090_v59 = vadd.f32 %v1634_v47, %v8297_v8  ;;  %v8299_v48 = vld [vmem:[#allocation69_spill] sm:$0xff]  ;;  %v8303_v29 = vld [vmem:[#allocation76_spill] sm:$0xff] }
 0x159   : > { %8286 = vst [vmem:[#allocation71_spill] sm:$0xff] %v6072_v12  ;;  %8288 = vst [vmem:[#allocation28_spill] sm:$0xff] %v6075_v14  ;;  %v6093_v56 = vadd.f32 %v1635_v11, %v8299_v48  ;;  %v8301_v62 = vld [vmem:[#allocation73_spill] sm:$0xff]  ;;  %v6099_v20 = vadd.f32 %v1637_v40, %v8303_v29  ;;  %v8305_v27 = vld [vmem:[#allocation79_spill] sm:$0xff] }
 0x15a   : > { %8290 = vst [vmem:[#allocation26_spill] sm:$0xff] %v6078_v1  ;;  %8292 = vst [vmem:[#allocation27_spill] sm:$0xff] %v6081_v31  ;;  %v6096_v28 = vadd.f32 %v1636_v49, %v8301_v62  ;;  %v6102_v54 = vadd.f32 %v1638_v52, %v8305_v27  ;;  %v8307_v60 = vld [vmem:[#allocation100_spill] sm:$0xff]  ;;  %v8308_v46 = vld [vmem:[#allocation62_spill] sm:$0xff] }
 0x15b   : > { %8294 = vst [vmem:[#allocation52_spill] sm:$0xff] %v6084_v7  ;;  %8296 = vst [vmem:[#allocation53_spill] sm:$0xff] %v6087_v15  ;;  %v6106_v7 = vmul.f32 %v8308_v46, %v8307_v60  ;;  %v8310_v53 = vld [vmem:[#allocation67_spill] sm:$0xff]  ;;  %v8312_v11 = vld [vmem:[#allocation68_spill] sm:$0xff]  ;;  %v6126_v48 = vmul.f32 %v8253_v39, %v8307_v60  ;;  %v6130_v62 = vmul.f32 %v8254_v55, %v8307_v60 }
 0x15c   : > { %8298 = vst [vmem:[#allocation54_spill] sm:$0xff] %v6090_v59  ;;  %8300 = vst [vmem:[#allocation90_spill] sm:$0xff] %v6093_v56  ;;  %v6110_v47 = vmul.f32 %v8310_v53, %v8307_v60  ;;  %v6114_v51 = vmul.f32 %v8312_v11, %v8307_v60  ;;  %v8314_v49 = vld [vmem:[#allocation70_spill] sm:$0xff]  ;;  %v8316_v40 = vld [vmem:[#allocation72_spill] sm:$0xff]  ;;  %v6134_v29 = vmul.f32 %v8255_v6, %v8307_v60 }
 0x15d   : > { %8302 = vst [vmem:[#allocation55_spill] sm:$0xff] %v6096_v28  ;;  %8304 = vst [vmem:[#allocation56_spill] sm:$0xff] %v6099_v20  ;;  %v6118_v8 = vmul.f32 %v8314_v49, %v8307_v60  ;;  %v6122_v52 = vmul.f32 %v8316_v40, %v8307_v60  ;;  %v6138_v27 = vmul.f32 %v8256_v44, %v8307_v60  ;;  %v8318_v49 = vld [vmem:[#allocation9_spill] sm:$0xff]  ;;  %v8321_v53 = vld [vmem:[#allocation19_spill] sm:$0xff] }
 0x15e   : > { %8306 = vst [vmem:[#allocation57_spill] sm:$0xff] %v6102_v54  ;;  %8309 = vst [vmem:[#allocation58_spill] sm:$0xff] %v6106_v7  ;;  %v6142_v40 = vmul.f32 %v8257_v42, %v8307_v60  ;;  %v6146_v39 = vmul.f32 %v8258_v24, %v8307_v60  ;;  %v6150_v55 = vmul.f32 %v8259_v0, %v8307_v60  ;;  %v8320_v11 = vld [vmem:[#allocation29_spill] sm:$0xff]  ;;  %v8324_v28 = vld [vmem:[#allocation34_spill] sm:$0xff] }
 0x15f   : > { %8311 = vst [vmem:[#allocation61_spill] sm:$0xff] %v6110_v47  ;;  %8313 = vst [vmem:[#allocation85_spill] sm:$0xff] %v6114_v51  ;;  %v6154_v6 = vmul.f32 %v8260_v26, %v8307_v60  ;;  %v6158_v44 = vmul.f32 %v8261_v45, %v8307_v60  ;;  %v6162_v42 = vmul.f32 %v8263_v4, %v8307_v60  ;;  %v8322_v4 = vld [vmem:[#allocation35_spill] sm:$0xff]  ;;  %v8325_v56 = vld [vmem:[#allocation38_spill] sm:$0xff] }
 0x160   : > { %8315 = vst [vmem:[#allocation86_spill] sm:$0xff] %v6118_v8  ;;  %v6166_v24 = vmul.f32 %v8265_v38, %v8307_v60  ;;  %v6170_v0 = vmul.f32 %v8268_v50, %v8307_v60  ;;  %v6174_v26 = vmul.f32 %v8318_v49, %v8307_v60  ;;  %v1737_v45 = vmul.f32 %v8320_v11, %v8307_v60  ;;  %v8323_v38 = vld [vmem:[#allocation33_spill] sm:$0xff]  ;;  %v8326_v49 = vld [vmem:[#allocation39_spill] sm:$0xff]  ;;  %v8327_v11 = vld [vmem:[#allocation44_spill] sm:$0xff] }
 0x161   : > { %v1738_v46 = vmul.f32 %v8321_v53, %v8307_v60  ;;  %v1739_v54 = vmul.f32 %v8322_v4, %v8307_v60  ;;  %v1740_v20 = vmul.f32 %v8323_v38, %v8307_v60  ;;  %v1741_v50 = vmul.f32 %v8324_v28, %v8307_v60  ;;  %v8328_v53 = vld [vmem:[#allocation45_spill] sm:$0xff]  ;;  %v8329_v4 = vld [vmem:[#allocation50_spill] sm:$0xff]  ;;  %v6196_v12 = vld [vmem:[#allocation2 + $0x208] sm:$0xff] }
 0x162   : > { %8317 = vst [vmem:[#allocation87_spill] sm:$0xff] %v6166_v24  ;;  %8319 = vst [vmem:[#allocation88_spill] sm:$0xff] %v6174_v26  ;;  %v1742_v59 = vmul.f32 %v8325_v56, %v8307_v60  ;;  %v1743_v15 = vmul.f32 %v8326_v49, %v8307_v60  ;;  %v1744_v31 = vmul.f32 %v8327_v11, %v8307_v60  ;;  %v8331_v38 = vld [vmem:[#allocation103_spill] sm:$0xff]  ;;  %v8332_v22 = vld [vmem:[#allocation104_spill] sm:$0xff] }
 0x163   : > { %v1745_v1 = vmul.f32 %v8328_v53, %v8307_v60  ;;  %v1746_v14 = vmul.f32 %v8329_v4, %v8307_v60  ;;  %8330 = vst [vmem:[#allocation91_spill] sm:$0xff] %v6196_v12  ;;  %v1747_v28 = vmul.f32 %v6196_v12, %v8307_v60  ;;  %v1748_v56 = vmul.f32 %v8307_v60, %v8249_v37 }
 0x164   : > { %v1749_v49 = vmul.f32 %v8307_v60, %v8331_v38  ;;  %v1750_v11 = vmul.f32 %v8307_v60, %v8332_v22  ;;  %v1810_v38 = vrot.slane %v1737_v45, 1  ;;  %v1811_v17 = vrot.slane %v1738_v46, 1 }
 0x165   : > { %v1813_v26 = vrot.slane %v1739_v54, 1  ;;  %v1814_v60 = vrot.slane %v1740_v20, 1  ;;  %v1816_v22 = vrot.slane %v1741_v50, 1  ;;  %v1817_v5 = vrot.slane %v1742_v59, 1 }
 0x166   : > { %v1819_v7 = vrot.slane %v1743_v15, 1  ;;  %v1820_v53 = vrot.slane %v1744_v31, 1  ;;  %v1822_v47 = vrot.slane %v1745_v1, 1  ;;  %v1823_v4 = vrot.slane %v1746_v14, 1 }
 0x167   : > { %v1825_v51 = vrot.slane %v1747_v28, 1  ;;  %v1826_v16 = vrot.slane %v1748_v56, 1  ;;  %v1828_v8 = vrot.slane %v1749_v49, 1  ;;  %v1829_v2 = vrot.slane %v1750_v11, 1 }
 0x168   : > { %v7521_v12 = vrot.slane %v6138_v27, 1  ;;  %v7519_v37 = vrot.slane %v6142_v40, 1  ;;  %v7520_v45 = vrot.slane %v6150_v55, 1  ;;  %v1812_v31 = vsel %vm605_vm2, %v1810_v38, %v1811_v17 }
 0x169   : > { %v1815_v14 = vsel %vm605_vm2, %v1813_v26, %v1814_v60  ;;  %v1818_v59 = vsel %vm605_vm2, %v1816_v22, %v1817_v5  ;;  %v1821_v56 = vsel %vm605_vm2, %v1819_v7, %v1820_v53  ;;  %v1824_v28 = vsel %vm605_vm2, %v1822_v47, %v1823_v4 }
 0x16a   : > { %v1827_v54 = vsel %vm605_vm2, %v1825_v51, %v1826_v16  ;;  %v1830_v46 = vsel %vm605_vm2, %v1828_v8, %v1829_v2  ;;  %v6230_v11 = vadd.f32 %v1810_v38, %v5932_v18  ;;  %v6233_v49 = vadd.f32 %v1812_v31, %v5935_v32  ;;  %v8347_v38 = vld [vmem:[#allocation113_spill] sm:$0xff] }
 0x16b   : > { %v6236_v1 = vadd.f32 %v1811_v17, %v5938_v41  ;;  %v6239_v15 = vadd.f32 %v1813_v26, %v5941_v33  ;;  %v6242_v20 = vadd.f32 %v1815_v14, %v5944_v21  ;;  %v6245_v50 = vadd.f32 %v1814_v60, %v5947_v10  ;;  %v8357_v31 = vld [vmem:[#allocation61_spill] sm:$0xff]  ;;  %v8359_v14 = vld [vmem:[#allocation58_spill] sm:$0xff] }
 0x16c   : > { %v6248_v9 = vadd.f32 %v1816_v22, %v5950_v19  ;;  %v6251_v18 = vadd.f32 %v1818_v59, %v5953_v43  ;;  %v6254_v32 = vadd.f32 %v1817_v5, %v5956_v58  ;;  %v6257_v41 = vadd.f32 %v1819_v7, %v5959_v30  ;;  %v8348_v5 = vld [vmem:[#allocation88_spill] sm:$0xff]  ;;  %v8350_v7 = vld [vmem:[#allocation114_spill] sm:$0xff] }
 0x16d   : > { %v6260_v33 = vadd.f32 %v1821_v56, %v5962_v23  ;;  %v6263_v21 = vadd.f32 %v1820_v53, %v5965_v34  ;;  %v6266_v10 = vadd.f32 %v1822_v47, %v5968_v25  ;;  %v6269_v19 = vadd.f32 %v1824_v28, %v5971_v63  ;;  %v8341_v25 = vld [vmem:[#allocation109_spill] sm:$0xff]  ;;  %v8343_v63 = vld [vmem:[#allocation112_spill] sm:$0xff]  ;;  %v8353_v47 = vld [vmem:[#allocation30_spill] sm:$0xff] }
 0x16e   : > { %v6272_v43 = vadd.f32 %v1823_v4, %v5974_v13  ;;  %v6275_v58 = vadd.f32 %v1825_v51, %v5977_v35  ;;  %v6278_v30 = vadd.f32 %v1827_v54, %v5980_v61  ;;  %v6281_v23 = vadd.f32 %v1826_v16, %v5983_v36  ;;  %v8345_v13 = vld [vmem:[#allocation41_spill] sm:$0xff]  ;;  %v8346_v35 = vld [vmem:[#allocation23_spill] sm:$0xff]  ;;  %v8349_v16 = vld [vmem:[#allocation82_spill] sm:$0xff] }
 0x16f   : > { %8333 = vst [vmem:[#allocation92_spill] sm:$0xff] %v6263_v21  ;;  %8334 = vst [vmem:[#allocation93_spill] sm:$0xff] %v6266_v10  ;;  %v6284_v34 = vadd.f32 %v1828_v8, %v5986_v3  ;;  %v6287_v26 = vadd.f32 %v1830_v46, %v8341_v25  ;;  %v6290_v22 = vadd.f32 %v1829_v2, %v8343_v63  ;;  %v1807_v61 = vrot.slane %v6170_v0, 1  ;;  %v8352_v53 = vld [vmem:[#allocation49_spill] sm:$0xff]  ;;  %v8355_v2 = vld [vmem:[#allocation60_spill] sm:$0xff] }
 0x170   : > { %8335 = vst [vmem:[#allocation94_spill] sm:$0xff] %v6269_v19  ;;  %8336 = vst [vmem:[#allocation105_spill] sm:$0xff] %v6272_v43  ;;  %v1687_v4 = vadd.f32 %v6016_v57, %v8345_v13  ;;  %v1688_v17 = vadd.f32 %v8347_v38, %v8346_v35  ;;  %v1808_v36 = vrot.slane %v8348_v5, 1  ;;  %v6300_v3 = vadd.f32 %v8350_v7, %v8349_v16  ;;  %v8356_v8 = vld [vmem:[#allocation31_spill] sm:$0xff]  ;;  %v8362_v28 = vld [vmem:[#allocation36_spill] sm:$0xff] }
 0x171   : > { %8337 = vst [vmem:[#allocation95_spill] sm:$0xff] %v6275_v58  ;;  %8338 = vst [vmem:[#allocation96_spill] sm:$0xff] %v6278_v30  ;;  %v6304_v51 = vadd.f32 %v8353_v47, %v8352_v53  ;;  %v1691_v60 = vadd.f32 %v8356_v8, %v8355_v2  ;;  %v8358_v57 = vrot.slane %v8357_v31, 1  ;;  %v8360_v59 = vrot.slane %v8359_v14, 1  ;;  %v8361_v0 = vld [vmem:[#allocation99_spill] sm:$0xff]  ;;  %v8363_v46 = vld [vmem:[#allocation86_spill] sm:$0xff] }
 0x172   : > { %8339 = vst [vmem:[#allocation97_spill] sm:$0xff] %v6281_v23  ;;  %8340 = vst [vmem:[#allocation106_spill] sm:$0xff] %v6284_v34  ;;  %v1692_v54 = vadd.f32 %v8362_v28, %v8361_v0  ;;  %v8364_v25 = vrot.slane %v8363_v46, 1  ;;  %v8365_v63 = vld [vmem:[#allocation85_spill] sm:$0xff]  ;;  %v8367_v38 = vrot.slane %v6126_v48, 1  ;;  %v8368_v5 = vrot.slane %v6122_v52, 1 }
 0x173   : > { %8342 = vst [vmem:[#allocation107_spill] sm:$0xff] %v6287_v26  ;;  %8344 = vst [vmem:[#allocation110_spill] sm:$0xff] %v6290_v22  ;;  %v1785_v56 = vsel %vm605_vm2, %v8360_v59, %v8358_v57  ;;  %v8366_v13 = vrot.slane %v8365_v63, 1  ;;  %v8369_v7 = vrot.slane %v6134_v29, 1  ;;  %v8370_v53 = vrot.slane %v6130_v62, 1  ;;  %v8475_v43 = vld [vmem:[#allocation115_spill] sm:$0xff] }
 0x174   : > { %8351 = vst [vmem:[#allocation16_spill] sm:$0xff] %v6300_v3  ;;  %8354 = vst [vmem:[#allocation17_spill] sm:$0xff] %v6304_v51  ;;  %v1791_v16 = vsel %vm605_vm2, %v8368_v5, %v8367_v38  ;;  %v1797_v2 = vsel %vm605_vm2, %v7521_v12, %v7519_v37  ;;  %v8371_v8 = vrot.slane %v6146_v39, 1  ;;  %v8372_v59 = vrot.slane %v6158_v44, 1  ;;  %v8380_v12 = vld [vmem:[#allocation43_spill] sm:$0xff]  ;;  %v8388_v3 = vld [vmem:[#allocation84_spill] sm:$0xff] }
 0x175   : > { %v1788_v35 = vsel %vm605_vm2, %v8366_v13, %v8364_v25  ;;  %v1794_v47 = vsel %vm605_vm2, %v8370_v53, %v8369_v7  ;;  %v8373_v0 = vrot.slane %v6154_v6, 1  ;;  %v8374_v25 = vrot.slane %v6166_v24, 1  ;;  %v8377_v7 = vld [vmem:[#allocation42_spill] sm:$0xff]  ;;  %v3247_v30 = vld [vmem:[#allocation2 + $0x1f8] sm:$0x1]  ;;  %v8477_v19 = vld [vmem:[#allocation104_spill] sm:$0xff] }
 0x176   : > { %v1800_v57 = vsel %vm605_vm2, %v8371_v8, %v7520_v45  ;;  %v8375_v13 = vrot.slane %v6162_v42, 1  ;;  %v1809_v5 = vsel %vm605_vm2, %v1807_v61, %v1808_v36  ;;  %v8378_v53 = vrot.slane %v8359_v14, 1  ;;  %v8379_v8 = vld [vmem:[#allocation37_spill] sm:$0xff]  ;;  %v8383_v24 = vld [vmem:[#allocation46_spill] sm:$0xff] }
 0x177   : > { %v1803_v28 = vsel %vm605_vm2, %v8373_v0, %v8372_v59  ;;  %v6359_v45 = vadd.f32 %v1785_v56, %v8379_v8  ;;  %v8381_v59 = vrot.slane %v8357_v31, 1  ;;  %v8384_v51 = vrot.slane %v8365_v63, 1  ;;  %v8391_v56 = vld [vmem:[#allocation48_spill] sm:$0xff]  ;;  %v8399_v63 = vld [vmem:[#allocation71_spill] sm:$0xff] }
 0x178   : > { %v6350_v38 = vsel %vm605_vm2, %v8375_v13, %v8374_v25  ;;  %v6356_v37 = vadd.f32 %v8378_v53, %v8377_v7  ;;  %v8386_v13 = vld [vmem:[#allocation47_spill] sm:$0xff]  ;;  %v8389_v14 = vrot.slane %v8363_v46, 1  ;;  %v8392_v53 = vrot.slane %v6122_v52, 1 }
 0x179   : > { %8376 = vst [vmem:[#allocation18_spill] sm:$0xff] %v6350_v38  ;;  %v6364_v0 = vadd.f32 %v8381_v59, %v8380_v12  ;;  %v6369_v25 = vadd.f32 %v8384_v51, %v8383_v24  ;;  %v6372_v38 = vadd.f32 %v1788_v35, %v8386_v13  ;;  %v8394_v12 = vld [vmem:[#allocation51_spill] sm:$0xff]  ;;  %v8396_v59 = vld [vmem:[#allocation89_spill] sm:$0xff]  ;;  %v8397_v24 = vrot.slane %v6126_v48, 1  ;;  %v8410_v48 = vld [vmem:[#allocation52_spill] sm:$0xff] }
 0x17a   : > { %v6377_v7 = vadd.f32 %v8389_v14, %v8388_v3  ;;  %v6382_v8 = vadd.f32 %v8392_v53, %v8391_v56  ;;  %v6385_v31 = vadd.f32 %v1791_v16, %v8394_v12  ;;  %v8400_v35 = vrot.slane %v6130_v62, 1  ;;  %v8402_v3 = vld [vmem:[#allocation28_spill] sm:$0xff]  ;;  %v8404_v14 = vld [vmem:[#allocation26_spill] sm:$0xff]  ;;  %v8407_v16 = vld [vmem:[#allocation27_spill] sm:$0xff] }
 0x17b   : > { %8382 = vst [vmem:[#allocation24_spill] sm:$0xff] %v6364_v0  ;;  %8385 = vst [vmem:[#allocation7_spill] sm:$0xff] %v6369_v25  ;;  %v6390_v51 = vadd.f32 %v8397_v24, %v8396_v59  ;;  %v6398_v46 = vadd.f32 %v1794_v47, %v8402_v3  ;;  %v8405_v52 = vrot.slane %v6134_v29, 1  ;;  %v8408_v53 = vrot.slane %v6138_v27, 1  ;;  %v8412_v24 = vld [vmem:[#allocation53_spill] sm:$0xff]  ;;  %v8415_v47 = vld [vmem:[#allocation54_spill] sm:$0xff] }
 0x17c   : > { %8387 = vst [vmem:[#allocation8_spill] sm:$0xff] %v6372_v38  ;;  %8390 = vst [vmem:[#allocation20_spill] sm:$0xff] %v6377_v7  ;;  %v6395_v13 = vadd.f32 %v8400_v35, %v8399_v63  ;;  %v6411_v59 = vadd.f32 %v1797_v2, %v8410_v48  ;;  %v8413_v62 = vrot.slane %v6142_v40, 1  ;;  %v8416_v35 = vrot.slane %v6146_v39, 1  ;;  %v8418_v29 = vld [vmem:[#allocation90_spill] sm:$0xff]  ;;  %v8423_v2 = vld [vmem:[#allocation56_spill] sm:$0xff] }
 0x17d   : > { %8393 = vst [vmem:[#allocation116_spill] sm:$0xff] %v6382_v8  ;;  %8395 = vst [vmem:[#allocation22_spill] sm:$0xff] %v6385_v31  ;;  %v6403_v56 = vadd.f32 %v8405_v52, %v8404_v14  ;;  %v6408_v12 = vadd.f32 %v8408_v53, %v8407_v16  ;;  %v6424_v14 = vadd.f32 %v1800_v57, %v8418_v29  ;;  %v8420_v52 = vld [vmem:[#allocation55_spill] sm:$0xff]  ;;  %v8421_v27 = vrot.slane %v6150_v55, 1  ;;  %v8426_v40 = vld [vmem:[#allocation57_spill] sm:$0xff] }
 0x17e   : > { %8398 = vst [vmem:[#allocation10_spill] sm:$0xff] %v6390_v51  ;;  %8401 = vst [vmem:[#allocation59_spill] sm:$0xff] %v6395_v13  ;;  %v6416_v63 = vadd.f32 %v8413_v62, %v8412_v24  ;;  %v6421_v3 = vadd.f32 %v8416_v35, %v8415_v47  ;;  %v8424_v53 = vrot.slane %v6154_v6, 1  ;;  %v6437_v24 = vadd.f32 %v1803_v28, %v8426_v40  ;;  %v8434_v29 = vld [vmem:[#allocation108_spill] sm:$0xff]  ;;  %v8435_v6 = vld [vmem:[#allocation14_spill] sm:$0xff] }
 0x17f   : > { %8403 = vst [vmem:[#allocation101_spill] sm:$0xff] %v6398_v46  ;;  %8406 = vst [vmem:[#allocation63_spill] sm:$0xff] %v6403_v56  ;;  %v6429_v16 = vadd.f32 %v8421_v27, %v8420_v52  ;;  %v8428_v39 = vrot.slane %v6158_v44, 1  ;;  %v8430_v57 = vrot.slane %v6162_v42, 1  ;;  %v6447_v35 = vadd.f32 %v1807_v61, %v1691_v60  ;;  %v8436_v27 = vld [vmem:[#allocation62_spill] sm:$0xff]  ;;  %v8437_v28 = vld [vmem:[#allocation67_spill] sm:$0xff] }
 0x180   : > { %8409 = vst [vmem:[#allocation102_spill] sm:$0xff] %v6408_v12  ;;  %8411 = vst [vmem:[#allocation64_spill] sm:$0xff] %v6411_v59  ;;  %v6434_v48 = vadd.f32 %v8424_v53, %v8423_v2  ;;  %v6449_v55 = vadd.f32 %v1809_v5, %v1692_v54  ;;  %v6452_v52 = vadd.f32 %v1808_v36, %v8434_v29  ;;  %v8439_v60 = vld [vmem:[#allocation70_spill] sm:$0xff]  ;;  %v3235_v54 = vld [vmem:[#allocation2 + $0x78] sm:$0x1] }
 0x181   : > { %8414 = vst [vmem:[#allocation65_spill] sm:$0xff] %v6416_v63  ;;  %8417 = vst [vmem:[#allocation98_spill] sm:$0xff] %v6421_v3  ;;  %v6441_v62 = vadd.f32 %v8428_v39, %v1687_v4  ;;  %v6445_v47 = vadd.f32 %v8430_v57, %v1688_v17  ;;  %v6456_v2 = vmul.f32 %v8436_v27, %v8435_v6  ;;  %v3234_v4 = vld [vmem:[#allocation2 + $0x58] sm:$0x1]  ;;  %v8438_v17 = vld [vmem:[#allocation68_spill] sm:$0xff] }
 0x182   : > { %8419 = vst [vmem:[#allocation11_spill] sm:$0xff] %v6424_v14  ;;  %8422 = vst [vmem:[#allocation15_spill] sm:$0xff] %v6429_v16  ;;  %v6460_v44 = vmul.f32 %v8437_v28, %v8435_v6  ;;  %v6463_v42 = vmul.f32 %v3234_v4, %v8435_v6  ;;  %v6467_v61 = vmul.f32 %v8438_v17, %v8435_v6  ;;  %v8440_v53 = vld [vmem:[#allocation72_spill] sm:$0xff]  ;;  %v8441_v39 = vld [vmem:[#allocation74_spill] sm:$0xff] }
 0x183   : > { %8425 = vst [vmem:[#allocation12_spill] sm:$0xff] %v6434_v48  ;;  %8427 = vst [vmem:[#allocation13_spill] sm:$0xff] %v6437_v24  ;;  %v6471_v36 = vmul.f32 %v8439_v60, %v8435_v6  ;;  %v6474_v5 = vmul.f32 %v3235_v54, %v8435_v6  ;;  %v6478_v40 = vmul.f32 %v8440_v53, %v8435_v6  ;;  %v3236_v29 = vld [vmem:[#allocation2 + $0x98] sm:$0x1]  ;;  %v8442_v28 = vld [vmem:[#allocation75_spill] sm:$0xff]  ;;  %v8478_v10 = vrot.slane %v6456_v2, 2 }
 0x184   : > { %8429 = vst [vmem:[#allocation66_spill] sm:$0xff] %v6441_v62  ;;  %8431 = vst [vmem:[#allocation69_spill] sm:$0xff] %v6445_v47  ;;  %v6482_v57 = vmul.f32 %v8441_v39, %v8435_v6  ;;  %v6485_v27 = vmul.f32 %v3236_v29, %v8435_v6  ;;  %v6489_v4 = vmul.f32 %v8442_v28, %v8435_v6  ;;  %v8444_v17 = vld [vmem:[#allocation77_spill] sm:$0xff]  ;;  %v8445_v47 = vld [vmem:[#allocation78_spill] sm:$0xff]  ;;  %v2030_v22 = vrot.slane %v6463_v42, 2 }
 0x185   : > { %8432 = vst [vmem:[#allocation73_spill] sm:$0xff] %v6447_v35  ;;  %8433 = vst [vmem:[#allocation76_spill] sm:$0xff] %v6449_v55  ;;  %v6493_v60 = vmul.f32 %v8444_v17, %v8435_v6  ;;  %v3237_v54 = vld [vmem:[#allocation2 + $0xb8] sm:$0x1]  ;;  %v6500_v39 = vmul.f32 %v8445_v47, %v8435_v6  ;;  %v8446_v62 = vld [vmem:[#allocation80_spill] sm:$0xff]  ;;  %v2033_v26 = vrot.slane %v6471_v36, 2 }
 0x186   : > { %8443 = vst [vmem:[#allocation79_spill] sm:$0xff] %v6489_v4  ;;  %v6496_v53 = vmul.f32 %v3237_v54, %v8435_v6  ;;  %v6504_v29 = vmul.f32 %v8446_v62, %v8435_v6  ;;  %v3238_v24 = vld [vmem:[#allocation2 + $0xd8] sm:$0x1]  ;;  %v8449_v16 = vld [vmem:[#allocation83_spill] sm:$0xff]  ;;  %v8459_v56 = vld [vmem:[#allocation40_spill] sm:$0xff]  ;;  %v2035_v34 = vrot.slane %v6474_v5, 2 }
 0x187   : > { %v6507_v28 = vmul.f32 %v3238_v24, %v8435_v6  ;;  %v8447_v48 = vld [vmem:[#allocation81_spill] sm:$0xff]  ;;  %v6515_v54 = vmul.f32 %v8449_v16, %v8435_v6  ;;  %v8457_v12 = vld [vmem:[#allocation111_spill] sm:$0xff]  ;;  %v8462_v55 = vld [vmem:[#allocation32_spill] sm:$0xff]  ;;  %v2038_v23 = vrot.slane %v6482_v57, 2  ;;  %v8480_v21 = vrot.slane %v6478_v40, 2 }
 0x188   : > { %v6511_v17 = vmul.f32 %v8447_v48, %v8435_v6  ;;  %v3239_v14 = vld [vmem:[#allocation2 + $0xf8] sm:$0x1]  ;;  %v6533_v16 = vmul.f32 %v8457_v12, %v8435_v6  ;;  %v8470_v8 = vld [vmem:[#allocation39_spill] sm:$0xff]  ;;  %v8471_v7 = vld [vmem:[#allocation44_spill] sm:$0xff] }
 0x189   : > { %8450 = vst [vmem:[#allocation109_spill] sm:$0xff] %v6515_v54  ;;  %v6518_v47 = vmul.f32 %v3239_v14, %v8435_v6  ;;  %v8452_v3 = vld [vmem:[#allocation21_spill] sm:$0xff]  ;;  %v6537_v14 = vmul.f32 %v8459_v56, %v8435_v6  ;;  %v8465_v56 = vld [vmem:[#allocation19_spill] sm:$0xff]  ;;  %v8473_v0 = vld [vmem:[#allocation50_spill] sm:$0xff]  ;;  %v1972_v54 = vmul.f32 %v3247_v30, %v8435_v6  ;;  %v1977_v30 = vmul.f32 %v8435_v6, %v8477_v19 }
 0x18a   : > { %8448 = vst [vmem:[#allocation100_spill] sm:$0xff] %v6511_v17  ;;  %v6522_v62 = vmul.f32 %v8452_v3, %v8435_v6  ;;  %v8454_v63 = vld [vmem:[#allocation25_spill] sm:$0xff]  ;;  %8458 = vst [vmem:[#allocation88_spill] sm:$0xff] %v6533_v16  ;;  %v8476_v57 = vld [vmem:[#allocation103_spill] sm:$0xff]  ;;  %v6646_v19 = vsel %vm850_vm3, %v8480_v21, %v2038_v23 }
 0x18b   : > { %8451 = vst [vmem:[#allocation112_spill] sm:$0xff] %v6518_v47  ;;  %v6526_v24 = vmul.f32 %v8454_v63, %v8435_v6  ;;  %v3240_v59 = vld [vmem:[#allocation2 + $0x118] sm:$0x1]  ;;  %8460 = vst [vmem:[#allocation82_spill] sm:$0xff] %v6537_v14  ;;  %v6544_v63 = vmul.f32 %v8462_v55, %v8435_v6  ;;  %v6557_v14 = vmul.f32 %v8465_v56, %v8435_v6  ;;  %v8466_v55 = vld [vmem:[#allocation35_spill] sm:$0xff] }
 0x18c   : > { %8453 = vst [vmem:[#allocation41_spill] sm:$0xff] %v6522_v62  ;;  %v6529_v48 = vmul.f32 %v3240_v59, %v8435_v6  ;;  %v3241_v46 = vld [vmem:[#allocation2 + $0x138] sm:$0x1]  ;;  %v6564_v13 = vmul.f32 %v8466_v55, %v8435_v6  ;;  %v8468_v62 = vld [vmem:[#allocation34_spill] sm:$0xff]  ;;  %8481 = vst [vmem:[#allocation49_spill] sm:$0xff] %v6646_v19 }
 0x18d   : > { %8455 = vst [vmem:[#allocation23_spill] sm:$0xff] %v6526_v24  ;;  %v6540_v3 = vmul.f32 %v3241_v46, %v8435_v6  ;;  %v8463_v24 = vld [vmem:[#allocation9_spill] sm:$0xff]  ;;  %v6575_v56 = vmul.f32 %v8468_v62, %v8435_v6  ;;  %v8469_v47 = vld [vmem:[#allocation38_spill] sm:$0xff] }
 0x18e   : > { %8456 = vst [vmem:[#allocation113_spill] sm:$0xff] %v6529_v48  ;;  %v6548_v59 = vmul.f32 %v8463_v24, %v8435_v6  ;;  %v3242_v48 = vld [vmem:[#allocation2 + $0x158] sm:$0x1] }
 0x18f   : > { %8461 = vst [vmem:[#allocation114_spill] sm:$0xff] %v6540_v3  ;;  %v1957_v12 = vmul.f32 %v3242_v48, %v8435_v6  ;;  %v8464_v16 = vld [vmem:[#allocation29_spill] sm:$0xff] }
 0x190   : > { %v6553_v35 = vmul.f32 %v8464_v16, %v8435_v6  ;;  %v3243_v46 = vld [vmem:[#allocation2 + $0x178] sm:$0x1] }
 0x191   : > { %v6560_v3 = vmul.f32 %v3243_v46, %v8435_v6  ;;  %v8467_v24 = vld [vmem:[#allocation33_spill] sm:$0xff]  ;;  %v6579_v46 = vmul.f32 %v8469_v47, %v8435_v6 }
 0x192   : > { %v6568_v51 = vmul.f32 %v8467_v24, %v8435_v6  ;;  %v3244_v48 = vld [vmem:[#allocation2 + $0x198] sm:$0x1]  ;;  %v6586_v24 = vmul.f32 %v8470_v8, %v8435_v6  ;;  %v2028_v8 = vrot.slane %v6460_v44, 2  ;;  %v8474_v44 = vld [vmem:[#allocation91_spill] sm:$0xff] }
 0x193   : > { %v6571_v16 = vmul.f32 %v3244_v48, %v8435_v6  ;;  %v3245_v31 = vld [vmem:[#allocation2 + $0x1b8] sm:$0x1]  ;;  %v6590_v48 = vmul.f32 %v8471_v7, %v8435_v6  ;;  %v6615_v58 = vmul.f32 %v8474_v44, %v8435_v6  ;;  %v3248_v7 = vld [vmem:[#allocation2 + $0x210] sm:$0xff] }
 0x194   : > { %v6582_v55 = vmul.f32 %v3245_v31, %v8435_v6  ;;  %v3246_v38 = vld [vmem:[#allocation2 + $0x1d8] sm:$0x1]  ;;  %v6601_v31 = vmul.f32 %v8473_v0, %v8435_v6  ;;  %v2040_v0 = vrot.slane %v6485_v27, 2  ;;  %v1974_v5 = vmul.f32 %v3248_v7, %v8435_v6 }
 0x195   : > { %v6593_v62 = vmul.f32 %v3246_v38, %v8435_v6  ;;  %v8472_v25 = vld [vmem:[#allocation45_spill] sm:$0xff]  ;;  %v6624_v27 = vmul.f32 %v8435_v6, %v8476_v57  ;;  %v2029_v42 = vsel %vm850_vm3, %v8478_v10, %v2028_v8  ;;  %v6633_v36 = vsel %vm850_vm3, %v2028_v8, %v2030_v22 }
 0x196   : > { %v6597_v47 = vmul.f32 %v8472_v25, %v8435_v6  ;;  %v433_v38 = vld [vmem:[#allocation2 + $0x238] sm:$0x1]  ;;  %v1975_v25 = vmul.f32 %v8435_v6, %v8475_v43  ;;  %v8479_v7 = vrot.slane %v6467_v61, 2  ;;  %v6641_v57 = vsel %vm850_vm3, %v2033_v26, %v2035_v34 }
 0x197   : > { %v1978_v44 = vmul.f32 %v8435_v6, %v433_v38  ;;  %v6649_v6 = vsel %vm850_vm3, %v2038_v23, %v2040_v0  ;;  %v2070_v10 = vrot.slane %v1957_v12, 2  ;;  %v8482_v22 = vrot.slane %v6493_v60, 2 }
 0x198   : > { %v6638_v43 = vsel %vm850_vm3, %v8479_v7, %v2033_v26  ;;  %v8483_v8 = vrot.slane %v6489_v4, 2  ;;  %v7529_v12 = vrot.slane %v6548_v59, 2  ;;  %v2072_v0 = vrot.slane %v6553_v35, 2 }
 0x199   : > { %v2073_v4 = vrot.slane %v6557_v14, 2  ;;  %v2078_v21 = vrot.slane %v6568_v51, 2  ;;  %v2080_v19 = vrot.slane %v6571_v16, 2  ;;  %v2082_v26 = vrot.slane %v6575_v56, 2 }
 0x19a   : > { %v6656_v38 = vsel %vm850_vm3, %v8483_v8, %v8482_v22  ;;  %v2075_v22 = vrot.slane %v6560_v3, 2  ;;  %v2077_v8 = vrot.slane %v6564_v13, 2  ;;  %v2071_v34 = vsel %vm850_vm3, %v7529_v12, %v2070_v10 }
 0x19b   : > { %8484 = vst [vmem:[#allocation30_spill] sm:$0xff] %v6656_v38  ;;  %v2083_v23 = vrot.slane %v6579_v46, 2  ;;  %v2085_v35 = vrot.slane %v6582_v55, 2  ;;  %v2087_v14 = vrot.slane %v6586_v24, 2  ;;  %v2088_v3 = vrot.slane %v6590_v48, 2 }
 0x19c   : > { %v2090_v13 = vrot.slane %v6593_v62, 2  ;;  %v2092_v7 = vrot.slane %v6597_v47, 2  ;;  %v2093_v10 = vrot.slane %v6601_v31, 2  ;;  %v2095_v12 = vrot.slane %v1972_v54, 2 }
 0x19d   : > { %v2074_v51 = vsel %vm850_vm3, %v2072_v0, %v2073_v4  ;;  %v2097_v16 = vrot.slane %v6615_v58, 2  ;;  %v2098_v56 = vrot.slane %v1974_v5, 2  ;;  %v2100_v38 = vrot.slane %v1975_v25, 2 }
 0x19e   : > { %v2076_v46 = vsel %vm850_vm3, %v2073_v4, %v2075_v22  ;;  %v2102_v55 = vrot.slane %v6624_v27, 2  ;;  %v2103_v24 = vrot.slane %v1977_v30, 2  ;;  %v2105_v17 = vrot.slane %v1978_v44, 2 }
 0x19f   : > { %v2079_v48 = vsel %vm850_vm3, %v2077_v8, %v2078_v21  ;;  %v2081_v62 = vsel %vm850_vm3, %v2078_v21, %v2080_v19  ;;  %v2084_v47 = vsel %vm850_vm3, %v2082_v26, %v2083_v23  ;;  %v2086_v54 = vsel %vm850_vm3, %v2083_v23, %v2085_v35 }
 0x1a0   : > { %v2089_v31 = vsel %vm850_vm3, %v2087_v14, %v2088_v3  ;;  %v2091_v58 = vsel %vm850_vm3, %v2088_v3, %v2090_v13  ;;  %v2094_v25 = vsel %vm850_vm3, %v2092_v7, %v2093_v10  ;;  %v2096_v4 = vsel %vm850_vm3, %v2093_v10, %v2095_v12  ;;  %v8493_v3 = vld [vmem:[#allocation106_spill] sm:$0xff] }
 0x1a1   : > { %v2099_v5 = vsel %vm850_vm3, %v2097_v16, %v2098_v56  ;;  %v2101_v27 = vsel %vm850_vm3, %v2098_v56, %v2100_v38  ;;  %v8485_v30 = vrot.slane %v6456_v2, 2  ;;  %v2156_v19 = vadd.f32 %v2029_v42, %v6359_v45 }
 0x1a2   : > { %v2104_v21 = vsel %vm850_vm3, %v2102_v55, %v2103_v24  ;;  %v2106_v23 = vsel %vm850_vm3, %v2103_v24, %v2105_v17  ;;  %v6703_v22 = vadd.f32 %v2071_v34, %v6452_v52  ;;  %v6706_v35 = vadd.f32 %v2072_v0, %v6230_v11 }
 0x1a3   : > { %v2155_v44 = vadd.f32 %v8485_v30, %v6356_v37  ;;  %v6709_v12 = vadd.f32 %v2074_v51, %v6233_v49  ;;  %v6712_v38 = vadd.f32 %v2076_v46, %v6236_v1  ;;  %v6715_v37 = vadd.f32 %v2077_v8, %v6239_v15  ;;  %v8495_v51 = vld [vmem:[#allocation110_spill] sm:$0xff]  ;;  %v8496_v46 = vld [vmem:[#allocation109_spill] sm:$0xff]  ;;  %v8503_v30 = vld [vmem:[#allocation20_spill] sm:$0xff] }
 0x1a4   : > { %v6718_v45 = vadd.f32 %v2079_v48, %v6242_v20  ;;  %v6721_v2 = vadd.f32 %v2081_v62, %v6245_v50  ;;  %v6724_v52 = vadd.f32 %v2082_v26, %v6248_v9  ;;  %v6727_v11 = vadd.f32 %v2084_v47, %v6251_v18  ;;  %v8486_v20 = vld [vmem:[#allocation92_spill] sm:$0xff]  ;;  %v8487_v50 = vld [vmem:[#allocation93_spill] sm:$0xff]  ;;  %v8488_v9 = vld [vmem:[#allocation94_spill] sm:$0xff] }
 0x1a5   : > { %v6730_v49 = vadd.f32 %v2086_v54, %v6254_v32  ;;  %v6733_v1 = vadd.f32 %v2087_v14, %v6257_v41  ;;  %v6736_v15 = vadd.f32 %v2089_v31, %v6260_v33  ;;  %v6739_v17 = vadd.f32 %v2091_v58, %v8486_v20  ;;  %v8489_v18 = vld [vmem:[#allocation105_spill] sm:$0xff]  ;;  %v8490_v32 = vld [vmem:[#allocation95_spill] sm:$0xff]  ;;  %v8491_v41 = vld [vmem:[#allocation96_spill] sm:$0xff] }
 0x1a6   : > { %v6742_v42 = vadd.f32 %v2092_v7, %v8487_v50  ;;  %v6745_v34 = vadd.f32 %v2094_v25, %v8488_v9  ;;  %v6748_v26 = vadd.f32 %v2096_v4, %v8489_v18  ;;  %v6751_v0 = vadd.f32 %v2097_v16, %v8490_v32  ;;  %v8492_v33 = vld [vmem:[#allocation97_spill] sm:$0xff]  ;;  %v8494_v7 = vld [vmem:[#allocation107_spill] sm:$0xff]  ;;  %v8497_v48 = vld [vmem:[#allocation24_spill] sm:$0xff] }
 0x1a7   : > { %v6754_v8 = vadd.f32 %v2099_v5, %v8491_v41  ;;  %v6757_v14 = vadd.f32 %v2101_v27, %v8492_v33  ;;  %v6760_v13 = vadd.f32 %v2102_v55, %v8493_v3  ;;  %v6763_v10 = vadd.f32 %v2104_v21, %v8494_v7  ;;  %v8500_v58 = vld [vmem:[#allocation7_spill] sm:$0xff]  ;;  %v8502_v5 = vld [vmem:[#allocation8_spill] sm:$0xff]  ;;  %v8508_v20 = vld [vmem:[#allocation22_spill] sm:$0xff] }
 0x1a8   : > { %v6766_v56 = vadd.f32 %v2106_v23, %v8495_v51  ;;  %v2053_v24 = vrot.slane %v8496_v46, 2  ;;  %v2157_v16 = vadd.f32 %v6633_v36, %v8497_v48  ;;  %v2252_v62 = vrot.slane %v2155_v44, 7  ;;  %v8509_v50 = vld [vmem:[#allocation49_spill] sm:$0xff]  ;;  %v8514_v41 = vld [vmem:[#allocation112_spill] sm:$0xff]  ;;  %v8516_v51 = vld [vmem:[#allocation10_spill] sm:$0xff] }
 0x1a9   : > { %v2253_v47 = vrot.slane %v2156_v19, 7  ;;  %v8498_v54 = vrot.slane %v6496_v53, 2  ;;  %v8499_v31 = vrot.slane %v6493_v60, 2  ;;  %v8501_v25 = vrot.slane %v6467_v61, 2  ;;  %v8506_v19 = vld [vmem:[#allocation116_spill] sm:$0xff]  ;;  %v8515_v3 = vld [vmem:[#allocation41_spill] sm:$0xff] }
 0x1aa   : > { %v2159_v27 = vadd.f32 %v6638_v43, %v8502_v5  ;;  %v2160_v21 = vadd.f32 %v6641_v57, %v8503_v30  ;;  %v8504_v36 = vrot.slane %v6548_v59, 2  ;;  %v8505_v44 = vrot.slane %v6544_v63, 2  ;;  %v8522_v30 = vld [vmem:[#allocation76_spill] sm:$0xff] }
 0x1ab   : > { %v2046_v55 = vsel %vm850_vm3, %v8499_v31, %v8498_v54  ;;  %v2158_v4 = vadd.f32 %v8501_v25, %v8500_v58  ;;  %v8507_v60 = vrot.slane %v6478_v40, 2  ;;  %v6793_v61 = vadd.f32 %v8509_v50, %v8508_v20  ;;  %v8518_v54 = vld [vmem:[#allocation79_spill] sm:$0xff]  ;;  %v8523_v20 = vld [vmem:[#allocation100_spill] sm:$0xff] }
 0x1ac   : > { %v2069_v53 = vsel %vm850_vm3, %v8505_v44, %v8504_v36  ;;  %v6796_v9 = vsel %vm2251_vm4, %v2252_v62, %v2253_v47  ;;  %v8510_v43 = vrot.slane %v6504_v29, 2  ;;  %v8511_v57 = vrot.slane %v6500_v39, 2  ;;  %v8517_v62 = vld [vmem:[#allocation59_spill] sm:$0xff]  ;;  %v8520_v29 = vld [vmem:[#allocation73_spill] sm:$0xff] }
 0x1ad   : > { %v2161_v23 = vadd.f32 %v8507_v60, %v8506_v19  ;;  %v8512_v18 = vrot.slane %v6507_v28, 2  ;;  %v2055_v33 = vrot.slane %v8514_v41, 2  ;;  %v2057_v7 = vrot.slane %v8515_v3, 2  ;;  %3095 = vmatprep.mubr.msk.f32.mxu0 %vm255_vm0, %v6796_v9 }
 0x1ae   : > { %v2049_v59 = vsel %vm850_vm3, %v8511_v57, %v8510_v43  ;;  %v8513_v32 = vmov %v8510_v43  ;;  %v6816_v48 = vadd.f32 %v6649_v6, %v8516_v51  ;;  %v8519_v31 = vrot.slane %v8518_v54, 2  ;;  %v8525_v43 = vld [vmem:[#allocation101_spill] sm:$0xff]  ;;  %v8526_v57 = vld [vmem:[#allocation30_spill] sm:$0xff] }
 0x1af   : > { %v6808_v40 = vsel %vm850_vm3, %v8513_v32, %v8512_v18  ;;  %v8521_v58 = vmov %v8505_v44  ;;  %v2255_v5 = vrot.slane %v2157_v16, 7  ;;  %v2180_v36 = vadd.f32 %v2069_v53, %v8522_v30  ;;  %v8527_v16 = vld [vmem:[#allocation23_spill] sm:$0xff]  ;;  %v8528_v53 = vld [vmem:[#allocation113_spill] sm:$0xff] }
 0x1b0   : > { %v6821_v28 = vadd.f32 %v8519_v31, %v8517_v62  ;;  %v2179_v25 = vadd.f32 %v8521_v58, %v8520_v29  ;;  %v2257_v44 = vrot.slane %v2158_v4, 7  ;;  %v2258_v19 = vrot.slane %v2159_v27, 7  ;;  %v8529_v27 = vld [vmem:[#allocation63_spill] sm:$0xff]  ;;  %v8530_v62 = vld [vmem:[#allocation102_spill] sm:$0xff]  ;;  %v8532_v29 = vld [vmem:[#allocation64_spill] sm:$0xff] }
 0x1b1   : > { %v2260_v60 = vrot.slane %v2160_v21, 7  ;;  %v8524_v6 = vrot.slane %v8523_v20, 2  ;;  %v6836_v18 = vadd.f32 %v8526_v57, %v8525_v43  ;;  %v2262_v32 = vrot.slane %v2161_v23, 7 }
 0x1b2   : > { %v2263_v63 = vrot.slane %v6793_v61, 7  ;;  %v2058_v51 = vrot.slane %v8527_v16, 2  ;;  %v2060_v4 = vrot.slane %v8528_v53, 2  ;;  %v6842_v21 = vadd.f32 %v2046_v55, %v8529_v27 }
 0x1b3   : > { %v6832_v50 = vsel %vm850_vm3, %v8524_v6, %v2053_v24  ;;  %v8531_v54 = vrot.slane %v6500_v39, 2  ;;  %v6850_v58 = vadd.f32 %v2049_v59, %v8532_v29  ;;  %v6853_v30 = vsel %vm2251_vm4, %v2253_v47, %v2255_v5 }
 0x1b4   : > { %v2265_v23 = vrot.slane %v6816_v48, 7  ;;  %v2267_v6 = vrot.slane %v6821_v28, 7  ;;  %v6858_v43 = vsel %vm2251_vm4, %v2257_v44, %v2258_v19  ;;  %v6861_v55 = vsel %vm2251_vm4, %v2258_v19, %v2260_v60 }
 0x1b5   : > { %v6847_v31 = vadd.f32 %v8531_v54, %v8530_v62  ;;  %v2292_v57 = vrot.slane %v2179_v25, 7  ;;  %v2293_v39 = vrot.slane %v2180_v36, 7  ;;  %v6866_v59 = vsel %vm2251_vm4, %v2262_v32, %v2263_v63 }
 0x1b6   : > { %v2268_v47 = vrot.slane %v6836_v18, 7  ;;  %v2295_v5 = vrot.slane %v6703_v22, 7  ;;  %v2297_v48 = vrot.slane %v6706_v35, 7  ;;  %v2298_v44 = vrot.slane %v6709_v12, 7 }
 0x1b7   : > { %v6872_v27 = vsel %vm2251_vm4, %v2292_v57, %v2293_v39  ;;  %v2300_v19 = vrot.slane %v6712_v38, 7  ;;  %v2302_v25 = vrot.slane %v6715_v37, 7  ;;  %v2303_v60 = vrot.slane %v6718_v45, 7 }
 0x1b8   : > { %v6878_v36 = vsel %vm2251_vm4, %v2293_v39, %v2295_v5  ;;  %v2305_v32 = vrot.slane %v6721_v2, 7  ;;  %v2307_v22 = vrot.slane %v6724_v52, 7  ;;  %3119 = vmatprep.mubr.msk.f32.mxu1 %vm255_vm0, %v6872_v27  ;;  %v6886_v35 = vsel %vm2251_vm4, %v2297_v48, %v2298_v44 }
 0x1b9   : > { %v6889_v12 = vsel %vm2251_vm4, %v2298_v44, %v2300_v19  ;;  %v2308_v38 = vrot.slane %v6727_v11, 7  ;;  %v2310_v37 = vrot.slane %v6730_v49, 7  ;;  %v6894_v62 = vsel %vm2251_vm4, %v2302_v25, %v2303_v60 }
 0x1ba   : > { %v6897_v45 = vsel %vm2251_vm4, %v2303_v60, %v2305_v32  ;;  %v2312_v2 = vrot.slane %v6733_v1, 7  ;;  %v2313_v52 = vrot.slane %v6736_v15, 7  ;;  %v2315_v11 = vrot.slane %v6739_v17, 7 }
 0x1bb   : > { %v6902_v54 = vsel %vm2251_vm4, %v2307_v22, %v2308_v38  ;;  %v6905_v29 = vsel %vm2251_vm4, %v2308_v38, %v2310_v37  ;;  %v2317_v49 = vrot.slane %v6742_v42, 7  ;;  %v2318_v39 = vrot.slane %v6745_v34, 7  ;;  %v8533_v22 = vld [vmem:[#allocation88_spill] sm:$0xff]  ;;  %v8534_v37 = vld [vmem:[#allocation82_spill] sm:$0xff] }
 0x1bc   : > { %v6910_v57 = vsel %vm2251_vm4, %v2312_v2, %v2313_v52  ;;  %v2320_v5 = vrot.slane %v6748_v26, 7  ;;  %v2322_v1 = vrot.slane %v6751_v0, 7  ;;  %v6916_v15 = vsel %vm2251_vm4, %v2313_v52, %v2315_v11  ;;  %v8535_v11 = vld [vmem:[#allocation65_spill] sm:$0xff] }
 0x1bd   : > { %v2323_v48 = vrot.slane %v6754_v8, 7  ;;  %v2325_v44 = vrot.slane %v6757_v14, 7  ;;  %v2327_v17 = vrot.slane %v6760_v13, 7  ;;  %v6922_v42 = vsel %vm2251_vm4, %v2317_v49, %v2318_v39 }
 0x1be   : > { %v6925_v19 = vsel %vm2251_vm4, %v2318_v39, %v2320_v5  ;;  %v2328_v34 = vrot.slane %v6763_v10, 7  ;;  %v2330_v26 = vrot.slane %v6766_v56, 7  ;;  %v2364_v8 = vsel %vm255_vm0, %v6796_v9, 0.0 }
 0x1bf   : > { %v6930_v0 = vsel %vm2251_vm4, %v2322_v1, %v2323_v48  ;;  %v6933_v25 = vsel %vm2251_vm4, %v2323_v48, %v2325_v44  ;;  %v2365_v14 = vsel %vm255_vm0, %v6853_v30, 0.0  ;;  %v2367_v56 = vsel %vm255_vm0, %v6858_v43, 0.0  ;;  %v8538_v48 = vld [vmem:[#allocation11_spill] sm:$0xff] }
 0x1c0   : > { %v6940_v13 = vsel %vm2251_vm4, %v2327_v17, %v2328_v34  ;;  %v6943_v60 = vsel %vm2251_vm4, %v2328_v34, %v2330_v26  ;;  %v2366_v10 = vadd.f32 %v2365_v14, %v2364_v8  ;;  %v2056_v32 = vsel %vm850_vm3, %v2053_v24, %v2055_v33  ;;  %v8536_v33 = vld [vmem:[#allocation98_spill] sm:$0xff] }
 0x1c1   : > { %v2062_v38 = vrot.slane %v8533_v22, 2  ;;  %v2063_v2 = vrot.slane %v8534_v37, 2  ;;  %v2369_v52 = vsel %vm255_vm0, %v6861_v55, 0.0  ;;  %v2169_v49 = vadd.f32 %v6808_v40, %v8535_v11  ;;  %v8540_v17 = vld [vmem:[#allocation18_spill] sm:$0xff]  ;;  %v8546_v11 = vld [vmem:[#allocation87_spill] sm:$0xff] }
 0x1c2   : > { %v6961_v39 = vsel %vm2251_vm4, %v2263_v63, %v2265_v23  ;;  %v2270_v41 = vrot.slane %v6842_v21, 7  ;;  %v2368_v46 = vadd.f32 %v2367_v56, %v2366_v10  ;;  %v2059_v24 = vsel %vm850_vm3, %v2057_v7, %v2058_v51  ;;  %v8541_v26 = vld [vmem:[#allocation114_spill] sm:$0xff]  ;;  %v8543_v56 = vld [vmem:[#allocation12_spill] sm:$0xff] }
 0x1c3   : > { %v8537_v5 = vrot.slane %v8523_v20, 2  ;;  %v2171_v40 = vadd.f32 %v6832_v50, %v8538_v48  ;;  %v2371_v61 = vsel %vm255_vm0, %v6866_v59, 0.0  ;;  %v6981_v63 = vsel %vm2251_vm4, %v2267_v6, %v2268_v47  ;;  %v8539_v20 = vld [vmem:[#allocation16_spill] sm:$0xff]  ;;  %v8542_v6 = vld [vmem:[#allocation15_spill] sm:$0xff] }
 0x1c4   : > { %v2272_v21 = vrot.slane %v6847_v31, 7  ;;  %v2273_v23 = vrot.slane %v6850_v58, 7  ;;  %v2370_v44 = vadd.f32 %v2369_v52, %v2368_v46  ;;  %v1901_v34 = vadd.f32 %v8540_v17, %v8539_v20  ;;  %v8545_v52 = vld [vmem:[#allocation17_spill] sm:$0xff]  ;;  %v8548_v46 = vld [vmem:[#allocation66_spill] sm:$0xff] }
 0x1c5   : > { %v2170_v1 = vadd.f32 %v8537_v5, %v8536_v33  ;;  %v2061_v50 = vsel %vm850_vm3, %v2058_v51, %v2060_v4  ;;  %v2065_v8 = vrot.slane %v8541_v26, 2  ;;  %v2373_v28 = vsel %vm255_vm0, %v6961_v39, 0.0  ;;  %v8544_v51 = vld [vmem:[#allocation13_spill] sm:$0xff] }
 0x1c6   : > { %v2172_v14 = vadd.f32 %v2056_v32, %v8542_v6  ;;  %v6999_v31 = vsel %vm2251_vm4, %v2268_v47, %v2270_v41  ;;  %v2275_v58 = vrot.slane %v2169_v49, 7  ;;  %v2372_v10 = vadd.f32 %v2371_v61, %v2370_v44  ;;  %v8549_v61 = vld [vmem:[#allocation69_spill] sm:$0xff] }
 0x1c7   : > { %v2064_v53 = vsel %vm850_vm3, %v2062_v38, %v2063_v2  ;;  %v2173_v16 = vadd.f32 %v2057_v7, %v8543_v56  ;;  %v2174_v4 = vadd.f32 %v2059_v24, %v8544_v51  ;;  %v2375_v22 = vsel %vm255_vm0, %v6981_v63, 0.0 }
 0x1c8   : > { %v7009_v32 = vsel %vm2251_vm4, %v2272_v21, %v2273_v23  ;;  %v2277_v18 = vrot.slane %v2170_v1, 7  ;;  %v2278_v37 = vrot.slane %v2171_v40, 7  ;;  %v2374_v47 = vadd.f32 %v2373_v28, %v2372_v10 }
 0x1c9   : > { %v8547_v49 = vrot.slane %v8546_v11, 1  ;;  %v2175_v33 = vadd.f32 %v2061_v50, %v8548_v46  ;;  %v2377_v3 = vsel %vm255_vm0, %v6999_v31, 0.0  ;;  %v2066_v7 = vsel %vm850_vm3, %v2063_v2, %v2065_v8 }
 0x1ca   : > { %v7019_v24 = vsel %vm2251_vm4, %v2273_v23, %v2275_v58  ;;  %v2280_v5 = vrot.slane %v2172_v14, 7  ;;  %v2376_v48 = vadd.f32 %v2375_v22, %v2374_v47  ;;  %v2176_v1 = vadd.f32 %v2062_v38, %v8549_v61 }
 0x1cb   : > { %v1902_v41 = vadd.f32 %v8547_v49, %v8545_v52  ;;  %v2177_v40 = vadd.f32 %v2064_v53, %v1901_v34  ;;  %v2379_v21 = vsel %vm255_vm0, %v7009_v32, 0.0  ;;  %v7025_v44 = vsel %vm2251_vm4, %v2277_v18, %v2278_v37 }
 0x1cc   : > { %v2282_v20 = vrot.slane %v2173_v16, 7  ;;  %v2283_v17 = vrot.slane %v2174_v4, 7  ;;  %v2378_v50 = vadd.f32 %v2377_v3, %v2376_v48  ;;  %v2285_v28 = vrot.slane %v2175_v33, 7 }
 0x1cd   : > { %v2178_v26 = vadd.f32 %v2066_v7, %v1902_v41  ;;  %v2381_v2 = vsel %vm255_vm0, %v7019_v24, 0.0  ;;  %v7030_v23 = vsel %vm2251_vm4, %v2278_v37, %v2280_v5  ;;  %v2434_v38 = vmul.f32 %v6796_v9, %v6796_v9 }
 0x1ce   : > { %v2380_v8 = vadd.f32 %v2379_v21, %v2378_v50  ;;  %v2435_v34 = vmul.f32 %v6853_v30, %v6853_v30  ;;  %v2287_v6 = vrot.slane %v2176_v1, 7  ;;  %v2383_v14 = vsel %vm255_vm0, %v7025_v44, 0.0 }
 0x1cf   : > { %v2436_v58 = vmul.f32 %v6858_v43, %v6858_v43  ;;  %v7041_v10 = vsel %vm2251_vm4, %v2282_v20, %v2283_v17  ;;  %v2288_v53 = vrot.slane %v2177_v40, 7  ;;  %v2437_v16 = vmul.f32 %v6861_v55, %v6861_v55 }
 0x1d0   : > { %v2382_v56 = vadd.f32 %v2381_v2, %v2380_v8  ;;  %v7046_v9 = vsel %vm2251_vm4, %v2283_v17, %v2285_v28  ;;  %v2290_v51 = vrot.slane %v2178_v26, 7  ;;  %v2385_v4 = vsel %vm255_vm0, %v7030_v23, 0.0 }
 0x1d1   : > { %v2438_v18 = vmul.f32 %v6866_v59, %v6866_v59  ;;  %v2466_v37 = vsel %vm255_vm0, %v2434_v38, 0.0  ;;  %v2467_v47 = vsel %vm255_vm0, %v2435_v34, 0.0  ;;  %v2387_v52 = vsel %vm255_vm0, %v7041_v10, 0.0 }
 0x1d2   : > { %v2384_v22 = vadd.f32 %v2383_v14, %v2382_v56  ;;  %v2468_v11 = vadd.f32 %v2467_v47, %v2466_v37  ;;  %v2469_v49 = vsel %vm255_vm0, %v2436_v58, 0.0  ;;  %v7058_v41 = vsel %vm2251_vm4, %v2287_v6, %v2288_v53 }
 0x1d3   : > { %v2439_v33 = vmul.f32 %v6961_v39, %v6961_v39  ;;  %v2471_v3 = vsel %vm255_vm0, %v2437_v16, 0.0  ;;  %v2389_v7 = vsel %vm255_vm0, %v7046_v9, 0.0  ;;  %v7066_v48 = vsel %vm2251_vm4, %v2288_v53, %v2290_v51 }
 0x1d4   : > { %v2386_v46 = vadd.f32 %v2385_v4, %v2384_v22  ;;  %v2470_v5 = vadd.f32 %v2469_v49, %v2468_v11  ;;  %v2440_v1 = vmul.f32 %v6981_v63, %v6981_v63  ;;  %v2473_v40 = vsel %vm255_vm0, %v2438_v18, 0.0 }
 0x1d5   : > { %v2391_v21 = vsel %vm255_vm0, %v7058_v41, 0.0  ;;  %v2441_v50 = vmul.f32 %v6999_v31, %v6999_v31  ;;  %v2475_v26 = vsel %vm255_vm0, %v2439_v33, 0.0  ;;  %v2393_v28 = vsel %vm255_vm0, %v7066_v48, 0.0 }
 0x1d6   : > { %v2388_v61 = vadd.f32 %v2387_v52, %v2386_v46  ;;  %v2472_v20 = vadd.f32 %v2471_v3, %v2470_v5  ;;  %v2442_v38 = vmul.f32 %v7009_v32, %v7009_v32  ;;  %v2477_v34 = vsel %vm255_vm0, %v2440_v1, 0.0 }
 0x1d7   : > { %v2395_v6 = vsel %vm255_vm0, %v6872_v27, 0.0  ;;  %v2443_v53 = vmul.f32 %v7019_v24, %v7019_v24  ;;  %v2479_v56 = vsel %vm255_vm0, %v2441_v50, 0.0  ;;  %v2397_v16 = vsel %vm255_vm0, %v6878_v36, 0.0 }
 0x1d8   : > { %v2390_v17 = vadd.f32 %v2389_v7, %v2388_v61  ;;  %v2474_v2 = vadd.f32 %v2473_v40, %v2472_v20  ;;  %v2444_v22 = vmul.f32 %v7025_v44, %v7025_v44  ;;  %v2481_v18 = vsel %vm255_vm0, %v2442_v38, 0.0 }
 0x1d9   : > { %v2399_v37 = vsel %vm255_vm0, %v6886_v35, 0.0  ;;  %v2445_v11 = vmul.f32 %v7030_v23, %v7030_v23  ;;  %v2483_v49 = vsel %vm255_vm0, %v2443_v53, 0.0  ;;  %v2401_v46 = vsel %vm255_vm0, %v6889_v12, 0.0 }
 0x1da   : > { %v2392_v8 = vadd.f32 %v2391_v21, %v2390_v17  ;;  %v2476_v14 = vadd.f32 %v2475_v26, %v2474_v2  ;;  %v2446_v7 = vmul.f32 %v7041_v10, %v7041_v10  ;;  %v2485_v5 = vsel %vm255_vm0, %v2444_v22, 0.0 }
 0x1db   : > { %v2403_v61 = vsel %vm255_vm0, %v6894_v62, 0.0  ;;  %v2447_v21 = vmul.f32 %v7046_v9, %v7046_v9  ;;  %v2487_v20 = vsel %vm255_vm0, %v2445_v11, 0.0  ;;  %v2405_v17 = vsel %vm255_vm0, %v6897_v45, 0.0 }
 0x1dc   : > { %v2394_v58 = vadd.f32 %v2393_v28, %v2392_v8  ;;  %v2478_v51 = vadd.f32 %v2477_v34, %v2476_v14  ;;  %v2448_v28 = vmul.f32 %v7058_v41, %v7058_v41  ;;  %v2489_v2 = vsel %vm255_vm0, %v2446_v7, 0.0 }
 0x1dd   : > { %v2407_v8 = vsel %vm255_vm0, %v6902_v54, 0.0  ;;  %v2491_v14 = vsel %vm255_vm0, %v2447_v21, 0.0 }
 0x1de   : > { %v2396_v4 = vadd.f32 %v2395_v6, %v2394_v58  ;;  %v2480_v47 = vadd.f32 %v2479_v56, %v2478_v51  ;;  %v2449_v6 = vmul.f32 %v7066_v48, %v7066_v48  ;;  %v2409_v58 = vsel %vm255_vm0, %v6905_v29, 0.0 }
 0x1df   : > { %v2493_v51 = vsel %vm255_vm0, %v2448_v28, 0.0 }
 0x1e0   : > { %v2398_v52 = vadd.f32 %v2397_v16, %v2396_v4  ;;  %v2482_v33 = vadd.f32 %v2481_v18, %v2480_v47  ;;  %v2450_v16 = vmul.f32 %v6872_v27, %v6872_v27  ;;  %v2411_v4 = vsel %vm255_vm0, %v6910_v57, 0.0 }
 0x1e1   : > { %v2495_v47 = vsel %vm255_vm0, %v2449_v6, 0.0  ;;  %v2452_v27 = vmul.f32 %v6886_v35, %v6886_v35 }
 0x1e2   : > { %v2400_v3 = vadd.f32 %v2399_v37, %v2398_v52  ;;  %v2484_v1 = vadd.f32 %v2483_v49, %v2482_v33  ;;  %v2451_v37 = vmul.f32 %v6878_v36, %v6878_v36  ;;  %v2413_v52 = vsel %vm255_vm0, %v6916_v15, 0.0 }
 0x1e3   : > { %v2415_v33 = vsel %vm255_vm0, %v6922_v42, 0.0 }
 0x1e4   : > { %v2402_v40 = vadd.f32 %v2401_v46, %v2400_v3  ;;  %v2486_v50 = vadd.f32 %v2485_v5, %v2484_v1  ;;  %v2497_v46 = vsel %vm255_vm0, %v2450_v16, 0.0  ;;  %v2453_v5 = vmul.f32 %v6889_v12, %v6889_v12 }
 0x1e5   : > { %v2417_v1 = vsel %vm255_vm0, %v6925_v19, 0.0 }
 0x1e6   : > { %v2404_v26 = vadd.f32 %v2403_v61, %v2402_v40  ;;  %v2488_v38 = vadd.f32 %v2487_v20, %v2486_v50  ;;  %v2499_v61 = vsel %vm255_vm0, %v2451_v37, 0.0  ;;  %v2454_v20 = vmul.f32 %v6894_v62, %v6894_v62 }
 0x1e7   : > { %v2419_v50 = vsel %vm255_vm0, %v6930_v0, 0.0 }
 0x1e8   : > { %v2406_v34 = vadd.f32 %v2405_v17, %v2404_v26  ;;  %v2490_v53 = vadd.f32 %v2489_v2, %v2488_v38  ;;  %v2501_v17 = vsel %vm255_vm0, %v2452_v27, 0.0  ;;  %v2455_v2 = vmul.f32 %v6897_v45, %v6897_v45 }
 0x1e9   : > { %v2421_v38 = vsel %vm255_vm0, %v6933_v25, 0.0  ;;  %v2459_v27 = vmul.f32 %v6916_v15, %v6916_v15 }
 0x1ea   : > { %v2408_v56 = vadd.f32 %v2407_v8, %v2406_v34  ;;  %v2492_v22 = vadd.f32 %v2491_v14, %v2490_v53  ;;  %v2503_v8 = vsel %vm255_vm0, %v2453_v5, 0.0  ;;  %v2456_v14 = vmul.f32 %v6902_v54, %v6902_v54 }
 0x1eb   : > { %v2423_v53 = vsel %vm255_vm0, %v6940_v13, 0.0 }
 0x1ec   : > { %v2410_v18 = vadd.f32 %v2409_v58, %v2408_v56  ;;  %v2494_v11 = vadd.f32 %v2493_v51, %v2492_v22  ;;  %v2505_v58 = vsel %vm255_vm0, %v2454_v20, 0.0  ;;  %v2457_v51 = vmul.f32 %v6905_v29, %v6905_v29 }
 0x1ed   : > { %v2425_v22 = vsel %vm255_vm0, %v6943_v60, 0.0  ;;  %v2462_v20 = vmul.f32 %v6930_v0, %v6930_v0 }
 0x1ee   : > { %v2412_v49 = vadd.f32 %v2411_v4, %v2410_v18  ;;  %v2496_v3 = vadd.f32 %v2495_v47, %v2494_v11  ;;  %v2507_v4 = vsel %vm255_vm0, %v2455_v2, 0.0  ;;  %v2458_v47 = vmul.f32 %v6910_v57, %v6910_v57 }
 0x1f0   : > { %v2414_v7 = vadd.f32 %v2413_v52, %v2412_v49  ;;  %v2498_v40 = vadd.f32 %v2497_v46, %v2496_v3  ;;  %v2509_v52 = vsel %vm255_vm0, %v2456_v14, 0.0  ;;  %v2511_v46 = vsel %vm255_vm0, %v2457_v51, 0.0 }
 0x1f1   : > { %v2460_v3 = vmul.f32 %v6922_v42, %v6922_v42 }
 0x1f2   : > { %v2416_v21 = vadd.f32 %v2415_v33, %v2414_v7  ;;  %v2500_v26 = vadd.f32 %v2499_v61, %v2498_v40  ;;  %v2513_v7 = vsel %vm255_vm0, %v2458_v47, 0.0  ;;  %v2515_v40 = vsel %vm255_vm0, %v2459_v27, 0.0 }
 0x1f4   : > { %v2418_v28 = vadd.f32 %v2417_v1, %v2416_v21  ;;  %v2502_v34 = vadd.f32 %v2501_v17, %v2500_v26  ;;  %v2461_v1 = vmul.f32 %v6925_v19, %v6925_v19  ;;  %v2517_v17 = vsel %vm255_vm0, %v2460_v3, 0.0 }
 0x1f6   : > { %v2420_v6 = vadd.f32 %v2419_v50, %v2418_v28  ;;  %v2504_v56 = vadd.f32 %v2503_v8, %v2502_v34  ;;  %v2463_v28 = vmul.f32 %v6933_v25, %v6933_v25  ;;  %v2519_v2 = vsel %vm255_vm0, %v2461_v1, 0.0 }
 0x1f7   : > { %v2521_v34 = vsel %vm255_vm0, %v2462_v20, 0.0 }
 0x1f8   : > { %v2422_v16 = vadd.f32 %v2421_v38, %v2420_v6  ;;  %v2506_v18 = vadd.f32 %v2505_v58, %v2504_v56  ;;  %v2464_v38 = vmul.f32 %v6940_v13, %v6940_v13  ;;  %v2465_v58 = vmul.f32 %v6943_v60, %v6943_v60 }
 0x1fa   : > { %v2424_v37 = vadd.f32 %v2423_v53, %v2422_v16  ;;  %v2508_v11 = vadd.f32 %v2507_v4, %v2506_v18  ;;  %v2523_v53 = vsel %vm255_vm0, %v2463_v28, 0.0  ;;  %v2525_v16 = vsel %vm255_vm0, %v2464_v38, 0.0 }
 0x1fc   : > { %v2426_v49 = vadd.f32 %v2425_v22, %v2424_v37  ;;  %v2510_v33 = vadd.f32 %v2509_v52, %v2508_v11  ;;  %v2527_v22 = vsel %vm255_vm0, %v2465_v58, 0.0 }
 0x1fe   : > { %v2427_v5 = vrot.slane %v2426_v49, 4  ;;  %v2512_v61 = vadd.f32 %v2511_v46, %v2510_v33 }
 0x200   : > { %v2514_v21 = vadd.f32 %v2513_v7, %v2512_v61  ;;  %v2428_v50 = vadd.f32 %v2427_v5, %v2426_v49 }
 0x202   : > { %v2516_v26 = vadd.f32 %v2515_v40, %v2514_v21  ;;  %v2429_v6 = vrot.slane %v2428_v50, 2  ;;  %v2540_v21 = vld [vmem:[%s7306_s2] sm:$0x1] }
 0x204   : > { %v2518_v8 = vadd.f32 %v2517_v17, %v2516_v26  ;;  %v2430_v51 = vadd.f32 %v2429_v6, %v2428_v50  ;;  %v8550_v50 = vld [vmem:[#allocation6_spill] sm:$0xff] }
 0x206   : > { %v2520_v14 = vadd.f32 %v2519_v2, %v2518_v8  ;;  %v2431_v37 = vrot.slane %v2430_v51, 1  ;;  %v2542_v2 = vld [vmem:[%s7307_s3] sm:$0x1] }
 0x208   : > { %v2522_v56 = vadd.f32 %v2521_v34, %v2520_v14  ;;  %v2432_v11 = vadd.f32 %v2431_v37, %v2430_v51  ;;  %v2545_v34 = vld [vmem:[%s7308_s4] sm:$0xff] }
 0x20a   : > { %v2524_v4 = vadd.f32 %v2523_v53, %v2522_v56  ;;  %v2433_v46 = vmul.f32 0.00390625, %v2432_v11 }
 0x20c   : > { %v2526_v18 = vadd.f32 %v2525_v16, %v2524_v4  ;;  %v2536_v5 = vmul.f32 %v2433_v46, %v2433_v46 }
 0x20e   : > { %v2528_v47 = vadd.f32 %v2527_v22, %v2526_v18 }
 0x210   : > { %v2529_v52 = vrot.slane %v2528_v47, 4 }
 0x212   : > { %v2530_v49 = vadd.f32 %v2529_v52, %v2528_v47 }
 0x214   : > { %v2531_v27 = vrot.slane %v2530_v49, 2 }
 0x216   : > { %v2532_v33 = vadd.f32 %v2531_v27, %v2530_v49 }
 0x218   : > { %v2533_v3 = vrot.slane %v2532_v33, 1 }
 0x21a   : > { %v2534_v7 = vadd.f32 %v2533_v3, %v2532_v33 }
 0x21c   : > { %v2535_v61 = vmul.f32 0.00390625, %v2534_v7 }
 0x21e   : > { %v2537_v1 = vsub.f32 %v2535_v61, %v2536_v5 }
 0x220   : > { %v2538_v40 = vadd.f32 1e-05, %v2537_v1 }
 0x222   : > { %3187 = vrsqrt.f32 %v2538_v40 }
 0x22f   : > { %v3188_v20 = vpop.eup %3187 }
 0x230   : > { %v2541_v17 = vmul.f32 %v3188_v20, %v2540_v21 }
 0x232   : > { %v2549_v26 = vrot.slane %v2541_v17, %v8550_v50  ;;  %v2543_v28 = vmul.f32 %v2541_v17, %v2433_v46 }
 0x234   : > { %2551 = vbcast.lane.b32.xlu0 %v2549_v26, 256  ;;  %v2544_v8 = vsub.f32 %v2542_v2, %v2543_v28 }
 0x236   : > { %v2557_v38 = vrot.slane %v2544_v8, %v8550_v50 }
 0x238   : > { %2559 = vbcast.lane.b32.xlu0 %v2557_v38, 256 }
 0x2a6   : > { %v2552_v6 = vpop.permute.xlu0 %2551 }
 0x2a7   : > { %v2553_v14 = vmul.f32 %v2552_v6, %v2545_v34 }
 0x2a9   : > { %3093 = vmatprep.subr.mxu0 %v2553_v14  ;;  %3143 = vmatprep.subr.mxu1 %v2553_v14 }
 0x2aa   : > { %3094 = vmatpush3.msra.mxu0 %v2553_v14  ;;  %3144 = vmatpush3.msra.mxu1 %v2553_v14  ;;  %v2560_v58 = vpop.permute.xlu0 %2559 }
 0x2ab   : > { %3096 = vmatmul.mubr.msk.f32.vlgmr.msra.gmra.mxu0 %vm255_vm0, %v6853_v30  ;;  %3120 = vmatmul.mubr.msk.f32.vlgmr.msra.gmra.mxu1 %vm255_vm0, %v6878_v36  ;;  %v2561_v53 = vmul.f32 %v2560_v58, %v2545_v34 }
 0x2ac   : > { %3098 = vmatprep.mubr.msk.f32.mxu0 %vm255_vm0, %v6858_v43  ;;  %3122 = vmatprep.mubr.msk.f32.mxu1 %vm255_vm0, %v6886_v35 }
 0x2ad   : > { %v2563_v56 = vsel %vm2562_vm5, %v2561_v53, 0.0 }
 0x2ae   : > { %v2564_v30 = vrot.slane %v2563_v56, 4 }
 0x2af   : > { %3099 = vmatmul.mubr.msk.f32.gmra.mxu0 %vm255_vm0, %v6861_v55  ;;  %3123 = vmatmul.mubr.msk.f32.gmra.mxu1 %vm255_vm0, %v6889_v12 }
 0x2b0   : > { %3101 = vmatprep.mubr.msk.f32.mxu0 %vm255_vm0, %v6866_v59  ;;  %3125 = vmatprep.mubr.msk.f32.mxu1 %vm255_vm0, %v6894_v62  ;;  %v2565_v36 = vadd.f32 %v2564_v30, %v2563_v56 }
 0x2b2   : > { %v2566_v43 = vrot.slane %v2565_v36, 2 }
 0x2b3   : > { %3102 = vmatmul.mubr.msk.f32.gmra.mxu0 %vm255_vm0, %v6961_v39  ;;  %3126 = vmatmul.mubr.msk.f32.gmra.mxu1 %vm255_vm0, %v6897_v45 }
 0x2b4   : > { %3104 = vmatprep.mubr.msk.f32.mxu0 %vm255_vm0, %v6981_v63  ;;  %3128 = vmatprep.mubr.msk.f32.mxu1 %vm255_vm0, %v6902_v54  ;;  %v2567_v55 = vadd.f32 %v2566_v43, %v2565_v36 }
 0x2b6   : > { %v2568_v59 = vrot.slane %v2567_v55, 1 }
 0x2b7   : > { %3105 = vmatmul.mubr.msk.f32.gmra.mxu0 %vm255_vm0, %v6999_v31  ;;  %3129 = vmatmul.mubr.msk.f32.gmra.mxu1 %vm255_vm0, %v6905_v29 }
 0x2b8   : > { %3107 = vmatprep.mubr.msk.f32.mxu0 %vm255_vm0, %v7009_v32  ;;  %3131 = vmatprep.mubr.msk.f32.mxu1 %vm255_vm0, %v6910_v57  ;;  %v2569_v35 = vadd.f32 %v2568_v59, %v2567_v55 }
 0x2ba   : > { %2924 = vbcast.lane.b32.xlu0 %v2569_v35, 256 }
 0x2bb   : > { %3108 = vmatmul.mubr.msk.f32.gmra.mxu0 %vm255_vm0, %v7019_v24  ;;  %3132 = vmatmul.mubr.msk.f32.gmra.mxu1 %vm255_vm0, %v6916_v15 }
 0x2bc   : > { %3110 = vmatprep.mubr.msk.f32.mxu0 %vm255_vm0, %v7025_v44  ;;  %3134 = vmatprep.mubr.msk.f32.mxu1 %vm255_vm0, %v6922_v42 }
 0x2be   : > { %2928 = vbcast.lane.b32.xlu0 %v2569_v35, 264 }
 0x2bf   : > { %3111 = vmatmul.mubr.msk.f32.gmra.mxu0 %vm255_vm0, %v7030_v23  ;;  %3135 = vmatmul.mubr.msk.f32.gmra.mxu1 %vm255_vm0, %v6925_v19 }
 0x2c0   : > { %3113 = vmatprep.mubr.msk.f32.mxu0 %vm255_vm0, %v7041_v10  ;;  %3137 = vmatprep.mubr.msk.f32.mxu1 %vm255_vm0, %v6930_v0 }
 0x2c3   : > { %3114 = vmatmul.mubr.msk.f32.gmra.mxu0 %vm255_vm0, %v7046_v9  ;;  %3138 = vmatmul.mubr.msk.f32.gmra.mxu1 %vm255_vm0, %v6933_v25 }
 0x2c4   : > { %3116 = vmatprep.mubr.msk.f32.mxu0 %vm255_vm0, %v7058_v41  ;;  %3140 = vmatprep.mubr.msk.f32.mxu1 %vm255_vm0, %v6940_v13 }
 0x2c7   : > { %3117 = vmatmul.mubr.msk.f32.gmra.mxu0 %vm255_vm0, %v7066_v48  ;;  %3141 = vmatmul.mubr.msk.f32.gmra.mxu1 %vm255_vm0, %v6943_v60 }
 0x32c   : > { %v2925_v11 = vpop.permute.xlu0 %2924 }
 0x330   : > { %v2929_v49 = vpop.permute.xlu0 %2928 }
 0x36b   : > { %v3097_v12 = vpop.f32.mrf.mxu0  ;;  %v3121_v62 = vpop.f32.mrf.mxu1 }
 0x36d   : > { %v2700_v45 = vpop.f32.mrf.mxu0  ;;  %v2780_v54 = vpop.f32.mrf.mxu1 }
 0x36e   : > { %2859 = vxpose.xlu1.b32.start [1/16] (narrow) %v2700_v45, 16  ;;  %2891 = vxpose.xlu0.b32.start [1/16] (narrow) %v2780_v54, 16 }
 0x36f   : > { %v3100_v29 = vpop.f32.mrf.mxu0  ;;  %v3124_v57 = vpop.f32.mrf.mxu1 }
 0x371   : > { %v2710_v15 = vpop.f32.mrf.mxu0  ;;  %v2790_v42 = vpop.f32.mrf.mxu1 }
 0x372   : > { %2860 = vxpose.xlu1.b32.cont [2/16] (narrow) %v3097_v12, 16  ;;  %2892 = vxpose.xlu0.b32.cont [2/16] (narrow) %v3121_v62, 16 }
 0x373   : > { %v3103_v19 = vpop.f32.mrf.mxu0  ;;  %v3127_v0 = vpop.f32.mrf.mxu1 }
 0x375   : > { %v2720_v25 = vpop.f32.mrf.mxu0  ;;  %v2800_v13 = vpop.f32.mrf.mxu1 }
 0x376   : > { %2861 = vxpose.xlu1.b32.cont [3/16] (narrow) %v2710_v15, 16  ;;  %2893 = vxpose.xlu0.b32.cont [3/16] (narrow) %v2790_v42, 16 }
 0x377   : > { %v3106_v60 = vpop.f32.mrf.mxu0  ;;  %v3130_v39 = vpop.f32.mrf.mxu1 }
 0x379   : > { %v2730_v63 = vpop.f32.mrf.mxu0  ;;  %v2810_v31 = vpop.f32.mrf.mxu1 }
 0x37a   : > { %2862 = vxpose.xlu1.b32.cont [4/16] (narrow) %v3100_v29, 16  ;;  %2894 = vxpose.xlu0.b32.cont [4/16] (narrow) %v3124_v57, 16 }
 0x37b   : > { %v3109_v32 = vpop.f32.mrf.mxu0  ;;  %v3133_v24 = vpop.f32.mrf.mxu1 }
 0x37d   : > { %v2740_v44 = vpop.f32.mrf.mxu0  ;;  %v2820_v23 = vpop.f32.mrf.mxu1 }
 0x37e   : > { %2863 = vxpose.xlu1.b32.cont [5/16] (narrow) %v2720_v25, 16  ;;  %2895 = vxpose.xlu0.b32.cont [5/16] (narrow) %v2800_v13, 16 }
 0x37f   : > { %v3112_v10 = vpop.f32.mrf.mxu0  ;;  %v3136_v9 = vpop.f32.mrf.mxu1 }
 0x381   : > { %v2750_v41 = vpop.f32.mrf.mxu0  ;;  %v2830_v48 = vpop.f32.mrf.mxu1 }
 0x382   : > { %2864 = vxpose.xlu1.b32.cont [6/16] (narrow) %v3103_v19, 16  ;;  %2896 = vxpose.xlu0.b32.cont [6/16] (narrow) %v3127_v0, 16 }
 0x383   : > { %v3115_v16 = vpop.f32.mrf.mxu0  ;;  %v3139_v51 = vpop.f32.mrf.mxu1 }
 0x385   : > { %v2760_v4 = vpop.f32.mrf.mxu0  ;;  %v2840_v22 = vpop.f32.mrf.mxu1 }
 0x386   : > { %2865 = vxpose.xlu1.b32.cont [7/16] (narrow) %v2730_v63, 16  ;;  %2897 = vxpose.xlu0.b32.cont [7/16] (narrow) %v2810_v31, 16 }
 0x387   : > { %v3118_v18 = vpop.f32.mrf.mxu0  ;;  %v3142_v37 = vpop.f32.mrf.mxu1 }
 0x389   : > { %v2770_v47 = vpop.f32.mrf.mxu0  ;;  %v2850_v52 = vpop.f32.mrf.mxu1 }
 0x38a   : > { %2866 = vxpose.xlu1.b32.cont [8/16] (narrow) %v3106_v60, 16  ;;  %2898 = vxpose.xlu0.b32.cont [8/16] (narrow) %v3130_v39, 16 }
 0x38e   : > { %2867 = vxpose.xlu1.b32.cont [9/16] (narrow) %v2740_v44, 16  ;;  %2899 = vxpose.xlu0.b32.cont [9/16] (narrow) %v2820_v23, 16 }
 0x392   : > { %2868 = vxpose.xlu1.b32.cont [10/16] (narrow) %v3109_v32, 16  ;;  %2900 = vxpose.xlu0.b32.cont [10/16] (narrow) %v3133_v24, 16 }
 0x396   : > { %2869 = vxpose.xlu1.b32.cont [11/16] (narrow) %v2750_v41, 16  ;;  %2901 = vxpose.xlu0.b32.cont [11/16] (narrow) %v2830_v48, 16 }
 0x39a   : > { %2870 = vxpose.xlu1.b32.cont [12/16] (narrow) %v3112_v10, 16  ;;  %2902 = vxpose.xlu0.b32.cont [12/16] (narrow) %v3136_v9, 16 }
 0x39e   : > { %2871 = vxpose.xlu1.b32.cont [13/16] (narrow) %v2760_v4, 16  ;;  %2903 = vxpose.xlu0.b32.cont [13/16] (narrow) %v2840_v22, 16 }
 0x3a2   : > { %2872 = vxpose.xlu1.b32.cont [14/16] (narrow) %v3115_v16, 16  ;;  %2904 = vxpose.xlu0.b32.cont [14/16] (narrow) %v3139_v51, 16 }
 0x3a6   : > { %2873 = vxpose.xlu1.b32.cont [15/16] (narrow) %v2770_v47, 16  ;;  %2905 = vxpose.xlu0.b32.cont [15/16] (narrow) %v2850_v52, 16 }
 0x3aa   : > { %2874 = vxpose.xlu1.b32.end [16/16] (narrow) %v3118_v18, 16  ;;  %2906 = vxpose.xlu0.b32.end [16/16] (narrow) %v3142_v37, 16 }
 0x3ea   : > { %v2875_v27 = vpop.trf.xlu1  ;;  %v2907_v46 = vpop.trf.xlu0 }
 0x3eb   : > { %v2930_v33 = vadd.f32 %v2925_v11, %v2875_v27  ;;  %v2931_v3 = vadd.f32 %v2925_v11, %v2907_v46 }
 0x3ed   : > { %2934 = vst [vmem:[%s217_s8] sm:$0xff] %v2930_v33  ;;  %2935 = vst [vmem:[%s217_s8 + $0x8] sm:$0xff] %v2931_v3 }
 0x3ee   : > { %v2876_v7 = vpop.trf.xlu1  ;;  %v2908_v5 = vpop.trf.xlu0 }
 0x3ef   : > { %v2932_v61 = vadd.f32 %v2929_v49, %v2876_v7  ;;  %v2933_v1 = vadd.f32 %v2929_v49, %v2908_v5 }
 0x3f1   : > { %2936 = vst [vmem:[%s217_s8 + $0x10] sm:$0xff] %v2932_v61  ;;  %2937 = vst [vmem:[%s217_s8 + $0x18] sm:$0xff] %v2933_v1 }
 0x3f2   : > { %3262 = shalt.err (!%p3259_p3)
}
 0x3f3   : > { %s3263_s23 = scalar_lea.hbm %s7262_s13, 512  ;;  %s3267_s30 = scalar_lea.hbm %s7309_s5, 1024 }
 0x3f4   : > { %p3264_p4 = scmp.ne.s32.totalorder %s7262_s13, %s3263_s23  ;;  %p3268_p9 = scmp.lt.s32.totalorder %s7262_s13, %s7309_s5 }
 0x3f5   : > { %p3269_p10 = scmp.lt.s32.totalorder %s3267_s30, %s3263_s23 }
 0x3f6   : > { %p3265_p7 = pnand %p3264_p4, %p3383_p5 }
 0x3f7   : > { %p3270_p11 = por %p3269_p10, %p3268_p9 }
 0x3f8   : > { %p3266_p8 = pneg %p3265_p7 }
 0x3fa   : > { %p3271_p12 = pnand %p3270_p11, %p3266_p8 }
 0x3fc   : > { %3274 = shalt.err (!%p3271_p12)
}
 0x3fd   : > { %s3313_s8 = smov 256   ;;  %s3314_s10 = smov 16  }
 0x3fe   : > { %3145 = dma.vmem_to_hbm [thread:$0]  (%p3383_p5), %s7257_s9, 512, %s7262_s13, %s7264_s14, %s3313_s8, %s3313_s8, %s3314_s10  }
 0x3ff PF: > { %p3151_p13 = scmp.ge.s32.totalorder %s3309_s21, 2  ;;  %s2967_s11 = sand.u32 1, %s3297_s18  }
 0x400   : > { %s2968_s12 = scalar_lea.sflag [#allocation4], %s2967_s11 }
 0x401   : > { %p3148_p0 = pnand %p3151_p13, %p3387_p6 }
 0x403   : > { %p3149_p1 = pneg %p3148_p0 }
 0x405   : > { %3292 = dma.done.wait (%p3149_p1), %s2968_s12, 512  }
 0x406   : > { %3294 = vsyncadd (%p3149_p1), %s2968_s12, 4294966784  ;;  %p15_p2 = scmp.ge.s32.totalorder %s3370_s24, 4   ;;  %s8551_s18 = smov %s3301_s19 }
 0x407   : > { %s8552_s19 = smov %s3305_s20  ;;  %s8553_s20 = smov %s3381_s27 }
 0x408   : > { %s8554_s21 = smov %s3370_s24  ;;  %17 = sbr.rel (!%p15_p2) target bundleno = 3 (0x3), region = 76 }
 0x40d   :  { %2973 = vsyncpa [#allocation4], 1 }
 0x40e   :  { %2975 = vsyncpa [#allocation4 + $0x1], 1 }

</bundles_post_ra>
